<compile_context>
chip_gen: v5e
topology: v5e:2x2
jax: 0.10.0
libtpu: 0.0.40
codegen_flags: <defaults>
</compile_context>

<pallas_src>
import jax
import jax.numpy as jnp
from jax import lax
from jax.experimental import pallas as pl
from jax.experimental.pallas import tpu as pltpu

EPS = 1e-5
F32 = jnp.float32
BF16 = jnp.bfloat16
VMEM_LIMIT = 64 * 1024 * 1024   # raised scoped-VMEM ceiling (<= physical on v5e/v6e/v7x)


def _full_spec(shape):
    n = len(shape)
    return pl.BlockSpec(shape, lambda *_, n=n: (0,) * n)


def _mxu_dot(a, b):
    """bf16-operand MXU matmul with f32 accumulation."""
    return jnp.dot(a.astype(BF16), b.astype(BF16), preferred_element_type=F32)


def _bn_relu(h, gamma, beta, relu=True):
    """Training-mode BatchNorm over columns (+ optional ReLU), all in f32."""
    mean = jnp.mean(h, axis=1, keepdims=True)
    var = jnp.mean(jnp.square(h - mean), axis=1, keepdims=True)
    h = gamma * (h - mean) * lax.rsqrt(var + EPS) + beta
    return jnp.maximum(h, 0.0) if relu else h


# --------------------------------------------------------------------------
# Generic pointwise-MLP stack kernel: chain of (W @ h [+ b]) -> BN(train) ->
# ReLU with an optional contiguous max-reduction over the column axis.
# --------------------------------------------------------------------------
def make_mlp_kernel(n_layers, bn_flags, relu_flags, reduce_cfg):
    """reduce_cfg:
      None                               -> emit (C_out, P)
      ("block_max", n_outer, n_inner, w) -> cols ordered (outer, inner, w);
                                            elementwise max over `inner`;
                                            emit (C_out, n_outer*w)
      ("lane_max", n_groups, w)          -> cols ordered (group, w); cross-lane
                                            max per group; emit (C_out, n_groups)
    """
    def kernel(*refs):
        h = refs[0][...]
        out_ref = refs[-1]
        params = refs[1:-1]
        p = 0
        for i in range(n_layers):
            W = params[p][...]
            p += 1
            h = _mxu_dot(W, h)
            if bn_flags[i]:
                # NOTE: conv bias is skipped -- exactly cancelled by train-mode BN mean.
                gamma, beta = params[p][...], params[p + 1][...]
                p += 2
                h = _bn_relu(h, gamma, beta, relu=relu_flags[i])
            else:
                h = h + params[p][...]
                p += 1
                if relu_flags[i]:
                    h = jnp.maximum(h, 0.0)

        if reduce_cfg is None:
            out_ref[...] = h
        elif reduce_cfg[0] == "block_max":
            _, n_outer, n_inner, w = reduce_cfg
            parts = []
            for bo in range(n_outer):
                base = bo * n_inner * w
                acc = h[:, base:base + w]
                for j in range(1, n_inner):
                    acc = jnp.maximum(acc, h[:, base + j * w: base + (j + 1) * w])
                parts.append(acc)
            out_ref[...] = parts[0] if n_outer == 1 else jnp.concatenate(parts, axis=1)
        else:  # "lane_max"
            _, n_groups, w = reduce_cfg
            cols = [jnp.max(h[:, g * w:(g + 1) * w], axis=1, keepdims=True)
                    for g in range(n_groups)]
            out_ref[...] = cols[0] if n_groups == 1 else jnp.concatenate(cols, axis=1)

    return kernel


def mlp(hin, layers, reduce_cfg=None):
    bn_flags = [l["gamma"] is not None for l in layers]
    relu_flags = [l["relu"] for l in layers]
    kernel = make_mlp_kernel(len(layers), bn_flags, relu_flags, reduce_cfg)
    args, in_specs = [hin], [_full_spec(hin.shape)]
    for l, bn in zip(layers, bn_flags):
        names = ("W", "gamma", "beta") if bn else ("W", "b")   # no bias DMA for BN layers
        for nm in names:
            args.append(l[nm])
            in_specs.append(_full_spec(l[nm].shape))
    cout = layers[-1]["W"].shape[0]
    P = hin.shape[1]
    if reduce_cfg is None:
        Q = P
    elif reduce_cfg[0] == "block_max":
        Q = reduce_cfg[1] * reduce_cfg[3]
    else:
        Q = reduce_cfg[1]
    return pl.pallas_call(
        kernel,
        grid=(1,),
        in_specs=in_specs,
        out_specs=_full_spec((cout, Q)),
        out_shape=jax.ShapeDtypeStruct((cout, Q), F32),
        compiler_params=pltpu.CompilerParams(vmem_limit_bytes=VMEM_LIMIT),
    )(*args)


# --------------------------------------------------------------------------
# Aggregation stage: agg_conv1(concat(local, broadcast(global))) -> BN+ReLU ->
# agg_conv2 -> BN+ReLU -> max over N.  The global feature is broadcast inside
# the kernel (no (bt, B*N) HBM round trip) and agg_conv1 is split into its
# local / global column blocks.
# --------------------------------------------------------------------------
def make_agg_kernel(B, N):
    def kernel(loc_ref, gf_ref, w1l_ref, w1g_ref, g1_ref, be1_ref,
               w2_ref, g2_ref, be2_ref, out_ref):
        loc = loc_ref[...]                               # (local_bt, B*N), cols (b, n)
        gf = gf_ref[...]                                 # (bottleneck, B)
        t = _mxu_dot(w1g_ref[...], gf)                   # (128, B) global branch
        tg = jnp.concatenate(
            [jnp.broadcast_to(t[:, b:b + 1], (t.shape[0], N)) for b in range(B)],
            axis=1)                                      # (128, B*N), VMEM-only broadcast
        h = _mxu_dot(w1l_ref[...], loc) + tg             # bias skipped (BN follows)
        h = _bn_relu(h, g1_ref[...], be1_ref[...])
        h = _mxu_dot(w2_ref[...], h)
        h = _bn_relu(h, g2_ref[...], be2_ref[...])
        cols = [jnp.max(h[:, b * N:(b + 1) * N], axis=1, keepdims=True)
                for b in range(B)]
        out_ref[...] = cols[0] if B == 1 else jnp.concatenate(cols, axis=1)

    return kernel


def agg_stage(local_feat, gfeat, agg, B, N):
    args = [local_feat, gfeat, agg["W1l"], agg["W1g"], agg["g1"], agg["be1"],
            agg["W2"], agg["g2"], agg["be2"]]
    bt = agg["W2"].shape[0]
    return pl.pallas_call(
        make_agg_kernel(B, N),
        grid=(1,),
        in_specs=[_full_spec(a.shape) for a in args],
        out_specs=_full_spec((bt, B)),
        out_shape=jax.ShapeDtypeStruct((bt, B), F32),
        compiler_params=pltpu.CompilerParams(vmem_limit_bytes=VMEM_LIMIT),
    )(*args)


# --------------------------------------------------------------------------
# FC head on a (B, C) slab: batch on sublanes, features on lanes (lane-dense).
# --------------------------------------------------------------------------
def make_fc_kernel(n_layers, bn_flags, relu_flags):
    def kernel(*refs):
        h = refs[0][...]                                 # (B, C_in)
        out_ref = refs[-1]
        params = refs[1:-1]
        p = 0
        for i in range(n_layers):
            WT = params[p][...]                          # (cin, cout)
            p += 1
            h = _mxu_dot(h, WT)                          # (B, cout)
            if bn_flags[i]:
                gamma, beta = params[p][...], params[p + 1][...]   # (1, cout)
                p += 2
                mean = jnp.mean(h, axis=0, keepdims=True)
                var = jnp.mean(jnp.square(h - mean), axis=0, keepdims=True)
                h = gamma * (h - mean) * lax.rsqrt(var + EPS) + beta
            else:
                h = h + params[p][...]
                p += 1
            if relu_flags[i]:
                h = jnp.maximum(h, 0.0)
        out_ref[...] = h

    return kernel


def fc_head(y, layers):
    bn_flags = [l["gamma"] is not None for l in layers]
    relu_flags = [l["relu"] for l in layers]
    kernel = make_fc_kernel(len(layers), bn_flags, relu_flags)
    args, in_specs = [y], [_full_spec(y.shape)]
    for l, bn in zip(layers, bn_flags):
        wt = jnp.transpose(l["W"])                       # tiny weight transpose, outside kernel
        args.append(wt)
        in_specs.append(_full_spec(wt.shape))
        extra = ("gamma", "beta") if bn else ("b",)
        for nm in extra:
            a = jnp.transpose(l[nm])                     # (1, cout) rows
            args.append(a)
            in_specs.append(_full_spec(a.shape))
    B = y.shape[0]
    cout = layers[-1]["W"].shape[0]
    return pl.pallas_call(
        kernel,
        grid=(1,),
        in_specs=in_specs,
        out_specs=_full_spec((B, cout)),
        out_shape=jax.ShapeDtypeStruct((B, cout), F32),
        compiler_params=pltpu.CompilerParams(vmem_limit_bytes=VMEM_LIMIT),
    )(*args)


# --------------------------------------------------------------------------
# Patcher(k): kNN grouping (self included) + mean-centering of each patch
# (ops.normalize_group, method='mean').  Distance matrix and gathers on the
# MXU; output is the channel-major, lane-dense slab (3, B*k, N).
# --------------------------------------------------------------------------
def make_patch_kernel(k, n):
    big = 1e30

    def kernel(x_ref, xt_ref, out_ref):
        xs = x_ref[0]                                    # (3, N)
        xt = xt_ref[0]                                   # (N, 3)
        # D[m, i] = ||x_m||^2 + ||x_i||^2 - 2 <x_m, x_i>  (cross term on the MXU)
        cross = jnp.dot(xt, xs, preferred_element_type=F32)       # (N, N)
        sq = xs * xs
        nrm_row = sq[0:1, :] + sq[1:2, :] + sq[2:3, :]            # (1, N)
        nrm_col = jnp.sum(xt * xt, axis=1, keepdims=True)         # (N, 1)
        D = nrm_col + nrm_row - 2.0 * cross
        rows = lax.broadcasted_iota(jnp.int32, (n, n), 0).astype(F32)
        sum_cn = jnp.zeros((3, n), F32)
        for j in range(k):
            mn = jnp.min(D, axis=0, keepdims=True)                # (1, N)
            cand = jnp.where(D <= mn, rows, float(n))
            sel = jnp.min(cand, axis=0, keepdims=True)            # first argmin (lowest index)
            onehot = (rows == sel).astype(F32)                    # (N, N), one 1 per column
            g = jnp.dot(xs, onehot, preferred_element_type=F32)   # (3, N): g[:, i] = xs[:, sel_i]
            out_ref[:, j, :] = g                                  # lane-dense store
            sum_cn = sum_cn + g
            D = jnp.where(rows == sel, big, D)
        mean = sum_cn * (1.0 / k)                                 # mean-center each patch
        out_ref[...] = out_ref[...] - mean[:, None, :]

    return kernel


def patcher_normalized(x, xt, k):
    """Returns mean-centered kNN patches as a channel-major (3, B*k, N) slab."""
    B, _, N = x.shape
    return pl.pallas_call(
        make_patch_kernel(k, N),
        grid=(B,),
        in_specs=[pl.BlockSpec((1, 3, N), lambda b: (b, 0, 0)),
                  pl.BlockSpec((1, N, 3), lambda b: (b, 0, 0))],
        out_specs=pl.BlockSpec((3, k, N), lambda b: (0, b, 0)),
        out_shape=jax.ShapeDtypeStruct((B * 0 + 3, B * k, N), F32),
        compiler_params=pltpu.CompilerParams(
            dimension_semantics=("parallel",), vmem_limit_bytes=VMEM_LIMIT),
    )(x, xt)


# --------------------------------------------------------------------------
# SoftProjection: soft weighted average of the `group_size` nearest cloud
# points for each query, weights = softmax(-||q - p||^2 / sigma).
# Streaming softmax (neighbors found in non-decreasing distance order, so the
# first logit is the max) keeps live ranges small; output is (B, 3, M).
# --------------------------------------------------------------------------
def make_project_kernel(group_size, sigma, n, m):
    inv_sigma = 1.0 / sigma
    big = 1e30

    def kernel(x_ref, xt_ref, q_ref, out_ref):
        xs = x_ref[0]                                    # (3, N)
        xt = xt_ref[0]                                   # (N, 3)
        qs = q_ref[0]                                    # (3, M)
        cross = jnp.dot(xt, qs, preferred_element_type=F32)       # (N, M) on the MXU
        sqq = qs * qs
        nrm_q = sqq[0:1, :] + sqq[1:2, :] + sqq[2:3, :]           # (1, M)
        nrm_x = jnp.sum(xt * xt, axis=1, keepdims=True)           # (N, 1)
        D = nrm_x + nrm_q - 2.0 * cross
        rows = lax.broadcasted_iota(jnp.int32, (n, m), 0).astype(F32)
        num = jnp.zeros((3, m), F32)
        denom = jnp.zeros((1, m), F32)
        maxl = jnp.zeros((1, m), F32)
        for j in range(group_size):
            mn = jnp.min(D, axis=0, keepdims=True)                # (1, M)
            cand = jnp.where(D <= mn, rows, float(n))
            sel = jnp.min(cand, axis=0, keepdims=True)
            onehot = (rows == sel).astype(F32)
            g = jnp.dot(xs, onehot, preferred_element_type=F32)   # (3, M) gathered point
            logit = -mn * inv_sigma
            if j == 0:
                maxl = logit          # distances are non-decreasing -> max logit
            w = jnp.exp(logit - maxl)
            denom = denom + w
            num = num + w * g
            D = jnp.where(rows == sel, big, D)
        out_ref[0] = num * pl.reciprocal(denom, approx=True)      # divide on the EUP

    return kernel


def soft_project(x, xt, simp, group_size, sigma):
    B, _, N = x.shape
    M = simp.shape[2]
    return pl.pallas_call(
        make_project_kernel(group_size, sigma, N, M),
        grid=(B,),
        in_specs=[pl.BlockSpec((1, 3, N), lambda b: (b, 0, 0)),
                  pl.BlockSpec((1, N, 3), lambda b: (b, 0, 0)),
                  pl.BlockSpec((1, 3, M), lambda b: (b, 0, 0))],
        out_specs=pl.BlockSpec((1, 3, M), lambda b: (b, 0, 0)),
        out_shape=jax.ShapeDtypeStruct((B, 3, M), F32),
        compiler_params=pltpu.CompilerParams(
            dimension_semantics=("parallel",), vmem_limit_bytes=VMEM_LIMIT),
    )(x, xt, simp)


# --------------------------------------------------------------------------
# Deterministic parameter init (PyTorch-style uniform for conv/linear, BN=1/0)
# --------------------------------------------------------------------------
def _linear_init(key, cout, cin):
    k1, k2 = jax.random.split(key)
    bound = 1.0 / (cin ** 0.5)
    W = jax.random.uniform(k1, (cout, cin), minval=-bound, maxval=bound, dtype=F32)
    b = jax.random.uniform(k2, (cout, 1), minval=-bound, maxval=bound, dtype=F32)
    return W, b


def _layer(key, cin, cout, bn=True, relu=True):
    W, b = _linear_init(key, cout, cin)
    gamma = jnp.ones((cout, 1), F32) if bn else None
    beta = jnp.zeros((cout, 1), F32) if bn else None
    return dict(W=W, b=b, gamma=gamma, beta=beta, relu=relu)


def init_params(key, bottleneck, num_out, local_bt):
    keys = iter(jax.random.split(key, 16))
    params = {}
    params["global"] = [_layer(next(keys), 3, 64), _layer(next(keys), 64, 64),
                        _layer(next(keys), 64, 64), _layer(next(keys), 64, 128),
                        _layer(next(keys), 128, bottleneck)]
    params["patch"] = [_layer(next(keys), 3, 32), _layer(next(keys), 32, 32),
                       _layer(next(keys), 32, local_bt)]
    agg1 = _layer(next(keys), local_bt + bottleneck, 128)
    agg2 = _layer(next(keys), 128, bottleneck)
    params["agg"] = dict(
        W1l=agg1["W"][:, :local_bt],          # multiplies the local features
        W1g=agg1["W"][:, local_bt:],          # multiplies the broadcast global feature
        g1=agg1["gamma"], be1=agg1["beta"],
        W2=agg2["W"], g2=agg2["gamma"], be2=agg2["beta"])
    params["fc"] = [_layer(next(keys), bottleneck, 256), _layer(next(keys), 256, 256),
                    _layer(next(keys), 256, 256),
                    _layer(next(keys), 256, 3 * num_out, bn=False, relu=False)]
    # SoftProjection: sigma = max(temperature**2, min_sigma), temperature=1.0, min_sigma=0.01
    params["sigma"] = max(1.0 ** 2, 0.01)
    return params


# --------------------------------------------------------------------------
# Forward pass (SampleNetPlus.forward, input_shape = output_shape = 'bcn')
# --------------------------------------------------------------------------
def samplenet_plus_forward(x, params, num_out_points, group_size, k_patch):
    B, C, N = x.shape
    assert C == 3, "shape of x must be [batch x 3 x num_in_points]"
    xt = jnp.transpose(x, (0, 2, 1))                        # (B, N, 3), shared by kNN kernels

    # ---- encode_local: Patcher + normalize + SharedMLP + max over k ----
    patches = patcher_normalized(x, xt, k_patch)            # (3, B*k, N), lane-dense
    pe_in = patches.reshape(3, B * k_patch * N)             # contiguous reshape, cols (b, k, n)
    local_feat = mlp(pe_in, params["patch"],
                     reduce_cfg=("block_max", B, k_patch, N))   # (local_bt, B*N), cols (b, n)

    # ---- encode_global: conv stack + max over N ----
    xg_in = jnp.transpose(x, (1, 0, 2)).reshape(3, B * N)   # cols (b, n)
    gfeat = mlp(xg_in, params["global"],
                reduce_cfg=("lane_max", B, N))              # (bottleneck, B)

    # ---- aggregation: concat(local, broadcast(global)) -> agg convs -> max over N ----
    yagg = agg_stage(local_feat, gfeat, params["agg"], B, N)    # (bottleneck, B)

    # ---- FC head (batch on sublanes, features on lanes) ----
    yfc = fc_head(jnp.transpose(yagg), params["fc"])        # (B, 3*num_out_points)
    simp = yfc.reshape(B, 3, num_out_points)

    # ---- SoftProjection (training path, skip_projection=False) ----
    proj = soft_project(x, xt, simp, group_size, params["sigma"])   # (B, 3, M)
    return simp, proj


if __name__ == "__main__":
    B, N = 2, 64
    NUM_OUT_POINTS = 16
    BOTTLENECK = 64
    GROUP_SIZE = 8
    K_PATCH = 16          # Patcher(k=16)
    LOCAL_BT = 32         # local_bottleneck_size

    key = jax.random.PRNGKey(0)
    key, kx = jax.random.split(key)
    x = jax.random.normal(kx, (B, 3, N), dtype=jnp.float32)

    params = init_params(key, BOTTLENECK, NUM_OUT_POINTS, LOCAL_BT)
    simp, out = samplenet_plus_forward(x, params, NUM_OUT_POINTS, GROUP_SIZE, K_PATCH)
    jax.block_until_ready((simp, out))
    assert simp.shape == (B, 3, NUM_OUT_POINTS)
    assert out.shape == (B, 3, NUM_OUT_POINTS)
    print("KERNEL_OK")
</pallas_src>

<mosaic_0001>
module attributes {stable_mosaic.version = 11 : i64} {
  func.func @kernel(%arg0: i32, %arg1: memref<1x3x64xf32, #tpu.memory_space<vmem>>, %arg2: memref<1x64x3xf32, #tpu.memory_space<vmem>>, %arg3: memref<3x16x64xf32, #tpu.memory_space<vmem>>) attributes {dimension_semantics = [#tpu.dimension_semantics<parallel>], iteration_bounds = array<i64: 2>, scalar_prefetch = 0 : i64, scratch_operands = 0 : i64, tpu.core_type = #tpu.core_type<tc>, window_params = [{transform_indices = @transform_0, window_bounds = array<i64: 1, 3, 64>}, {transform_indices = @transform_1, window_bounds = array<i64: 1, 64, 3>}, {transform_indices = @transform_2, window_bounds = array<i64: 3, 16, 64>}]} {
    %c0 = arith.constant 0 : index
    %c0_0 = arith.constant 0 : index
    %c0_1 = arith.constant 0 : index
    %0 = vector.load %arg1[%c0, %c0_0, %c0_1] : memref<1x3x64xf32, #tpu.memory_space<vmem>>, vector<1x3x64xf32>
    %1 = vector.shape_cast %0 : vector<1x3x64xf32> to vector<3x64xf32>
    %c0_2 = arith.constant 0 : index
    %c0_3 = arith.constant 0 : index
    %c0_4 = arith.constant 0 : index
    %2 = vector.load %arg2[%c0_2, %c0_3, %c0_4] : memref<1x64x3xf32, #tpu.memory_space<vmem>>, vector<1x64x3xf32>
    %3 = vector.shape_cast %2 : vector<1x64x3xf32> to vector<64x3xf32>
    %cst = arith.constant dense<0.000000e+00> : vector<64x64xf32>
    %4 = tpu.matmul %3, %1, %cst {dimension_numbers = #tpu.dot_dimension_numbers<[1], [0], [0], [1], [0, 0, 1, 1], [], []>} : vector<64x3xf32>, vector<3x64xf32>, vector<64x64xf32> -> vector<64x64xf32>
    %5 = arith.mulf %1, %1 : vector<3x64xf32>
    %6 = vector.extract_strided_slice %5 {offsets = [0, 0], sizes = [1, 64], strides = [1, 1]} : vector<3x64xf32> to vector<1x64xf32>
    %7 = vector.extract_strided_slice %5 {offsets = [1, 0], sizes = [1, 64], strides = [1, 1]} : vector<3x64xf32> to vector<1x64xf32>
    %8 = arith.addf %6, %7 : vector<1x64xf32>
    %9 = vector.extract_strided_slice %5 {offsets = [2, 0], sizes = [1, 64], strides = [1, 1]} : vector<3x64xf32> to vector<1x64xf32>
    %10 = arith.addf %8, %9 : vector<1x64xf32>
    %11 = arith.mulf %3, %3 : vector<64x3xf32>
    %cst_5 = arith.constant dense<0.000000e+00> : vector<64xf32>
    %12 = vector.multi_reduction <add>, %11, %cst_5 [1] : vector<64x3xf32> to vector<64xf32>
    %13 = vector.shape_cast %12 : vector<64xf32> to vector<64x1xf32>
    %14 = vector.broadcast %13 : vector<64x1xf32> to vector<64x64xf32>
    %15 = vector.broadcast %10 : vector<1x64xf32> to vector<64x64xf32>
    %16 = arith.addf %14, %15 : vector<64x64xf32>
    %cst_6 = arith.constant 2.000000e+00 : f32
    %17 = vector.broadcast %cst_6 : f32 to vector<64x64xf32>
    %18 = arith.mulf %17, %4 : vector<64x64xf32>
    %19 = arith.subf %16, %18 : vector<64x64xf32>
    %20 = tpu.iota {dimensions = array<i32: 0>} : vector<64x64xi32>
    %21 = arith.sitofp %20 : vector<64x64xi32> to vector<64x64xf32>
    %cst_7 = arith.constant 0.000000e+00 : f32
    %22 = vector.broadcast %cst_7 : f32 to vector<3x64xf32>
    %cst_8 = arith.constant dense<0x7F800000> : vector<64xf32>
    %23 = vector.multi_reduction <minimumf>, %19, %cst_8 [0] : vector<64x64xf32> to vector<64xf32>
    %24 = vector.shape_cast %23 : vector<64xf32> to vector<1x64xf32>
    %25 = vector.broadcast %24 : vector<1x64xf32> to vector<64x64xf32>
    %26 = arith.cmpf ole, %19, %25 : vector<64x64xf32>
    %cst_9 = arith.constant 6.400000e+01 : f32
    %27 = vector.broadcast %cst_9 : f32 to vector<64x64xf32>
    %28 = arith.select %26, %21, %27 : vector<64x64xi1>, vector<64x64xf32>
    %cst_10 = arith.constant dense<0x7F800000> : vector<64xf32>
    %29 = vector.multi_reduction <minimumf>, %28, %cst_10 [0] : vector<64x64xf32> to vector<64xf32>
    %30 = vector.shape_cast %29 : vector<64xf32> to vector<1x64xf32>
    %31 = vector.broadcast %30 : vector<1x64xf32> to vector<64x64xf32>
    %32 = arith.cmpf oeq, %21, %31 : vector<64x64xf32>
    %33 = arith.extui %32 : vector<64x64xi1> to vector<64x64xi32>
    %34 = arith.sitofp %33 : vector<64x64xi32> to vector<64x64xf32>
    %cst_11 = arith.constant dense<0.000000e+00> : vector<3x64xf32>
    %35 = tpu.matmul %1, %34, %cst_11 {dimension_numbers = #tpu.dot_dimension_numbers<[1], [0], [0], [1], [0, 0, 1, 1], [], []>} : vector<3x64xf32>, vector<64x64xf32>, vector<3x64xf32> -> vector<3x64xf32>
    %c0_12 = arith.constant 0 : index
    %c0_13 = arith.constant 0 : index
    %c0_14 = arith.constant 0 : index
    %36 = vector.load %arg3[%c0_12, %c0_13, %c0_14] : memref<3x16x64xf32, #tpu.memory_space<vmem>>, vector<3x1x64xf32>
    %37 = vector.shape_cast %36 : vector<3x1x64xf32> to vector<3x64xf32>
    %38 = vector.shape_cast %35 : vector<3x64xf32> to vector<3x1x64xf32>
    tpu.vector_store %arg3[%c0_12, %c0_13, %c0_14], %38 {strides = array<i32>} : memref<3x16x64xf32, #tpu.memory_space<vmem>>, vector<3x1x64xf32>,
    %39 = arith.addf %22, %35 : vector<3x64xf32>
    %40 = vector.broadcast %30 : vector<1x64xf32> to vector<64x64xf32>
    %41 = arith.cmpf oeq, %21, %40 : vector<64x64xf32>
    %cst_15 = arith.constant 1.000000e+30 : f32
    %42 = vector.broadcast %cst_15 : f32 to vector<64x64xf32>
    %43 = arith.select %41, %42, %19 : vector<64x64xi1>, vector<64x64xf32>
    %cst_16 = arith.constant dense<0x7F800000> : vector<64xf32>
    %44 = vector.multi_reduction <minimumf>, %43, %cst_16 [0] : vector<64x64xf32> to vector<64xf32>
    %45 = vector.shape_cast %44 : vector<64xf32> to vector<1x64xf32>
    %46 = vector.broadcast %45 : vector<1x64xf32> to vector<64x64xf32>
    %47 = arith.cmpf ole, %43, %46 : vector<64x64xf32>
    %cst_17 = arith.constant 6.400000e+01 : f32
    %48 = vector.broadcast %cst_17 : f32 to vector<64x64xf32>
    %49 = arith.select %47, %21, %48 : vector<64x64xi1>, vector<64x64xf32>
    %cst_18 = arith.constant dense<0x7F800000> : vector<64xf32>
    %50 = vector.multi_reduction <minimumf>, %49, %cst_18 [0] : vector<64x64xf32> to vector<64xf32>
    %51 = vector.shape_cast %50 : vector<64xf32> to vector<1x64xf32>
    %52 = vector.broadcast %51 : vector<1x64xf32> to vector<64x64xf32>
    %53 = arith.cmpf oeq, %21, %52 : vector<64x64xf32>
    %54 = arith.extui %53 : vector<64x64xi1> to vector<64x64xi32>
    %55 = arith.sitofp %54 : vector<64x64xi32> to vector<64x64xf32>
    %cst_19 = arith.constant dense<0.000000e+00> : vector<3x64xf32>
    %56 = tpu.matmul %1, %55, %cst_19 {dimension_numbers = #tpu.dot_dimension_numbers<[1], [0], [0], [1], [0, 0, 1, 1], [], []>} : vector<3x64xf32>, vector<64x64xf32>, vector<3x64xf32> -> vector<3x64xf32>
    %c0_20 = arith.constant 0 : index
    %c1 = arith.constant 1 : index
    %c0_21 = arith.constant 0 : index
    %57 = vector.load %arg3[%c0_20, %c1, %c0_21] : memref<3x16x64xf32, #tpu.memory_space<vmem>>, vector<3x1x64xf32>
    %58 = vector.shape_cast %57 : vector<3x1x64xf32> to vector<3x64xf32>
    %59 = vector.shape_cast %56 : vector<3x64xf32> to vector<3x1x64xf32>
    tpu.vector_store %arg3[%c0_20, %c1, %c0_21], %59 {strides = array<i32>} : memref<3x16x64xf32, #tpu.memory_space<vmem>>, vector<3x1x64xf32>,
    %60 = arith.addf %39, %56 : vector<3x64xf32>
    %61 = vector.broadcast %51 : vector<1x64xf32> to vector<64x64xf32>
    %62 = arith.cmpf oeq, %21, %61 : vector<64x64xf32>
    %cst_22 = arith.constant 1.000000e+30 : f32
    %63 = vector.broadcast %cst_22 : f32 to vector<64x64xf32>
    %64 = arith.select %62, %63, %43 : vector<64x64xi1>, vector<64x64xf32>
    %cst_23 = arith.constant dense<0x7F800000> : vector<64xf32>
    %65 = vector.multi_reduction <minimumf>, %64, %cst_23 [0] : vector<64x64xf32> to vector<64xf32>
    %66 = vector.shape_cast %65 : vector<64xf32> to vector<1x64xf32>
    %67 = vector.broadcast %66 : vector<1x64xf32> to vector<64x64xf32>
    %68 = arith.cmpf ole, %64, %67 : vector<64x64xf32>
    %cst_24 = arith.constant 6.400000e+01 : f32
    %69 = vector.broadcast %cst_24 : f32 to vector<64x64xf32>
    %70 = arith.select %68, %21, %69 : vector<64x64xi1>, vector<64x64xf32>
    %cst_25 = arith.constant dense<0x7F800000> : vector<64xf32>
    %71 = vector.multi_reduction <minimumf>, %70, %cst_25 [0] : vector<64x64xf32> to vector<64xf32>
    %72 = vector.shape_cast %71 : vector<64xf32> to vector<1x64xf32>
    %73 = vector.broadcast %72 : vector<1x64xf32> to vector<64x64xf32>
    %74 = arith.cmpf oeq, %21, %73 : vector<64x64xf32>
    %75 = arith.extui %74 : vector<64x64xi1> to vector<64x64xi32>
    %76 = arith.sitofp %75 : vector<64x64xi32> to vector<64x64xf32>
    %cst_26 = arith.constant dense<0.000000e+00> : vector<3x64xf32>
    %77 = tpu.matmul %1, %76, %cst_26 {dimension_numbers = #tpu.dot_dimension_numbers<[1], [0], [0], [1], [0, 0, 1, 1], [], []>} : vector<3x64xf32>, vector<64x64xf32>, vector<3x64xf32> -> vector<3x64xf32>
    %c0_27 = arith.constant 0 : index
    %c2 = arith.constant 2 : index
    %c0_28 = arith.constant 0 : index
    %78 = vector.load %arg3[%c0_27, %c2, %c0_28] : memref<3x16x64xf32, #tpu.memory_space<vmem>>, vector<3x1x64xf32>
    %79 = vector.shape_cast %78 : vector<3x1x64xf32> to vector<3x64xf32>
    %80 = vector.shape_cast %77 : vector<3x64xf32> to vector<3x1x64xf32>
    tpu.vector_store %arg3[%c0_27, %c2, %c0_28], %80 {strides = array<i32>} : memref<3x16x64xf32, #tpu.memory_space<vmem>>, vector<3x1x64xf32>,
    %81 = arith.addf %60, %77 : vector<3x64xf32>
    %82 = vector.broadcast %72 : vector<1x64xf32> to vector<64x64xf32>
    %83 = arith.cmpf oeq, %21, %82 : vector<64x64xf32>
    %cst_29 = arith.constant 1.000000e+30 : f32
    %84 = vector.broadcast %cst_29 : f32 to vector<64x64xf32>
    %85 = arith.select %83, %84, %64 : vector<64x64xi1>, vector<64x64xf32>
    %cst_30 = arith.constant dense<0x7F800000> : vector<64xf32>
    %86 = vector.multi_reduction <minimumf>, %85, %cst_30 [0] : vector<64x64xf32> to vector<64xf32>
    %87 = vector.shape_cast %86 : vector<64xf32> to vector<1x64xf32>
    %88 = vector.broadcast %87 : vector<1x64xf32> to vector<64x64xf32>
    %89 = arith.cmpf ole, %85, %88 : vector<64x64xf32>
    %cst_31 = arith.constant 6.400000e+01 : f32
    %90 = vector.broadcast %cst_31 : f32 to vector<64x64xf32>
    %91 = arith.select %89, %21, %90 : vector<64x64xi1>, vector<64x64xf32>
    %cst_32 = arith.constant dense<0x7F800000> : vector<64xf32>
    %92 = vector.multi_reduction <minimumf>, %91, %cst_32 [0] : vector<64x64xf32> to vector<64xf32>
    %93 = vector.shape_cast %92 : vector<64xf32> to vector<1x64xf32>
    %94 = vector.broadcast %93 : vector<1x64xf32> to vector<64x64xf32>
    %95 = arith.cmpf oeq, %21, %94 : vector<64x64xf32>
    %96 = arith.extui %95 : vector<64x64xi1> to vector<64x64xi32>
    %97 = arith.sitofp %96 : vector<64x64xi32> to vector<64x64xf32>
    %cst_33 = arith.constant dense<0.000000e+00> : vector<3x64xf32>
    %98 = tpu.matmul %1, %97, %cst_33 {dimension_numbers = #tpu.dot_dimension_numbers<[1], [0], [0], [1], [0, 0, 1, 1], [], []>} : vector<3x64xf32>, vector<64x64xf32>, vector<3x64xf32> -> vector<3x64xf32>
    %c0_34 = arith.constant 0 : index
    %c3 = arith.constant 3 : index
    %c0_35 = arith.constant 0 : index
    %99 = vector.load %arg3[%c0_34, %c3, %c0_35] : memref<3x16x64xf32, #tpu.memory_space<vmem>>, vector<3x1x64xf32>
    %100 = vector.shape_cast %99 : vector<3x1x64xf32> to vector<3x64xf32>
    %101 = vector.shape_cast %98 : vector<3x64xf32> to vector<3x1x64xf32>
    tpu.vector_store %arg3[%c0_34, %c3, %c0_35], %101 {strides = array<i32>} : memref<3x16x64xf32, #tpu.memory_space<vmem>>, vector<3x1x64xf32>,
    %102 = arith.addf %81, %98 : vector<3x64xf32>
    %103 = vector.broadcast %93 : vector<1x64xf32> to vector<64x64xf32>
    %104 = arith.cmpf oeq, %21, %103 : vector<64x64xf32>
    %cst_36 = arith.constant 1.000000e+30 : f32
    %105 = vector.broadcast %cst_36 : f32 to vector<64x64xf32>
    %106 = arith.select %104, %105, %85 : vector<64x64xi1>, vector<64x64xf32>
    %cst_37 = arith.constant dense<0x7F800000> : vector<64xf32>
    %107 = vector.multi_reduction <minimumf>, %106, %cst_37 [0] : vector<64x64xf32> to vector<64xf32>
    %108 = vector.shape_cast %107 : vector<64xf32> to vector<1x64xf32>
    %109 = vector.broadcast %108 : vector<1x64xf32> to vector<64x64xf32>
    %110 = arith.cmpf ole, %106, %109 : vector<64x64xf32>
    %cst_38 = arith.constant 6.400000e+01 : f32
    %111 = vector.broadcast %cst_38 : f32 to vector<64x64xf32>
    %112 = arith.select %110, %21, %111 : vector<64x64xi1>, vector<64x64xf32>
    %cst_39 = arith.constant dense<0x7F800000> : vector<64xf32>
    %113 = vector.multi_reduction <minimumf>, %112, %cst_39 [0] : vector<64x64xf32> to vector<64xf32>
    %114 = vector.shape_cast %113 : vector<64xf32> to vector<1x64xf32>
    %115 = vector.broadcast %114 : vector<1x64xf32> to vector<64x64xf32>
    %116 = arith.cmpf oeq, %21, %115 : vector<64x64xf32>
    %117 = arith.extui %116 : vector<64x64xi1> to vector<64x64xi32>
    %118 = arith.sitofp %117 : vector<64x64xi32> to vector<64x64xf32>
    %cst_40 = arith.constant dense<0.000000e+00> : vector<3x64xf32>
    %119 = tpu.matmul %1, %118, %cst_40 {dimension_numbers = #tpu.dot_dimension_numbers<[1], [0], [0], [1], [0, 0, 1, 1], [], []>} : vector<3x64xf32>, vector<64x64xf32>, vector<3x64xf32> -> vector<3x64xf32>
    %c0_41 = arith.constant 0 : index
    %c4 = arith.constant 4 : index
    %c0_42 = arith.constant 0 : index
    %120 = vector.load %arg3[%c0_41, %c4, %c0_42] : memref<3x16x64xf32, #tpu.memory_space<vmem>>, vector<3x1x64xf32>
    %121 = vector.shape_cast %120 : vector<3x1x64xf32> to vector<3x64xf32>
    %122 = vector.shape_cast %119 : vector<3x64xf32> to vector<3x1x64xf32>
    tpu.vector_store %arg3[%c0_41, %c4, %c0_42], %122 {strides = array<i32>} : memref<3x16x64xf32, #tpu.memory_space<vmem>>, vector<3x1x64xf32>,
    %123 = arith.addf %102, %119 : vector<3x64xf32>
    %124 = vector.broadcast %114 : vector<1x64xf32> to vector<64x64xf32>
    %125 = arith.cmpf oeq, %21, %124 : vector<64x64xf32>
    %cst_43 = arith.constant 1.000000e+30 : f32
    %126 = vector.broadcast %cst_43 : f32 to vector<64x64xf32>
    %127 = arith.select %125, %126, %106 : vector<64x64xi1>, vector<64x64xf32>
    %cst_44 = arith.constant dense<0x7F800000> : vector<64xf32>
    %128 = vector.multi_reduction <minimumf>, %127, %cst_44 [0] : vector<64x64xf32> to vector<64xf32>
    %129 = vector.shape_cast %128 : vector<64xf32> to vector<1x64xf32>
    %130 = vector.broadcast %129 : vector<1x64xf32> to vector<64x64xf32>
    %131 = arith.cmpf ole, %127, %130 : vector<64x64xf32>
    %cst_45 = arith.constant 6.400000e+01 : f32
    %132 = vector.broadcast %cst_45 : f32 to vector<64x64xf32>
    %133 = arith.select %131, %21, %132 : vector<64x64xi1>, vector<64x64xf32>
    %cst_46 = arith.constant dense<0x7F800000> : vector<64xf32>
    %134 = vector.multi_reduction <minimumf>, %133, %cst_46 [0] : vector<64x64xf32> to vector<64xf32>
    %135 = vector.shape_cast %134 : vector<64xf32> to vector<1x64xf32>
    %136 = vector.broadcast %135 : vector<1x64xf32> to vector<64x64xf32>
    %137 = arith.cmpf oeq, %21, %136 : vector<64x64xf32>
    %138 = arith.extui %137 : vector<64x64xi1> to vector<64x64xi32>
    %139 = arith.sitofp %138 : vector<64x64xi32> to vector<64x64xf32>
    %cst_47 = arith.constant dense<0.000000e+00> : vector<3x64xf32>
    %140 = tpu.matmul %1, %139, %cst_47 {dimension_numbers = #tpu.dot_dimension_numbers<[1], [0], [0], [1], [0, 0, 1, 1], [], []>} : vector<3x64xf32>, vector<64x64xf32>, vector<3x64xf32> -> vector<3x64xf32>
    %c0_48 = arith.constant 0 : index
    %c5 = arith.constant 5 : index
    %c0_49 = arith.constant 0 : index
    %141 = vector.load %arg3[%c0_48, %c5, %c0_49] : memref<3x16x64xf32, #tpu.memory_space<vmem>>, vector<3x1x64xf32>
    %142 = vector.shape_cast %141 : vector<3x1x64xf32> to vector<3x64xf32>
    %143 = vector.shape_cast %140 : vector<3x64xf32> to vector<3x1x64xf32>
    tpu.vector_store %arg3[%c0_48, %c5, %c0_49], %143 {strides = array<i32>} : memref<3x16x64xf32, #tpu.memory_space<vmem>>, vector<3x1x64xf32>,
    %144 = arith.addf %123, %140 : vector<3x64xf32>
    %145 = vector.broadcast %135 : vector<1x64xf32> to vector<64x64xf32>
    %146 = arith.cmpf oeq, %21, %145 : vector<64x64xf32>
    %cst_50 = arith.constant 1.000000e+30 : f32
    %147 = vector.broadcast %cst_50 : f32 to vector<64x64xf32>
    %148 = arith.select %146, %147, %127 : vector<64x64xi1>, vector<64x64xf32>
    %cst_51 = arith.constant dense<0x7F800000> : vector<64xf32>
    %149 = vector.multi_reduction <minimumf>, %148, %cst_51 [0] : vector<64x64xf32> to vector<64xf32>
    %150 = vector.shape_cast %149 : vector<64xf32> to vector<1x64xf32>
    %151 = vector.broadcast %150 : vector<1x64xf32> to vector<64x64xf32>
    %152 = arith.cmpf ole, %148, %151 : vector<64x64xf32>
    %cst_52 = arith.constant 6.400000e+01 : f32
    %153 = vector.broadcast %cst_52 : f32 to vector<64x64xf32>
    %154 = arith.select %152, %21, %153 : vector<64x64xi1>, vector<64x64xf32>
    %cst_53 = arith.constant dense<0x7F800000> : vector<64xf32>
    %155 = vector.multi_reduction <minimumf>, %154, %cst_53 [0] : vector<64x64xf32> to vector<64xf32>
    %156 = vector.shape_cast %155 : vector<64xf32> to vector<1x64xf32>
    %157 = vector.broadcast %156 : vector<1x64xf32> to vector<64x64xf32>
    %158 = arith.cmpf oeq, %21, %157 : vector<64x64xf32>
    %159 = arith.extui %158 : vector<64x64xi1> to vector<64x64xi32>
    %160 = arith.sitofp %159 : vector<64x64xi32> to vector<64x64xf32>
    %cst_54 = arith.constant dense<0.000000e+00> : vector<3x64xf32>
    %161 = tpu.matmul %1, %160, %cst_54 {dimension_numbers = #tpu.dot_dimension_numbers<[1], [0], [0], [1], [0, 0, 1, 1], [], []>} : vector<3x64xf32>, vector<64x64xf32>, vector<3x64xf32> -> vector<3x64xf32>
    %c0_55 = arith.constant 0 : index
    %c6 = arith.constant 6 : index
    %c0_56 = arith.constant 0 : index
    %162 = vector.load %arg3[%c0_55, %c6, %c0_56] : memref<3x16x64xf32, #tpu.memory_space<vmem>>, vector<3x1x64xf32>
    %163 = vector.shape_cast %162 : vector<3x1x64xf32> to vector<3x64xf32>
    %164 = vector.shape_cast %161 : vector<3x64xf32> to vector<3x1x64xf32>
    tpu.vector_store %arg3[%c0_55, %c6, %c0_56], %164 {strides = array<i32>} : memref<3x16x64xf32, #tpu.memory_space<vmem>>, vector<3x1x64xf32>,
    %165 = arith.addf %144, %161 : vector<3x64xf32>
    %166 = vector.broadcast %156 : vector<1x64xf32> to vector<64x64xf32>
    %167 = arith.cmpf oeq, %21, %166 : vector<64x64xf32>
    %cst_57 = arith.constant 1.000000e+30 : f32
    %168 = vector.broadcast %cst_57 : f32 to vector<64x64xf32>
    %169 = arith.select %167, %168, %148 : vector<64x64xi1>, vector<64x64xf32>
    %cst_58 = arith.constant dense<0x7F800000> : vector<64xf32>
    %170 = vector.multi_reduction <minimumf>, %169, %cst_58 [0] : vector<64x64xf32> to vector<64xf32>
    %171 = vector.shape_cast %170 : vector<64xf32> to vector<1x64xf32>
    %172 = vector.broadcast %171 : vector<1x64xf32> to vector<64x64xf32>
    %173 = arith.cmpf ole, %169, %172 : vector<64x64xf32>
    %cst_59 = arith.constant 6.400000e+01 : f32
    %174 = vector.broadcast %cst_59 : f32 to vector<64x64xf32>
    %175 = arith.select %173, %21, %174 : vector<64x64xi1>, vector<64x64xf32>
    %cst_60 = arith.constant dense<0x7F800000> : vector<64xf32>
    %176 = vector.multi_reduction <minimumf>, %175, %cst_60 [0] : vector<64x64xf32> to vector<64xf32>
    %177 = vector.shape_cast %176 : vector<64xf32> to vector<1x64xf32>
    %178 = vector.broadcast %177 : vector<1x64xf32> to vector<64x64xf32>
    %179 = arith.cmpf oeq, %21, %178 : vector<64x64xf32>
    %180 = arith.extui %179 : vector<64x64xi1> to vector<64x64xi32>
    %181 = arith.sitofp %180 : vector<64x64xi32> to vector<64x64xf32>
    %cst_61 = arith.constant dense<0.000000e+00> : vector<3x64xf32>
    %182 = tpu.matmul %1, %181, %cst_61 {dimension_numbers = #tpu.dot_dimension_numbers<[1], [0], [0], [1], [0, 0, 1, 1], [], []>} : vector<3x64xf32>, vector<64x64xf32>, vector<3x64xf32> -> vector<3x64xf32>
    %c0_62 = arith.constant 0 : index
    %c7 = arith.constant 7 : index
    %c0_63 = arith.constant 0 : index
    %183 = vector.load %arg3[%c0_62, %c7, %c0_63] : memref<3x16x64xf32, #tpu.memory_space<vmem>>, vector<3x1x64xf32>
    %184 = vector.shape_cast %183 : vector<3x1x64xf32> to vector<3x64xf32>
    %185 = vector.shape_cast %182 : vector<3x64xf32> to vector<3x1x64xf32>
    tpu.vector_store %arg3[%c0_62, %c7, %c0_63], %185 {strides = array<i32>} : memref<3x16x64xf32, #tpu.memory_space<vmem>>, vector<3x1x64xf32>,
    %186 = arith.addf %165, %182 : vector<3x64xf32>
    %187 = vector.broadcast %177 : vector<1x64xf32> to vector<64x64xf32>
    %188 = arith.cmpf oeq, %21, %187 : vector<64x64xf32>
    %cst_64 = arith.constant 1.000000e+30 : f32
    %189 = vector.broadcast %cst_64 : f32 to vector<64x64xf32>
    %190 = arith.select %188, %189, %169 : vector<64x64xi1>, vector<64x64xf32>
    %cst_65 = arith.constant dense<0x7F800000> : vector<64xf32>
    %191 = vector.multi_reduction <minimumf>, %190, %cst_65 [0] : vector<64x64xf32> to vector<64xf32>
    %192 = vector.shape_cast %191 : vector<64xf32> to vector<1x64xf32>
    %193 = vector.broadcast %192 : vector<1x64xf32> to vector<64x64xf32>
    %194 = arith.cmpf ole, %190, %193 : vector<64x64xf32>
    %cst_66 = arith.constant 6.400000e+01 : f32
    %195 = vector.broadcast %cst_66 : f32 to vector<64x64xf32>
    %196 = arith.select %194, %21, %195 : vector<64x64xi1>, vector<64x64xf32>
    %cst_67 = arith.constant dense<0x7F800000> : vector<64xf32>
    %197 = vector.multi_reduction <minimumf>, %196, %cst_67 [0] : vector<64x64xf32> to vector<64xf32>
    %198 = vector.shape_cast %197 : vector<64xf32> to vector<1x64xf32>
    %199 = vector.broadcast %198 : vector<1x64xf32> to vector<64x64xf32>
    %200 = arith.cmpf oeq, %21, %199 : vector<64x64xf32>
    %201 = arith.extui %200 : vector<64x64xi1> to vector<64x64xi32>
    %202 = arith.sitofp %201 : vector<64x64xi32> to vector<64x64xf32>
    %cst_68 = arith.constant dense<0.000000e+00> : vector<3x64xf32>
    %203 = tpu.matmul %1, %202, %cst_68 {dimension_numbers = #tpu.dot_dimension_numbers<[1], [0], [0], [1], [0, 0, 1, 1], [], []>} : vector<3x64xf32>, vector<64x64xf32>, vector<3x64xf32> -> vector<3x64xf32>
    %c0_69 = arith.constant 0 : index
    %c8 = arith.constant 8 : index
    %c0_70 = arith.constant 0 : index
    %204 = vector.load %arg3[%c0_69, %c8, %c0_70] : memref<3x16x64xf32, #tpu.memory_space<vmem>>, vector<3x1x64xf32>
    %205 = vector.shape_cast %204 : vector<3x1x64xf32> to vector<3x64xf32>
    %206 = vector.shape_cast %203 : vector<3x64xf32> to vector<3x1x64xf32>
    tpu.vector_store %arg3[%c0_69, %c8, %c0_70], %206 {strides = array<i32>} : memref<3x16x64xf32, #tpu.memory_space<vmem>>, vector<3x1x64xf32>,
    %207 = arith.addf %186, %203 : vector<3x64xf32>
    %208 = vector.broadcast %198 : vector<1x64xf32> to vector<64x64xf32>
    %209 = arith.cmpf oeq, %21, %208 : vector<64x64xf32>
    %cst_71 = arith.constant 1.000000e+30 : f32
    %210 = vector.broadcast %cst_71 : f32 to vector<64x64xf32>
    %211 = arith.select %209, %210, %190 : vector<64x64xi1>, vector<64x64xf32>
    %cst_72 = arith.constant dense<0x7F800000> : vector<64xf32>
    %212 = vector.multi_reduction <minimumf>, %211, %cst_72 [0] : vector<64x64xf32> to vector<64xf32>
    %213 = vector.shape_cast %212 : vector<64xf32> to vector<1x64xf32>
    %214 = vector.broadcast %213 : vector<1x64xf32> to vector<64x64xf32>
    %215 = arith.cmpf ole, %211, %214 : vector<64x64xf32>
    %cst_73 = arith.constant 6.400000e+01 : f32
    %216 = vector.broadcast %cst_73 : f32 to vector<64x64xf32>
    %217 = arith.select %215, %21, %216 : vector<64x64xi1>, vector<64x64xf32>
    %cst_74 = arith.constant dense<0x7F800000> : vector<64xf32>
    %218 = vector.multi_reduction <minimumf>, %217, %cst_74 [0] : vector<64x64xf32> to vector<64xf32>
    %219 = vector.shape_cast %218 : vector<64xf32> to vector<1x64xf32>
    %220 = vector.broadcast %219 : vector<1x64xf32> to vector<64x64xf32>
    %221 = arith.cmpf oeq, %21, %220 : vector<64x64xf32>
    %222 = arith.extui %221 : vector<64x64xi1> to vector<64x64xi32>
    %223 = arith.sitofp %222 : vector<64x64xi32> to vector<64x64xf32>
    %cst_75 = arith.constant dense<0.000000e+00> : vector<3x64xf32>
    %224 = tpu.matmul %1, %223, %cst_75 {dimension_numbers = #tpu.dot_dimension_numbers<[1], [0], [0], [1], [0, 0, 1, 1], [], []>} : vector<3x64xf32>, vector<64x64xf32>, vector<3x64xf32> -> vector<3x64xf32>
    %c0_76 = arith.constant 0 : index
    %c9 = arith.constant 9 : index
    %c0_77 = arith.constant 0 : index
    %225 = vector.load %arg3[%c0_76, %c9, %c0_77] : memref<3x16x64xf32, #tpu.memory_space<vmem>>, vector<3x1x64xf32>
    %226 = vector.shape_cast %225 : vector<3x1x64xf32> to vector<3x64xf32>
    %227 = vector.shape_cast %224 : vector<3x64xf32> to vector<3x1x64xf32>
    tpu.vector_store %arg3[%c0_76, %c9, %c0_77], %227 {strides = array<i32>} : memref<3x16x64xf32, #tpu.memory_space<vmem>>, vector<3x1x64xf32>,
    %228 = arith.addf %207, %224 : vector<3x64xf32>
    %229 = vector.broadcast %219 : vector<1x64xf32> to vector<64x64xf32>
    %230 = arith.cmpf oeq, %21, %229 : vector<64x64xf32>
    %cst_78 = arith.constant 1.000000e+30 : f32
    %231 = vector.broadcast %cst_78 : f32 to vector<64x64xf32>
    %232 = arith.select %230, %231, %211 : vector<64x64xi1>, vector<64x64xf32>
    %cst_79 = arith.constant dense<0x7F800000> : vector<64xf32>
    %233 = vector.multi_reduction <minimumf>, %232, %cst_79 [0] : vector<64x64xf32> to vector<64xf32>
    %234 = vector.shape_cast %233 : vector<64xf32> to vector<1x64xf32>
    %235 = vector.broadcast %234 : vector<1x64xf32> to vector<64x64xf32>
    %236 = arith.cmpf ole, %232, %235 : vector<64x64xf32>
    %cst_80 = arith.constant 6.400000e+01 : f32
    %237 = vector.broadcast %cst_80 : f32 to vector<64x64xf32>
    %238 = arith.select %236, %21, %237 : vector<64x64xi1>, vector<64x64xf32>
    %cst_81 = arith.constant dense<0x7F800000> : vector<64xf32>
    %239 = vector.multi_reduction <minimumf>, %238, %cst_81 [0] : vector<64x64xf32> to vector<64xf32>
    %240 = vector.shape_cast %239 : vector<64xf32> to vector<1x64xf32>
    %241 = vector.broadcast %240 : vector<1x64xf32> to vector<64x64xf32>
    %242 = arith.cmpf oeq, %21, %241 : vector<64x64xf32>
    %243 = arith.extui %242 : vector<64x64xi1> to vector<64x64xi32>
    %244 = arith.sitofp %243 : vector<64x64xi32> to vector<64x64xf32>
    %cst_82 = arith.constant dense<0.000000e+00> : vector<3x64xf32>
    %245 = tpu.matmul %1, %244, %cst_82 {dimension_numbers = #tpu.dot_dimension_numbers<[1], [0], [0], [1], [0, 0, 1, 1], [], []>} : vector<3x64xf32>, vector<64x64xf32>, vector<3x64xf32> -> vector<3x64xf32>
    %c0_83 = arith.constant 0 : index
    %c10 = arith.constant 10 : index
    %c0_84 = arith.constant 0 : index
    %246 = vector.load %arg3[%c0_83, %c10, %c0_84] : memref<3x16x64xf32, #tpu.memory_space<vmem>>, vector<3x1x64xf32>
    %247 = vector.shape_cast %246 : vector<3x1x64xf32> to vector<3x64xf32>
    %248 = vector.shape_cast %245 : vector<3x64xf32> to vector<3x1x64xf32>
    tpu.vector_store %arg3[%c0_83, %c10, %c0_84], %248 {strides = array<i32>} : memref<3x16x64xf32, #tpu.memory_space<vmem>>, vector<3x1x64xf32>,
    %249 = arith.addf %228, %245 : vector<3x64xf32>
    %250 = vector.broadcast %240 : vector<1x64xf32> to vector<64x64xf32>
    %251 = arith.cmpf oeq, %21, %250 : vector<64x64xf32>
    %cst_85 = arith.constant 1.000000e+30 : f32
    %252 = vector.broadcast %cst_85 : f32 to vector<64x64xf32>
    %253 = arith.select %251, %252, %232 : vector<64x64xi1>, vector<64x64xf32>
    %cst_86 = arith.constant dense<0x7F800000> : vector<64xf32>
    %254 = vector.multi_reduction <minimumf>, %253, %cst_86 [0] : vector<64x64xf32> to vector<64xf32>
    %255 = vector.shape_cast %254 : vector<64xf32> to vector<1x64xf32>
    %256 = vector.broadcast %255 : vector<1x64xf32> to vector<64x64xf32>
    %257 = arith.cmpf ole, %253, %256 : vector<64x64xf32>
    %cst_87 = arith.constant 6.400000e+01 : f32
    %258 = vector.broadcast %cst_87 : f32 to vector<64x64xf32>
    %259 = arith.select %257, %21, %258 : vector<64x64xi1>, vector<64x64xf32>
    %cst_88 = arith.constant dense<0x7F800000> : vector<64xf32>
    %260 = vector.multi_reduction <minimumf>, %259, %cst_88 [0] : vector<64x64xf32> to vector<64xf32>
    %261 = vector.shape_cast %260 : vector<64xf32> to vector<1x64xf32>
    %262 = vector.broadcast %261 : vector<1x64xf32> to vector<64x64xf32>
    %263 = arith.cmpf oeq, %21, %262 : vector<64x64xf32>
    %264 = arith.extui %263 : vector<64x64xi1> to vector<64x64xi32>
    %265 = arith.sitofp %264 : vector<64x64xi32> to vector<64x64xf32>
    %cst_89 = arith.constant dense<0.000000e+00> : vector<3x64xf32>
    %266 = tpu.matmul %1, %265, %cst_89 {dimension_numbers = #tpu.dot_dimension_numbers<[1], [0], [0], [1], [0, 0, 1, 1], [], []>} : vector<3x64xf32>, vector<64x64xf32>, vector<3x64xf32> -> vector<3x64xf32>
    %c0_90 = arith.constant 0 : index
    %c11 = arith.constant 11 : index
    %c0_91 = arith.constant 0 : index
    %267 = vector.load %arg3[%c0_90, %c11, %c0_91] : memref<3x16x64xf32, #tpu.memory_space<vmem>>, vector<3x1x64xf32>
    %268 = vector.shape_cast %267 : vector<3x1x64xf32> to vector<3x64xf32>
    %269 = vector.shape_cast %266 : vector<3x64xf32> to vector<3x1x64xf32>
    tpu.vector_store %arg3[%c0_90, %c11, %c0_91], %269 {strides = array<i32>} : memref<3x16x64xf32, #tpu.memory_space<vmem>>, vector<3x1x64xf32>,
    %270 = arith.addf %249, %266 : vector<3x64xf32>
    %271 = vector.broadcast %261 : vector<1x64xf32> to vector<64x64xf32>
    %272 = arith.cmpf oeq, %21, %271 : vector<64x64xf32>
    %cst_92 = arith.constant 1.000000e+30 : f32
    %273 = vector.broadcast %cst_92 : f32 to vector<64x64xf32>
    %274 = arith.select %272, %273, %253 : vector<64x64xi1>, vector<64x64xf32>
    %cst_93 = arith.constant dense<0x7F800000> : vector<64xf32>
    %275 = vector.multi_reduction <minimumf>, %274, %cst_93 [0] : vector<64x64xf32> to vector<64xf32>
    %276 = vector.shape_cast %275 : vector<64xf32> to vector<1x64xf32>
    %277 = vector.broadcast %276 : vector<1x64xf32> to vector<64x64xf32>
    %278 = arith.cmpf ole, %274, %277 : vector<64x64xf32>
    %cst_94 = arith.constant 6.400000e+01 : f32
    %279 = vector.broadcast %cst_94 : f32 to vector<64x64xf32>
    %280 = arith.select %278, %21, %279 : vector<64x64xi1>, vector<64x64xf32>
    %cst_95 = arith.constant dense<0x7F800000> : vector<64xf32>
    %281 = vector.multi_reduction <minimumf>, %280, %cst_95 [0] : vector<64x64xf32> to vector<64xf32>
    %282 = vector.shape_cast %281 : vector<64xf32> to vector<1x64xf32>
    %283 = vector.broadcast %282 : vector<1x64xf32> to vector<64x64xf32>
    %284 = arith.cmpf oeq, %21, %283 : vector<64x64xf32>
    %285 = arith.extui %284 : vector<64x64xi1> to vector<64x64xi32>
    %286 = arith.sitofp %285 : vector<64x64xi32> to vector<64x64xf32>
    %cst_96 = arith.constant dense<0.000000e+00> : vector<3x64xf32>
    %287 = tpu.matmul %1, %286, %cst_96 {dimension_numbers = #tpu.dot_dimension_numbers<[1], [0], [0], [1], [0, 0, 1, 1], [], []>} : vector<3x64xf32>, vector<64x64xf32>, vector<3x64xf32> -> vector<3x64xf32>
    %c0_97 = arith.constant 0 : index
    %c12 = arith.constant 12 : index
    %c0_98 = arith.constant 0 : index
    %288 = vector.load %arg3[%c0_97, %c12, %c0_98] : memref<3x16x64xf32, #tpu.memory_space<vmem>>, vector<3x1x64xf32>
    %289 = vector.shape_cast %288 : vector<3x1x64xf32> to vector<3x64xf32>
    %290 = vector.shape_cast %287 : vector<3x64xf32> to vector<3x1x64xf32>
    tpu.vector_store %arg3[%c0_97, %c12, %c0_98], %290 {strides = array<i32>} : memref<3x16x64xf32, #tpu.memory_space<vmem>>, vector<3x1x64xf32>,
    %291 = arith.addf %270, %287 : vector<3x64xf32>
    %292 = vector.broadcast %282 : vector<1x64xf32> to vector<64x64xf32>
    %293 = arith.cmpf oeq, %21, %292 : vector<64x64xf32>
    %cst_99 = arith.constant 1.000000e+30 : f32
    %294 = vector.broadcast %cst_99 : f32 to vector<64x64xf32>
    %295 = arith.select %293, %294, %274 : vector<64x64xi1>, vector<64x64xf32>
    %cst_100 = arith.constant dense<0x7F800000> : vector<64xf32>
    %296 = vector.multi_reduction <minimumf>, %295, %cst_100 [0] : vector<64x64xf32> to vector<64xf32>
    %297 = vector.shape_cast %296 : vector<64xf32> to vector<1x64xf32>
    %298 = vector.broadcast %297 : vector<1x64xf32> to vector<64x64xf32>
    %299 = arith.cmpf ole, %295, %298 : vector<64x64xf32>
    %cst_101 = arith.constant 6.400000e+01 : f32
    %300 = vector.broadcast %cst_101 : f32 to vector<64x64xf32>
    %301 = arith.select %299, %21, %300 : vector<64x64xi1>, vector<64x64xf32>
    %cst_102 = arith.constant dense<0x7F800000> : vector<64xf32>
    %302 = vector.multi_reduction <minimumf>, %301, %cst_102 [0] : vector<64x64xf32> to vector<64xf32>
    %303 = vector.shape_cast %302 : vector<64xf32> to vector<1x64xf32>
    %304 = vector.broadcast %303 : vector<1x64xf32> to vector<64x64xf32>
    %305 = arith.cmpf oeq, %21, %304 : vector<64x64xf32>
    %306 = arith.extui %305 : vector<64x64xi1> to vector<64x64xi32>
    %307 = arith.sitofp %306 : vector<64x64xi32> to vector<64x64xf32>
    %cst_103 = arith.constant dense<0.000000e+00> : vector<3x64xf32>
    %308 = tpu.matmul %1, %307, %cst_103 {dimension_numbers = #tpu.dot_dimension_numbers<[1], [0], [0], [1], [0, 0, 1, 1], [], []>} : vector<3x64xf32>, vector<64x64xf32>, vector<3x64xf32> -> vector<3x64xf32>
    %c0_104 = arith.constant 0 : index
    %c13 = arith.constant 13 : index
    %c0_105 = arith.constant 0 : index
    %309 = vector.load %arg3[%c0_104, %c13, %c0_105] : memref<3x16x64xf32, #tpu.memory_space<vmem>>, vector<3x1x64xf32>
    %310 = vector.shape_cast %309 : vector<3x1x64xf32> to vector<3x64xf32>
    %311 = vector.shape_cast %308 : vector<3x64xf32> to vector<3x1x64xf32>
    tpu.vector_store %arg3[%c0_104, %c13, %c0_105], %311 {strides = array<i32>} : memref<3x16x64xf32, #tpu.memory_space<vmem>>, vector<3x1x64xf32>,
    %312 = arith.addf %291, %308 : vector<3x64xf32>
    %313 = vector.broadcast %303 : vector<1x64xf32> to vector<64x64xf32>
    %314 = arith.cmpf oeq, %21, %313 : vector<64x64xf32>
    %cst_106 = arith.constant 1.000000e+30 : f32
    %315 = vector.broadcast %cst_106 : f32 to vector<64x64xf32>
    %316 = arith.select %314, %315, %295 : vector<64x64xi1>, vector<64x64xf32>
    %cst_107 = arith.constant dense<0x7F800000> : vector<64xf32>
    %317 = vector.multi_reduction <minimumf>, %316, %cst_107 [0] : vector<64x64xf32> to vector<64xf32>
    %318 = vector.shape_cast %317 : vector<64xf32> to vector<1x64xf32>
    %319 = vector.broadcast %318 : vector<1x64xf32> to vector<64x64xf32>
    %320 = arith.cmpf ole, %316, %319 : vector<64x64xf32>
    %cst_108 = arith.constant 6.400000e+01 : f32
    %321 = vector.broadcast %cst_108 : f32 to vector<64x64xf32>
    %322 = arith.select %320, %21, %321 : vector<64x64xi1>, vector<64x64xf32>
    %cst_109 = arith.constant dense<0x7F800000> : vector<64xf32>
    %323 = vector.multi_reduction <minimumf>, %322, %cst_109 [0] : vector<64x64xf32> to vector<64xf32>
    %324 = vector.shape_cast %323 : vector<64xf32> to vector<1x64xf32>
    %325 = vector.broadcast %324 : vector<1x64xf32> to vector<64x64xf32>
    %326 = arith.cmpf oeq, %21, %325 : vector<64x64xf32>
    %327 = arith.extui %326 : vector<64x64xi1> to vector<64x64xi32>
    %328 = arith.sitofp %327 : vector<64x64xi32> to vector<64x64xf32>
    %cst_110 = arith.constant dense<0.000000e+00> : vector<3x64xf32>
    %329 = tpu.matmul %1, %328, %cst_110 {dimension_numbers = #tpu.dot_dimension_numbers<[1], [0], [0], [1], [0, 0, 1, 1], [], []>} : vector<3x64xf32>, vector<64x64xf32>, vector<3x64xf32> -> vector<3x64xf32>
    %c0_111 = arith.constant 0 : index
    %c14 = arith.constant 14 : index
    %c0_112 = arith.constant 0 : index
    %330 = vector.load %arg3[%c0_111, %c14, %c0_112] : memref<3x16x64xf32, #tpu.memory_space<vmem>>, vector<3x1x64xf32>
    %331 = vector.shape_cast %330 : vector<3x1x64xf32> to vector<3x64xf32>
    %332 = vector.shape_cast %329 : vector<3x64xf32> to vector<3x1x64xf32>
    tpu.vector_store %arg3[%c0_111, %c14, %c0_112], %332 {strides = array<i32>} : memref<3x16x64xf32, #tpu.memory_space<vmem>>, vector<3x1x64xf32>,
    %333 = arith.addf %312, %329 : vector<3x64xf32>
    %334 = vector.broadcast %324 : vector<1x64xf32> to vector<64x64xf32>
    %335 = arith.cmpf oeq, %21, %334 : vector<64x64xf32>
    %cst_113 = arith.constant 1.000000e+30 : f32
    %336 = vector.broadcast %cst_113 : f32 to vector<64x64xf32>
    %337 = arith.select %335, %336, %316 : vector<64x64xi1>, vector<64x64xf32>
    %cst_114 = arith.constant dense<0x7F800000> : vector<64xf32>
    %338 = vector.multi_reduction <minimumf>, %337, %cst_114 [0] : vector<64x64xf32> to vector<64xf32>
    %339 = vector.shape_cast %338 : vector<64xf32> to vector<1x64xf32>
    %340 = vector.broadcast %339 : vector<1x64xf32> to vector<64x64xf32>
    %341 = arith.cmpf ole, %337, %340 : vector<64x64xf32>
    %cst_115 = arith.constant 6.400000e+01 : f32
    %342 = vector.broadcast %cst_115 : f32 to vector<64x64xf32>
    %343 = arith.select %341, %21, %342 : vector<64x64xi1>, vector<64x64xf32>
    %cst_116 = arith.constant dense<0x7F800000> : vector<64xf32>
    %344 = vector.multi_reduction <minimumf>, %343, %cst_116 [0] : vector<64x64xf32> to vector<64xf32>
    %345 = vector.shape_cast %344 : vector<64xf32> to vector<1x64xf32>
    %346 = vector.broadcast %345 : vector<1x64xf32> to vector<64x64xf32>
    %347 = arith.cmpf oeq, %21, %346 : vector<64x64xf32>
    %348 = arith.extui %347 : vector<64x64xi1> to vector<64x64xi32>
    %349 = arith.sitofp %348 : vector<64x64xi32> to vector<64x64xf32>
    %cst_117 = arith.constant dense<0.000000e+00> : vector<3x64xf32>
    %350 = tpu.matmul %1, %349, %cst_117 {dimension_numbers = #tpu.dot_dimension_numbers<[1], [0], [0], [1], [0, 0, 1, 1], [], []>} : vector<3x64xf32>, vector<64x64xf32>, vector<3x64xf32> -> vector<3x64xf32>
    %c0_118 = arith.constant 0 : index
    %c15 = arith.constant 15 : index
    %c0_119 = arith.constant 0 : index
    %351 = vector.load %arg3[%c0_118, %c15, %c0_119] : memref<3x16x64xf32, #tpu.memory_space<vmem>>, vector<3x1x64xf32>
    %352 = vector.shape_cast %351 : vector<3x1x64xf32> to vector<3x64xf32>
    %353 = vector.shape_cast %350 : vector<3x64xf32> to vector<3x1x64xf32>
    tpu.vector_store %arg3[%c0_118, %c15, %c0_119], %353 {strides = array<i32>} : memref<3x16x64xf32, #tpu.memory_space<vmem>>, vector<3x1x64xf32>,
    %354 = arith.addf %333, %350 : vector<3x64xf32>
    %cst_120 = arith.constant 6.250000e-02 : f32
    %355 = vector.broadcast %cst_120 : f32 to vector<3x64xf32>
    %356 = arith.mulf %354, %355 : vector<3x64xf32>
    %c0_121 = arith.constant 0 : index
    %c0_122 = arith.constant 0 : index
    %c0_123 = arith.constant 0 : index
    %357 = vector.load %arg3[%c0_121, %c0_122, %c0_123] : memref<3x16x64xf32, #tpu.memory_space<vmem>>, vector<3x16x64xf32>
    %358 = vector.shape_cast %356 : vector<3x64xf32> to vector<3x1x64xf32>
    %359 = vector.broadcast %358 : vector<3x1x64xf32> to vector<3x16x64xf32>
    %360 = arith.subf %357, %359 : vector<3x16x64xf32>
    %c0_124 = arith.constant 0 : index
    %c0_125 = arith.constant 0 : index
    %c0_126 = arith.constant 0 : index
    %361 = vector.load %arg3[%c0_124, %c0_125, %c0_126] : memref<3x16x64xf32, #tpu.memory_space<vmem>>, vector<3x16x64xf32>
    tpu.vector_store %arg3[%c0_124, %c0_125, %c0_126], %360 {strides = array<i32>} : memref<3x16x64xf32, #tpu.memory_space<vmem>>, vector<3x16x64xf32>,
    return
  }
  func.func @transform_0(%arg0: i32) -> (i32, i32, i32) {
    %c0_i32 = arith.constant 0 : i32
    %c0_i32_0 = arith.constant 0 : i32
    %c0_i32_1 = arith.constant 0 : i32
    return %arg0, %c0_i32, %c0_i32_0 : i32, i32, i32
  }
  func.func @transform_1(%arg0: i32) -> (i32, i32, i32) {
    %c0_i32 = arith.constant 0 : i32
    %c0_i32_0 = arith.constant 0 : i32
    %c0_i32_1 = arith.constant 0 : i32
    return %arg0, %c0_i32, %c0_i32_0 : i32, i32, i32
  }
  func.func @transform_2(%arg0: i32) -> (i32, i32, i32) {
    %c0_i32 = arith.constant 0 : i32
    %c0_i32_0 = arith.constant 0 : i32
    %c0_i32_1 = arith.constant 0 : i32
    return %c0_i32, %arg0, %c0_i32_0 : i32, i32, i32
  }
}

</mosaic_0001>

<bundles_post_ra>
// kernel: tpu_custom_call.1
= control target key start
LH: loop header
LB: loop body
LE: loop exit
PB: predicated region body
PF: predicated region fallthrough
CT: control target
= control target key end

     0   :  { %7 = vsyncpa [#allocation3], 0  ;;  %s4660_s0 = inlined_call_operand.vmem [shape: f32[2,3,64], index: 0, kind: input, shape index: {}]   ;;  %s4661_s1 = inlined_call_operand.vmem [shape: f32[2,64,3], index: 1, kind: input, shape index: {}]   ;;  %s4662_s2 = inlined_call_operand.hbm [shape: f32[3,32,64], index: 2, kind: output, shape index: {}]  }
   0x1   :  { %9 = vsyncpa [#allocation3 + $0x1], 0  ;;  %s2771_s9 = smov 0   ;;  %s2773_s10 = smov 0  }
   0x2   :  { %s2775_s11 = smov 0   ;;  %s2777_s12 = smov 0  }
   0x3 LB: > { %s2792_s13 = sadd.s32 4294967295, %s2746_s12   ;;  %s2362_s14 = sadd.s32 4294967294, %s2746_s12   ;;  %s2746_s12 = sphi %s2777_s12, %s4668_s12   ;;  %s2742_s11 = sphi %s2775_s11, %s4667_s11   ;;  %s2738_s10 = sphi %s2773_s10, %s4666_s10   ;;  %s2734_s9 = sphi %s2771_s9, %s4665_s9  }
   0x4   : > { %s2796_s15 = sadd.s32 1, %s2746_s12   ;;  %s74_s16 = sadd.s32 1, %s2742_s11 }
   0x5   : > { %s71_s17 = ssub.s32 %s2746_s12, %s2796_s15  ;;  %p84_p0 = scmp.ne.s32.totalorder %s2742_s11, %s2738_s10 }
   0x6   : > { %p72_p1 = scmp.eq.s32.totalorder %s71_s17, 0  ;;  %p85_p2 = scmp.eq.s32.totalorder %s2792_s13, 1 }
   0x7   : > { %p90_p3 = scmp.ne.s32.totalorder %s2738_s10, %s2734_s9  ;;  %p91_p4 = scmp.eq.s32.totalorder %s2362_s14, 1 }
   0x8   : > { %s2807_s18 = scalar_select %p72_p1, %s2742_s11, %s74_s16  }
   0x9   : > { %p2809_p5 = por %p85_p2, %p84_p0  ;;  %p2813_p6 = por %p91_p4, %p90_p3 }
   0xa   : > { %p2365_p7 = scmp.ge.s32.totalorder %s2746_s12, 1  ;;  %p124_p8 = scmp.lt.s32.totalorder %s2746_s12, 3 }
   0xc   : > { %p125_p9 = pnand %p2365_p7, %p124_p8 }
   0xd   : > { %p150_p10 = scmp.lt.s32.totalorder (!%p125_p9), %s2792_s13, 1  ;;  %s147_s30 = sand.u32 (!%p125_p9), 1, %s2738_s10  }
   0xe   : > { %128 = sbr.rel (%p125_p9) target bundleno = 1170 (0x492), region = 28  ;;  %s2250_s5 = scalar_lea.sflag (!%p125_p9), [#allocation3], %s147_s30 }
   0xf   : > { %s2656_s3 = smul.u32 (!%p125_p9), 48, %s147_s30 }
  0x11   : > { %s4488_s4 = scalar_lea.vmem (!%p125_p9), [#allocation2], %s2656_s3 }
  0x13   : > { %s151_s21 = scalar_select %p150_p10, %s2792_s13, 1  ;;  %vm194_vm0 = vcmask 1042432   ;;  %vm169_vm1 = vcmask 23552   ;;  %vm321_vm2 = vcmask 523264  }
  0x15   : > { %s2366_s22 = sshll.u32 %s151_s21, 2  ;;  %s2654_s23 = sshll.u32 %s151_s21, 6 }
  0x16   : > { %s2824_s26 = scalar_lea.vmem %s4660_s0, %s2366_s22  ;;  %s2829_s29 = scalar_lea.vmem %s4661_s1, %s2654_s23 }
  0x17   : > { %v2832_v0 = vld [vmem:[%s2824_s26] sm:$0x7]  ;;  %v163_v3 = vld [vmem:[%s2829_s29 + $0x10] sm:$0xff]  ;;  %v162_v6 = vld [vmem:[%s2829_s29 + $0x8] sm:$0xff] }
  0x18   : > { %v161_v1 = vld [vmem:[%s2829_s29] sm:$0xff]  ;;  %2369 = vmatpush.msk.msra.mxu0 %vm194_vm0, %v2832_v0  ;;  %v249_v4 = vmul.f32 %v163_v3, %v163_v3  ;;  %v248_v8 = vmul.f32 %v162_v6, %v162_v6  ;;  %v164_v9 = vld [vmem:[%s2829_s29 + $0x18] sm:$0xff]  ;;  %v166_v16 = vld [vmem:[%s2829_s29 + $0x28] sm:$0xff]  ;;  %v239_v30 = vmul.f32 %v2832_v0, %v2832_v0 }
  0x19   : > { %v247_v2 = vmul.f32 %v161_v1, %v161_v1  ;;  %2370 = vmatmul.msk.f32.vlgmr.msra.gmra.mxu0 %vm169_vm1, %v161_v1  ;;  %v250_v10 = vmul.f32 %v164_v9, %v164_v9  ;;  %v165_v11 = vld [vmem:[%s2829_s29 + $0x20] sm:$0xff]  ;;  %v252_v17 = vmul.f32 %v166_v16, %v166_v16  ;;  %v167_v19 = vld [vmem:[%s2829_s29 + $0x30] sm:$0xff]  ;;  %v168_v20 = vld [vmem:[%s2829_s29 + $0x38] sm:$0xff] }
  0x1a   : > { %v261_v7 = vsel %vm169_vm1, %v249_v4, 0.0  ;;  %v258_v12 = vsel %vm169_vm1, %v248_v8, 0.0  ;;  %v251_v13 = vmul.f32 %v165_v11, %v165_v11  ;;  %v253_v21 = vmul.f32 %v167_v19, %v167_v19 }
  0x1b   : > { %v255_v5 = vsel %vm169_vm1, %v247_v2, 0.0  ;;  %262 = vadd.xlane.f32.xlu1 %v261_v7  ;;  %v264_v14 = vsel %vm169_vm1, %v250_v10, 0.0  ;;  %v270_v18 = vsel %vm169_vm1, %v252_v17, 0.0  ;;  %v254_v22 = vmul.f32 %v168_v20, %v168_v20 }
  0x1c   : > { %256 = vadd.xlane.f32.xlu0 %v255_v5  ;;  %v267_v15 = vsel %vm169_vm1, %v251_v13, 0.0  ;;  %v273_v23 = vsel %vm169_vm1, %v253_v21, 0.0  ;;  %v241_v33 = vrot.slane %v239_v30, 1  ;;  %v244_v36 = vrot.slane %v239_v30, 2 }
  0x1d   : > { %268 = vadd.xlane.f32.xlu2 %v267_v15  ;;  %v276_v24 = vsel %vm169_vm1, %v254_v22, 0.0  ;;  %v304_v22 = vlaneseq }
  0x1e   : > { %v243_v35 = vadd.f32 %v241_v33, %v239_v30 }
  0x20   : > { %v246_v39 = vadd.f32 %v244_v36, %v243_v35 }
  0x21   : > { %2371 = vmatmul.msk.f32.gmra.mxu0 %vm169_vm1, %v162_v6 }
  0x22   : > { %v279_v42 = vperm.slane %v246_v39, 0 }
  0x23   : > { %265 = vadd.xlane.f32.xlu1 %v264_v14 }
  0x24   : > { %259 = vadd.xlane.f32.xlu0 %v258_v12 }
  0x25   : > { %271 = vadd.xlane.f32.xlu2 %v270_v18 }
  0x29   : > { %2372 = vmatmul.msk.f32.gmra.mxu0 %vm169_vm1, %v163_v3 }
  0x2b   : > { %277 = vadd.xlane.f32.xlu1 %v276_v24 }
  0x2c   : > { %274 = vadd.xlane.f32.xlu0 %v273_v23 }
  0x31   : > { %2373 = vmatmul.msk.f32.gmra.mxu0 %vm169_vm1, %v164_v9 }
  0x39   : > { %2374 = vmatmul.msk.f32.gmra.mxu0 %vm169_vm1, %v165_v11 }
  0x41   : > { %2375 = vmatmul.msk.f32.gmra.mxu0 %vm169_vm1, %v166_v16 }
  0x49   : > { %2376 = vmatmul.msk.f32.gmra.mxu0 %vm169_vm1, %v167_v19 }
  0x51   : > { %2377 = vmatmul.msk.f32.gmra.mxu0 %vm169_vm1, %v168_v20 }
  0x8e   : > { %v263_v32 = vpop.xlane.xlu1 %262 }
  0x8f   : > { %v257_v29 = vpop.xlane.xlu0 %256  ;;  %v282_v55 = vadd.f32 %v279_v42, %v263_v32 }
  0x90   : > { %v269_v34 = vpop.xlane.xlu2 %268  ;;  %v280_v53 = vadd.f32 %v279_v42, %v257_v29 }
  0x91   : > { %v284_v48 = vadd.f32 %v279_v42, %v269_v34 }
  0x96   : > { %v215_v25 = vpop.f32.mrf.mxu0  ;;  %v266_v40 = vpop.xlane.xlu1 %265 }
  0x97   : > { %v260_v37 = vpop.xlane.xlu0 %259  ;;  %v288_v54 = vmul.f32 2.0, %v215_v25  ;;  %v283_v58 = vadd.f32 %v279_v42, %v266_v40  ;;  %v305_v25 = vshrl.u32 %v304_v22, 7 }
  0x98   : > { %v272_v41 = vpop.xlane.xlu2 %271  ;;  %v281_v47 = vadd.f32 %v279_v42, %v260_v37 }
  0x99   : > { %v285_v45 = vadd.f32 %v279_v42, %v272_v41  ;;  %v2869_v2 = vsub.f32 %v280_v53, %v288_v54  ;;  %v307_v29 = vadd.s32 16, %v305_v25  ;;  %v308_v30 = vadd.s32 24, %v305_v25 }
  0x9a   : > { %v309_v32 = vadd.s32 32, %v305_v25  ;;  %v310_v33 = vadd.s32 40, %v305_v25  ;;  %v311_v34 = vadd.s32 48, %v305_v25  ;;  %v312_v35 = vadd.s32 56, %v305_v25 }
  0x9b   : > { %v322_v13 = vsel %vm321_vm2, %v2869_v2, inf  ;;  %v2893_v37 = vcvt.s32.f32 %v305_v25  ;;  %v2897_v39 = vcvt.s32.f32 %v307_v29  ;;  %v2899_v40 = vcvt.s32.f32 %v308_v30 }
  0x9e   : > { %v218_v26 = vpop.f32.mrf.mxu0  ;;  %v278_v56 = vpop.xlane.xlu1 %277 }
  0x9f   : > { %v275_v43 = vpop.xlane.xlu0 %274  ;;  %v289_v49 = vmul.f32 2.0, %v218_v26  ;;  %v287_v1 = vadd.f32 %v279_v42, %v278_v56 }
  0xa0   : > { %v286_v51 = vadd.f32 %v279_v42, %v275_v43  ;;  %v2901_v42 = vcvt.s32.f32 %v309_v32  ;;  %v2903_v43 = vcvt.s32.f32 %v310_v33 }
  0xa1   : > { %v2863_v61 = vsub.f32 %v281_v47, %v289_v49 }
  0xa3   : > { %v323_v8 = vsel %vm321_vm2, %v2863_v61, inf }
  0xa6   : > { %v221_v27 = vpop.f32.mrf.mxu0 }
  0xa7   : > { %v290_v57 = vmul.f32 2.0, %v221_v27 }
  0xa9   : > { %v2871_v4 = vsub.f32 %v282_v55, %v290_v57 }
  0xab   : > { %v324_v14 = vsel %vm321_vm2, %v2871_v4, inf }
  0xae   : > { %v224_v28 = vpop.f32.mrf.mxu0 }
  0xaf   : > { %v291_v59 = vmul.f32 2.0, %v224_v28  ;;  %v306_v28 = vadd.s32 8, %v305_v25 }
  0xb1   : > { %v2873_v5 = vsub.f32 %v283_v58, %v291_v59 }
  0xb3   : > { %v325_v15 = vsel %vm321_vm2, %v2873_v5, inf }
  0xb6   : > { %v227_v31 = vpop.f32.mrf.mxu0 }
  0xb7   : > { %v292_v50 = vmul.f32 2.0, %v227_v31 }
  0xb9   : > { %v2865_v62 = vsub.f32 %v284_v48, %v292_v50 }
  0xbb   : > { %v326_v9 = vsel %vm321_vm2, %v2865_v62, inf }
  0xbc   : > { %v327_v17 = vmin.f32 %v322_v13, %v326_v9 }
  0xbe   : > { %v230_v38 = vpop.f32.mrf.mxu0 }
  0xbf   : > { %v293_v46 = vmul.f32 2.0, %v230_v38  ;;  %v2895_v38 = vcvt.s32.f32 %v306_v28 }
  0xc1   : > { %v2861_v60 = vsub.f32 %v285_v45, %v293_v46  ;;  %v2907_v45 = vcvt.s32.f32 %v312_v35 }
  0xc3   : > { %v328_v6 = vsel %vm321_vm2, %v2861_v60, inf }
  0xc4   : > { %v329_v12 = vmin.f32 %v323_v8, %v328_v6 }
  0xc6   : > { %v233_v44 = vpop.f32.mrf.mxu0  ;;  %v334_v20 = vmin.f32 %v327_v17, %v329_v12 }
  0xc7   : > { %v294_v52 = vmul.f32 2.0, %v233_v44  ;;  %v2905_v44 = vcvt.s32.f32 %v311_v34 }
  0xc9   : > { %v2867_v63 = vsub.f32 %v286_v51, %v294_v52 }
  0xcb   : > { %v330_v10 = vsel %vm321_vm2, %v2867_v63, inf }
  0xcc   : > { %v331_v18 = vmin.f32 %v324_v14, %v330_v10 }
  0xce   : > { %v236_v3 = vpop.f32.mrf.mxu0 }
  0xcf   : > { %v295_v7 = vmul.f32 2.0, %v236_v3 }
  0xd1   : > { %v2883_v11 = vsub.f32 %v287_v1, %v295_v7 }
  0xd3   : > { %v332_v16 = vsel %vm321_vm2, %v2883_v11, inf }
  0xd4   : > { %v333_v19 = vmin.f32 %v325_v15, %v332_v16 }
  0xd6   : > { %v335_v21 = vmin.f32 %v331_v18, %v333_v19 }
  0xd8   : > { %v336_v23 = vmin.f32 %v334_v20, %v335_v21  ;;  %v2748_v20 = vmov 1.0  }
  0xda   : > { %v337_v24 = vrot.slane %v336_v23, 4 }
  0xdc   : > { %v338_v26 = vmin.f32 %v336_v23, %v337_v24 }
  0xde   : > { %v339_v27 = vrot.slane %v338_v26, 2 }
  0xe0   : > { %v340_v31 = vmin.f32 %v338_v26, %v339_v27 }
  0xe2   : > { %v341_v36 = vrot.slane %v340_v31, 1 }
  0xe4   : > { %v342_v41 = vmin.f32 %v340_v31, %v341_v36 }
  0xe6   : > { %vm343_vm3 = vcmp.le.f32.partialorder %v2869_v2, %v342_v41  ;;  %vm344_vm4 = vcmp.le.f32.partialorder %v2863_v61, %v342_v41  ;;  %vm345_vm5 = vcmp.le.f32.partialorder %v2871_v4, %v342_v41  ;;  %vm346_vm6 = vcmp.le.f32.partialorder %v2873_v5, %v342_v41 }
  0xe7   : > { %vm347_vm7 = vcmp.le.f32.partialorder %v2865_v62, %v342_v41  ;;  %vm348_vm8 = vcmp.le.f32.partialorder %v2861_v60, %v342_v41  ;;  %vm349_vm9 = vcmp.le.f32.partialorder %v2867_v63, %v342_v41  ;;  %vm350_vm10 = vcmp.le.f32.partialorder %v2883_v11, %v342_v41 }
  0xe8   : > { %v351_v46 = vsel %vm343_vm3, %v2893_v37, 64.0  ;;  %v352_v47 = vsel %vm344_vm4, %v2895_v38, 64.0  ;;  %v353_v48 = vsel %vm345_vm5, %v2897_v39, 64.0  ;;  %v354_v49 = vsel %vm346_vm6, %v2899_v40, 64.0 }
  0xe9   : > { %v355_v50 = vsel %vm347_vm7, %v2901_v42, 64.0  ;;  %v356_v51 = vsel %vm348_vm8, %v2903_v43, 64.0  ;;  %v357_v52 = vsel %vm349_vm9, %v2905_v44, 64.0  ;;  %v358_v53 = vsel %vm350_vm10, %v2907_v45, 64.0 }
  0xea   : > { %v359_v54 = vsel %vm321_vm2, %v351_v46, inf  ;;  %v360_v55 = vsel %vm321_vm2, %v352_v47, inf  ;;  %v361_v56 = vsel %vm321_vm2, %v353_v48, inf  ;;  %v362_v57 = vsel %vm321_vm2, %v354_v49, inf }
  0xeb   : > { %v363_v58 = vsel %vm321_vm2, %v355_v50, inf  ;;  %v365_v59 = vsel %vm321_vm2, %v356_v51, inf  ;;  %v367_v1 = vsel %vm321_vm2, %v357_v52, inf  ;;  %v369_v3 = vsel %vm321_vm2, %v358_v53, inf }
  0xec   : > { %v364_v6 = vmin.f32 %v359_v54, %v363_v58  ;;  %v366_v7 = vmin.f32 %v360_v55, %v365_v59  ;;  %v368_v8 = vmin.f32 %v361_v56, %v367_v1  ;;  %v370_v9 = vmin.f32 %v362_v57, %v369_v3 }
  0xee   : > { %v371_v10 = vmin.f32 %v364_v6, %v366_v7  ;;  %v372_v12 = vmin.f32 %v368_v8, %v370_v9 }
  0xf0   : > { %v373_v13 = vmin.f32 %v371_v10, %v372_v12 }
  0xf2   : > { %v374_v14 = vrot.slane %v373_v13, 4 }
  0xf4   : > { %v375_v15 = vmin.f32 %v373_v13, %v374_v14 }
  0xf6   : > { %v376_v16 = vrot.slane %v375_v15, 2 }
  0xf8   : > { %v377_v17 = vmin.f32 %v375_v15, %v376_v16 }
  0xfa   : > { %v378_v18 = vrot.slane %v377_v17, 1 }
  0xfc   : > { %v379_v19 = vmin.f32 %v377_v17, %v378_v18 }
  0xfe   : > { %vm387_vm11 = vcmp.eq.f32.partialorder %v2907_v45, %v379_v19  ;;  %vm386_vm12 = vcmp.eq.f32.partialorder %v2905_v44, %v379_v19  ;;  %vm385_vm13 = vcmp.eq.f32.partialorder %v2903_v43, %v379_v19  ;;  %vm384_vm14 = vcmp.eq.f32.partialorder %v2901_v42, %v379_v19 }
  0xff   : > { %2386 = vmatpush.msk.msra.mxu1 %vm387_vm11, %v2748_v20  ;;  %v2939_v21 = vsel %vm387_vm11, 1e+30, %v2883_v11  ;;  %v2942_v22 = vsel %vm386_vm12, 1e+30, %v2867_v63  ;;  %v2947_v23 = vsel %vm385_vm13, 1e+30, %v2861_v60  ;;  %vm383_vm15 = vcmp.eq.f32.partialorder %v2899_v40, %v379_v19 }
 0x100   : > { %v454_v24 = vsel %vm321_vm2, %v2939_v21, inf  ;;  %v452_v25 = vsel %vm321_vm2, %v2942_v22, inf  ;;  %v450_v11 = vsel %vm321_vm2, %v2947_v23, inf  ;;  %v2959_v63 = vsel %vm384_vm14, 1e+30, %v2865_v62 }
 0x101   : > { %2387 = vmatpush.msk.msra.mxu1 %vm386_vm12, %v2748_v20  ;;  %v448_v60 = vsel %vm321_vm2, %v2959_v63, inf  ;;  %v2967_v26 = vsel %vm383_vm15, 1e+30, %v2873_v5  ;;  %vm382_vm0 = vcmp.eq.f32.partialorder %v2897_v39, %v379_v19  ;;  %vm381_vm1 = vcmp.eq.f32.partialorder %v2895_v38, %v379_v19 }
 0x102   : > { %v447_v27 = vsel %vm321_vm2, %v2967_v26, inf  ;;  %v2976_v62 = vsel %vm382_vm0, 1e+30, %v2871_v4  ;;  %v2981_v28 = vsel %vm381_vm1, 1e+30, %v2863_v61  ;;  %vm380_vm3 = vcmp.eq.f32.partialorder %v2893_v37, %v379_v19 }
 0x103   : > { %2388 = vmatpush.msk.msra.mxu1 %vm385_vm13, %v2748_v20  ;;  %v455_v5 = vmin.f32 %v447_v27, %v454_v24  ;;  %v446_v29 = vsel %vm321_vm2, %v2976_v62, inf  ;;  %v445_v30 = vsel %vm321_vm2, %v2981_v28, inf  ;;  %v2994_v4 = vsel %vm380_vm3, 1e+30, %v2869_v2 }
 0x104   : > { %v453_v61 = vmin.f32 %v446_v29, %v452_v25  ;;  %v451_v31 = vmin.f32 %v445_v30, %v450_v11  ;;  %v444_v32 = vsel %vm321_vm2, %v2994_v4, inf }
 0x105   : > { %2389 = vmatpush.msk.msra.mxu1 %vm384_vm14, %v2748_v20  ;;  %v449_v33 = vmin.f32 %v444_v32, %v448_v60 }
 0x106   : > { %v457_v34 = vmin.f32 %v453_v61, %v455_v5 }
 0x107   : > { %2390 = vmatpush.msk.msra.mxu1 %vm383_vm15, %v2748_v20  ;;  %v456_v35 = vmin.f32 %v449_v33, %v451_v31 }
 0x109   : > { %2391 = vmatpush.msk.msra.mxu1 %vm382_vm0, %v2748_v20  ;;  %v458_v2 = vmin.f32 %v456_v35, %v457_v34 }
 0x10b   : > { %2392 = vmatpush.msk.msra.mxu1 %vm381_vm1, %v2748_v20  ;;  %v459_v36 = vrot.slane %v458_v2, 4 }
 0x10d   : > { %2393 = vmatpush.msk.msra.mxu1 %vm380_vm3, %v2748_v20  ;;  %v460_v41 = vmin.f32 %v458_v2, %v459_v36 }
 0x10e   : > { %2394 = vmatmul.msk.f32.vlgmr.msra.gmra.mxu1 %vm321_vm2, %v2832_v0 }
 0x10f   : > { %v461_v46 = vrot.slane %v460_v41, 2 }
 0x111   : > { %v462_v47 = vmin.f32 %v460_v41, %v461_v46 }
 0x113   : > { %v463_v48 = vrot.slane %v462_v47, 1 }
 0x115   : > { %v464_v49 = vmin.f32 %v462_v47, %v463_v48 }
 0x117   : > { %vm465_vm4 = vcmp.le.f32.partialorder %v2994_v4, %v464_v49  ;;  %vm466_vm5 = vcmp.le.f32.partialorder %v2981_v28, %v464_v49  ;;  %vm467_vm6 = vcmp.le.f32.partialorder %v2976_v62, %v464_v49  ;;  %vm468_vm7 = vcmp.le.f32.partialorder %v2967_v26, %v464_v49 }
 0x118   : > { %v473_v50 = vsel %vm465_vm4, %v2893_v37, 64.0  ;;  %vm469_vm8 = vcmp.le.f32.partialorder %v2959_v63, %v464_v49  ;;  %vm470_vm9 = vcmp.le.f32.partialorder %v2947_v23, %v464_v49  ;;  %vm471_vm10 = vcmp.le.f32.partialorder %v2942_v22, %v464_v49 }
 0x119   : > { %v481_v51 = vsel %vm321_vm2, %v473_v50, inf  ;;  %vm472_vm11 = vcmp.le.f32.partialorder %v2939_v21, %v464_v49  ;;  %v474_v52 = vsel %vm466_vm5, %v2895_v38, 64.0  ;;  %v475_v53 = vsel %vm467_vm6, %v2897_v39, 64.0 }
 0x11a   : > { %v476_v54 = vsel %vm468_vm7, %v2899_v40, 64.0  ;;  %v477_v55 = vsel %vm469_vm8, %v2901_v42, 64.0  ;;  %v478_v56 = vsel %vm470_vm9, %v2903_v43, 64.0  ;;  %v479_v57 = vsel %vm471_vm10, %v2905_v44, 64.0 }
 0x11b   : > { %v480_v58 = vsel %vm472_vm11, %v2907_v45, 64.0  ;;  %v482_v59 = vsel %vm321_vm2, %v474_v52, inf  ;;  %v483_v1 = vsel %vm321_vm2, %v475_v53, inf  ;;  %v484_v3 = vsel %vm321_vm2, %v476_v54, inf }
 0x11c   : > { %v485_v6 = vsel %vm321_vm2, %v477_v55, inf  ;;  %v487_v7 = vsel %vm321_vm2, %v478_v56, inf  ;;  %v489_v8 = vsel %vm321_vm2, %v479_v57, inf  ;;  %v491_v9 = vsel %vm321_vm2, %v480_v58, inf }
 0x11d   : > { %v486_v10 = vmin.f32 %v481_v51, %v485_v6  ;;  %v488_v12 = vmin.f32 %v482_v59, %v487_v7  ;;  %v490_v13 = vmin.f32 %v483_v1, %v489_v8  ;;  %v492_v14 = vmin.f32 %v484_v3, %v491_v9 }
 0x11f   : > { %v493_v15 = vmin.f32 %v486_v10, %v488_v12  ;;  %v494_v16 = vmin.f32 %v490_v13, %v492_v14 }
 0x121   : > { %v495_v17 = vmin.f32 %v493_v15, %v494_v16 }
 0x123   : > { %v496_v18 = vrot.slane %v495_v17, 4 }
 0x125   : > { %v497_v19 = vmin.f32 %v495_v17, %v496_v18 }
 0x127   : > { %v498_v24 = vrot.slane %v497_v19, 2 }
 0x129   : > { %v499_v25 = vmin.f32 %v497_v19, %v498_v24 }
 0x12b   : > { %v500_v11 = vrot.slane %v499_v25, 1 }
 0x12d   : > { %v501_v60 = vmin.f32 %v499_v25, %v500_v11 }
 0x12f   : > { %vm509_vm12 = vcmp.eq.f32.partialorder %v2907_v45, %v501_v60  ;;  %vm508_vm13 = vcmp.eq.f32.partialorder %v2905_v44, %v501_v60  ;;  %vm507_vm14 = vcmp.eq.f32.partialorder %v2903_v43, %v501_v60  ;;  %vm506_vm15 = vcmp.eq.f32.partialorder %v2901_v42, %v501_v60 }
 0x130   : > { %2403 = vmatpush.msk.msra.mxu2 %vm509_vm12, %v2748_v20  ;;  %v3045_v27 = vsel %vm509_vm12, 1e+30, %v2939_v21  ;;  %v3048_v5 = vsel %vm508_vm13, 1e+30, %v2942_v22  ;;  %v3053_v29 = vsel %vm507_vm14, 1e+30, %v2947_v23  ;;  %vm505_vm0 = vcmp.eq.f32.partialorder %v2899_v40, %v501_v60 }
 0x131   : > { %v573_v30 = vsel %vm321_vm2, %v3045_v27, inf  ;;  %v571_v61 = vsel %vm321_vm2, %v3048_v5, inf  ;;  %v569_v21 = vsel %vm321_vm2, %v3053_v29, inf  ;;  %v3065_v22 = vsel %vm506_vm15, 1e+30, %v2959_v63 }
 0x132   : > { %2404 = vmatpush.msk.msra.mxu2 %vm508_vm13, %v2748_v20  ;;  %v567_v23 = vsel %vm321_vm2, %v3065_v22, inf  ;;  %v3073_v31 = vsel %vm505_vm0, 1e+30, %v2967_v26  ;;  %vm504_vm1 = vcmp.eq.f32.partialorder %v2897_v39, %v501_v60  ;;  %vm503_vm3 = vcmp.eq.f32.partialorder %v2895_v38, %v501_v60 }
 0x133   : > { %v566_v32 = vsel %vm321_vm2, %v3073_v31, inf  ;;  %v3082_v63 = vsel %vm504_vm1, 1e+30, %v2976_v62  ;;  %v3087_v33 = vsel %vm503_vm3, 1e+30, %v2981_v28  ;;  %vm502_vm4 = vcmp.eq.f32.partialorder %v2893_v37, %v501_v60 }
 0x134   : > { %2405 = vmatpush.msk.msra.mxu2 %vm507_vm14, %v2748_v20  ;;  %v574_v26 = vmin.f32 %v566_v32, %v573_v30  ;;  %v565_v34 = vsel %vm321_vm2, %v3082_v63, inf  ;;  %v564_v35 = vsel %vm321_vm2, %v3087_v33, inf  ;;  %v3100_v62 = vsel %vm502_vm4, 1e+30, %v2994_v4 }
 0x135   : > { %v572_v28 = vmin.f32 %v565_v34, %v571_v61  ;;  %v570_v2 = vmin.f32 %v564_v35, %v569_v21  ;;  %v563_v36 = vsel %vm321_vm2, %v3100_v62, inf }
 0x136   : > { %2406 = vmatpush.msk.msra.mxu2 %vm506_vm15, %v2748_v20  ;;  %v568_v41 = vmin.f32 %v563_v36, %v567_v23 }
 0x137   : > { %v576_v46 = vmin.f32 %v572_v28, %v574_v26 }
 0x138   : > { %2407 = vmatpush.msk.msra.mxu2 %vm505_vm0, %v2748_v20  ;;  %v575_v47 = vmin.f32 %v568_v41, %v570_v2 }
 0x13a   : > { %2408 = vmatpush.msk.msra.mxu2 %vm504_vm1, %v2748_v20  ;;  %v577_v4 = vmin.f32 %v575_v47, %v576_v46 }
 0x13c   : > { %2409 = vmatpush.msk.msra.mxu2 %vm503_vm3, %v2748_v20  ;;  %v578_v48 = vrot.slane %v577_v4, 4 }
 0x13e   : > { %2410 = vmatpush.msk.msra.mxu2 %vm502_vm4, %v2748_v20  ;;  %v579_v49 = vmin.f32 %v577_v4, %v578_v48 }
 0x13f   : > { %2411 = vmatmul.msk.f32.vlgmr.msra.gmra.mxu2 %vm321_vm2, %v2832_v0 }
 0x140   : > { %v580_v50 = vrot.slane %v579_v49, 2 }
 0x142   : > { %v581_v51 = vmin.f32 %v579_v49, %v580_v50 }
 0x144   : > { %v582_v52 = vrot.slane %v581_v51, 1 }
 0x146   : > { %v583_v53 = vmin.f32 %v581_v51, %v582_v52 }
 0x148   : > { %vm584_vm5 = vcmp.le.f32.partialorder %v3100_v62, %v583_v53  ;;  %vm585_vm6 = vcmp.le.f32.partialorder %v3087_v33, %v583_v53  ;;  %vm586_vm7 = vcmp.le.f32.partialorder %v3082_v63, %v583_v53  ;;  %vm587_vm8 = vcmp.le.f32.partialorder %v3073_v31, %v583_v53 }
 0x149   : > { %v592_v54 = vsel %vm584_vm5, %v2893_v37, 64.0  ;;  %vm588_vm9 = vcmp.le.f32.partialorder %v3065_v22, %v583_v53  ;;  %vm589_vm10 = vcmp.le.f32.partialorder %v3053_v29, %v583_v53  ;;  %vm590_vm11 = vcmp.le.f32.partialorder %v3048_v5, %v583_v53 }
 0x14a   : > { %v600_v55 = vsel %vm321_vm2, %v592_v54, inf  ;;  %vm591_vm12 = vcmp.le.f32.partialorder %v3045_v27, %v583_v53  ;;  %v593_v56 = vsel %vm585_vm6, %v2895_v38, 64.0  ;;  %v594_v57 = vsel %vm586_vm7, %v2897_v39, 64.0 }
 0x14b   : > { %v595_v58 = vsel %vm587_vm8, %v2899_v40, 64.0  ;;  %v596_v59 = vsel %vm588_vm9, %v2901_v42, 64.0  ;;  %v597_v1 = vsel %vm589_vm10, %v2903_v43, 64.0  ;;  %v598_v3 = vsel %vm590_vm11, %v2905_v44, 64.0 }
 0x14c   : > { %v599_v6 = vsel %vm591_vm12, %v2907_v45, 64.0  ;;  %v601_v7 = vsel %vm321_vm2, %v593_v56, inf  ;;  %v602_v8 = vsel %vm321_vm2, %v594_v57, inf  ;;  %v603_v9 = vsel %vm321_vm2, %v595_v58, inf }
 0x14d   : > { %v604_v10 = vsel %vm321_vm2, %v596_v59, inf  ;;  %v606_v12 = vsel %vm321_vm2, %v597_v1, inf  ;;  %v608_v13 = vsel %vm321_vm2, %v598_v3, inf  ;;  %v610_v14 = vsel %vm321_vm2, %v599_v6, inf }
 0x14e   : > { %v605_v15 = vmin.f32 %v600_v55, %v604_v10  ;;  %v607_v16 = vmin.f32 %v601_v7, %v606_v12  ;;  %v609_v17 = vmin.f32 %v602_v8, %v608_v13  ;;  %v611_v18 = vmin.f32 %v603_v9, %v610_v14 }
 0x150   : > { %v612_v19 = vmin.f32 %v605_v15, %v607_v16  ;;  %v613_v24 = vmin.f32 %v609_v17, %v611_v18 }
 0x152   : > { %v614_v25 = vmin.f32 %v612_v19, %v613_v24 }
 0x154   : > { %v615_v11 = vrot.slane %v614_v25, 4 }
 0x156   : > { %v616_v60 = vmin.f32 %v614_v25, %v615_v11 }
 0x158   : > { %v617_v30 = vrot.slane %v616_v60, 2 }
 0x15a   : > { %v618_v61 = vmin.f32 %v616_v60, %v617_v30 }
 0x15c   : > { %v619_v21 = vrot.slane %v618_v61, 1 }
 0x15e   : > { %v620_v23 = vmin.f32 %v618_v61, %v619_v21 }
 0x160   : > { %vm628_vm13 = vcmp.eq.f32.partialorder %v2907_v45, %v620_v23  ;;  %vm627_vm14 = vcmp.eq.f32.partialorder %v2905_v44, %v620_v23  ;;  %vm626_vm15 = vcmp.eq.f32.partialorder %v2903_v43, %v620_v23  ;;  %vm625_vm0 = vcmp.eq.f32.partialorder %v2901_v42, %v620_v23 }
 0x161   : > { %2420 = vmatpush.msk.msra.mxu3 %vm628_vm13, %v2748_v20  ;;  %v3151_v32 = vsel %vm628_vm13, 1e+30, %v3045_v27  ;;  %v3154_v26 = vsel %vm627_vm14, 1e+30, %v3048_v5  ;;  %v3159_v34 = vsel %vm626_vm15, 1e+30, %v3053_v29  ;;  %vm624_vm1 = vcmp.eq.f32.partialorder %v2899_v40, %v620_v23 }
 0x162   : > { %v692_v35 = vsel %vm321_vm2, %v3151_v32, inf  ;;  %v690_v28 = vsel %vm321_vm2, %v3154_v26, inf  ;;  %v688_v27 = vsel %vm321_vm2, %v3159_v34, inf  ;;  %v3171_v5 = vsel %vm625_vm0, 1e+30, %v3065_v22 }
 0x163   : > { %2421 = vmatpush.msk.msra.mxu3 %vm627_vm14, %v2748_v20  ;;  %v686_v29 = vsel %vm321_vm2, %v3171_v5, inf  ;;  %v3179_v2 = vsel %vm624_vm1, 1e+30, %v3073_v31  ;;  %vm623_vm3 = vcmp.eq.f32.partialorder %v2897_v39, %v620_v23  ;;  %vm622_vm4 = vcmp.eq.f32.partialorder %v2895_v38, %v620_v23 }
 0x164   : > { %v685_v36 = vsel %vm321_vm2, %v3179_v2, inf  ;;  %v3188_v22 = vsel %vm623_vm3, 1e+30, %v3082_v63  ;;  %v3193_v41 = vsel %vm622_vm4, 1e+30, %v3087_v33  ;;  %vm621_vm5 = vcmp.eq.f32.partialorder %v2893_v37, %v620_v23 }
 0x165   : > { %2422 = vmatpush.msk.msra.mxu3 %vm626_vm15, %v2748_v20  ;;  %v693_v31 = vmin.f32 %v685_v36, %v692_v35  ;;  %v684_v46 = vsel %vm321_vm2, %v3188_v22, inf  ;;  %v683_v47 = vsel %vm321_vm2, %v3193_v41, inf  ;;  %v3206_v63 = vsel %vm621_vm5, 1e+30, %v3100_v62 }
 0x166   : > { %v691_v33 = vmin.f32 %v684_v46, %v690_v28  ;;  %v689_v4 = vmin.f32 %v683_v47, %v688_v27  ;;  %v682_v48 = vsel %vm321_vm2, %v3206_v63, inf }
 0x167   : > { %2423 = vmatpush.msk.msra.mxu3 %vm625_vm0, %v2748_v20  ;;  %v687_v49 = vmin.f32 %v682_v48, %v686_v29 }
 0x168   : > { %v695_v50 = vmin.f32 %v691_v33, %v693_v31 }
 0x169   : > { %2424 = vmatpush.msk.msra.mxu3 %vm624_vm1, %v2748_v20  ;;  %v694_v51 = vmin.f32 %v687_v49, %v689_v4 }
 0x16b   : > { %2425 = vmatpush.msk.msra.mxu3 %vm623_vm3, %v2748_v20  ;;  %v696_v62 = vmin.f32 %v694_v51, %v695_v50 }
 0x16d   : > { %2426 = vmatpush.msk.msra.mxu3 %vm622_vm4, %v2748_v20  ;;  %v697_v52 = vrot.slane %v696_v62, 4 }
 0x16f   : > { %2427 = vmatpush.msk.msra.mxu3 %vm621_vm5, %v2748_v20  ;;  %v698_v53 = vmin.f32 %v696_v62, %v697_v52 }
 0x170   : > { %2428 = vmatmul.msk.f32.vlgmr.msra.gmra.mxu3 %vm321_vm2, %v2832_v0 }
 0x171   : > { %v699_v54 = vrot.slane %v698_v53, 2 }
 0x173   : > { %v700_v55 = vmin.f32 %v698_v53, %v699_v54 }
 0x175   : > { %v701_v56 = vrot.slane %v700_v55, 1 }
 0x177   : > { %v702_v57 = vmin.f32 %v700_v55, %v701_v56 }
 0x179   : > { %vm703_vm6 = vcmp.le.f32.partialorder %v3206_v63, %v702_v57  ;;  %vm704_vm7 = vcmp.le.f32.partialorder %v3193_v41, %v702_v57  ;;  %vm705_vm8 = vcmp.le.f32.partialorder %v3188_v22, %v702_v57  ;;  %vm706_vm9 = vcmp.le.f32.partialorder %v3179_v2, %v702_v57 }
 0x17a   : > { %v711_v58 = vsel %vm703_vm6, %v2893_v37, 64.0  ;;  %vm707_vm10 = vcmp.le.f32.partialorder %v3171_v5, %v702_v57  ;;  %vm708_vm11 = vcmp.le.f32.partialorder %v3159_v34, %v702_v57  ;;  %vm709_vm12 = vcmp.le.f32.partialorder %v3154_v26, %v702_v57 }
 0x17b   : > { %v719_v59 = vsel %vm321_vm2, %v711_v58, inf  ;;  %vm710_vm13 = vcmp.le.f32.partialorder %v3151_v32, %v702_v57  ;;  %v712_v1 = vsel %vm704_vm7, %v2895_v38, 64.0  ;;  %v713_v3 = vsel %vm705_vm8, %v2897_v39, 64.0 }
 0x17c   : > { %v714_v6 = vsel %vm706_vm9, %v2899_v40, 64.0  ;;  %v715_v7 = vsel %vm707_vm10, %v2901_v42, 64.0  ;;  %v716_v8 = vsel %vm708_vm11, %v2903_v43, 64.0  ;;  %v717_v9 = vsel %vm709_vm12, %v2905_v44, 64.0 }
 0x17d   : > { %v718_v10 = vsel %vm710_vm13, %v2907_v45, 64.0  ;;  %v720_v12 = vsel %vm321_vm2, %v712_v1, inf  ;;  %v721_v13 = vsel %vm321_vm2, %v713_v3, inf  ;;  %v722_v14 = vsel %vm321_vm2, %v714_v6, inf }
 0x17e   : > { %v723_v15 = vsel %vm321_vm2, %v715_v7, inf  ;;  %v725_v16 = vsel %vm321_vm2, %v716_v8, inf  ;;  %v727_v17 = vsel %vm321_vm2, %v717_v9, inf  ;;  %v729_v18 = vsel %vm321_vm2, %v718_v10, inf }
 0x17f   : > { %v724_v19 = vmin.f32 %v719_v59, %v723_v15  ;;  %v726_v24 = vmin.f32 %v720_v12, %v725_v16  ;;  %v728_v25 = vmin.f32 %v721_v13, %v727_v17  ;;  %v730_v11 = vmin.f32 %v722_v14, %v729_v18 }
 0x181   : > { %v731_v60 = vmin.f32 %v724_v19, %v726_v24  ;;  %v732_v30 = vmin.f32 %v728_v25, %v730_v11 }
 0x183   : > { %v733_v61 = vmin.f32 %v731_v60, %v732_v30 }
 0x185   : > { %v734_v21 = vrot.slane %v733_v61, 4 }
 0x187   : > { %v735_v23 = vmin.f32 %v733_v61, %v734_v21 }
 0x189   : > { %v736_v35 = vrot.slane %v735_v23, 2 }
 0x18b   : > { %v737_v28 = vmin.f32 %v735_v23, %v736_v35 }
 0x18d   : > { %v738_v27 = vrot.slane %v737_v28, 1 }
 0x18f   : > { %v739_v29 = vmin.f32 %v737_v28, %v738_v27 }
 0x191   : > { %vm747_vm14 = vcmp.eq.f32.partialorder %v2907_v45, %v739_v29  ;;  %vm746_vm15 = vcmp.eq.f32.partialorder %v2905_v44, %v739_v29  ;;  %vm745_vm0 = vcmp.eq.f32.partialorder %v2903_v43, %v739_v29  ;;  %vm744_vm1 = vcmp.eq.f32.partialorder %v2901_v42, %v739_v29 }
 0x192   : > { %2437 = vmatpush.msk.msrb.mxu1 %vm747_vm14, %v2748_v20  ;;  %v3257_v36 = vsel %vm747_vm14, 1e+30, %v3151_v32  ;;  %v3260_v31 = vsel %vm746_vm15, 1e+30, %v3154_v26  ;;  %v3265_v46 = vsel %vm745_vm0, 1e+30, %v3159_v34  ;;  %vm743_vm3 = vcmp.eq.f32.partialorder %v2899_v40, %v739_v29 }
 0x193   : > { %v811_v47 = vsel %vm321_vm2, %v3257_v36, inf  ;;  %v809_v33 = vsel %vm321_vm2, %v3260_v31, inf  ;;  %v807_v32 = vsel %vm321_vm2, %v3265_v46, inf  ;;  %v3277_v26 = vsel %vm744_vm1, 1e+30, %v3171_v5 }
 0x194   : > { %2438 = vmatpush.msk.msrb.mxu1 %vm746_vm15, %v2748_v20  ;;  %v805_v34 = vsel %vm321_vm2, %v3277_v26, inf  ;;  %v3285_v4 = vsel %vm743_vm3, 1e+30, %v3179_v2  ;;  %vm742_vm4 = vcmp.eq.f32.partialorder %v2897_v39, %v739_v29  ;;  %vm741_vm5 = vcmp.eq.f32.partialorder %v2895_v38, %v739_v29 }
 0x195   : > { %v804_v48 = vsel %vm321_vm2, %v3285_v4, inf  ;;  %v3294_v5 = vsel %vm742_vm4, 1e+30, %v3188_v22  ;;  %v3299_v49 = vsel %vm741_vm5, 1e+30, %v3193_v41  ;;  %vm740_vm6 = vcmp.eq.f32.partialorder %v2893_v37, %v739_v29 }
 0x196   : > { %2439 = vmatpush.msk.msrb.mxu1 %vm745_vm0, %v2748_v20  ;;  %v812_v2 = vmin.f32 %v804_v48, %v811_v47  ;;  %v803_v50 = vsel %vm321_vm2, %v3294_v5, inf  ;;  %v802_v51 = vsel %vm321_vm2, %v3299_v49, inf  ;;  %v3312_v22 = vsel %vm740_vm6, 1e+30, %v3206_v63 }
 0x197   : > { %v810_v41 = vmin.f32 %v803_v50, %v809_v33  ;;  %v808_v62 = vmin.f32 %v802_v51, %v807_v32  ;;  %v801_v52 = vsel %vm321_vm2, %v3312_v22, inf }
 0x198   : > { %2440 = vmatpush.msk.msrb.mxu1 %vm744_vm1, %v2748_v20  ;;  %v806_v53 = vmin.f32 %v801_v52, %v805_v34 }
 0x199   : > { %v814_v54 = vmin.f32 %v810_v41, %v812_v2 }
 0x19a   : > { %2441 = vmatpush.msk.msrb.mxu1 %vm743_vm3, %v2748_v20  ;;  %v813_v55 = vmin.f32 %v806_v53, %v808_v62 }
 0x19c   : > { %2442 = vmatpush.msk.msrb.mxu1 %vm742_vm4, %v2748_v20  ;;  %v815_v63 = vmin.f32 %v813_v55, %v814_v54 }
 0x19e   : > { %2443 = vmatpush.msk.msrb.mxu1 %vm741_vm5, %v2748_v20  ;;  %v816_v56 = vrot.slane %v815_v63, 4 }
 0x1a0   : > { %2444 = vmatpush.msk.msrb.mxu1 %vm740_vm6, %v2748_v20  ;;  %v817_v57 = vmin.f32 %v815_v63, %v816_v56 }
 0x1a1   : > { %2445 = vmatmul.msk.f32.vlgmr.msrb.gmra.mxu1 %vm321_vm2, %v2832_v0 }
 0x1a2   : > { %v818_v58 = vrot.slane %v817_v57, 2 }
 0x1a4   : > { %v819_v59 = vmin.f32 %v817_v57, %v818_v58 }
 0x1a6   : > { %v820_v1 = vrot.slane %v819_v59, 1 }
 0x1a8   : > { %v821_v3 = vmin.f32 %v819_v59, %v820_v1 }
 0x1aa   : > { %vm822_vm7 = vcmp.le.f32.partialorder %v3312_v22, %v821_v3  ;;  %vm823_vm8 = vcmp.le.f32.partialorder %v3299_v49, %v821_v3  ;;  %vm824_vm9 = vcmp.le.f32.partialorder %v3294_v5, %v821_v3  ;;  %vm825_vm10 = vcmp.le.f32.partialorder %v3285_v4, %v821_v3 }
 0x1ab   : > { %v830_v6 = vsel %vm822_vm7, %v2893_v37, 64.0  ;;  %vm826_vm11 = vcmp.le.f32.partialorder %v3277_v26, %v821_v3  ;;  %vm827_vm12 = vcmp.le.f32.partialorder %v3265_v46, %v821_v3  ;;  %vm828_vm13 = vcmp.le.f32.partialorder %v3260_v31, %v821_v3 }
 0x1ac   : > { %v838_v0 = vsel %vm321_vm2, %v830_v6, inf  ;;  %vm829_vm14 = vcmp.le.f32.partialorder %v3257_v36, %v821_v3  ;;  %v831_v7 = vsel %vm823_vm8, %v2895_v38, 64.0  ;;  %v832_v8 = vsel %vm824_vm9, %v2897_v39, 64.0  ;;  %v3438_v3 = vld [vmem:[%s2824_s26] sm:$0x7] }
 0x1ad   : > { %v833_v9 = vsel %vm825_vm10, %v2899_v40, 64.0  ;;  %v834_v10 = vsel %vm826_vm11, %v2901_v42, 64.0  ;;  %v835_v12 = vsel %vm827_vm12, %v2903_v43, 64.0  ;;  %v836_v13 = vsel %vm828_vm13, %v2905_v44, 64.0 }
 0x1ae   : > { %v837_v14 = vsel %vm829_vm14, %v2907_v45, 64.0  ;;  %v839_v15 = vsel %vm321_vm2, %v831_v7, inf  ;;  %v840_v16 = vsel %vm321_vm2, %v832_v8, inf  ;;  %v841_v17 = vsel %vm321_vm2, %v833_v9, inf }
 0x1af   : > { %v842_v18 = vsel %vm321_vm2, %v834_v10, inf  ;;  %v844_v19 = vsel %vm321_vm2, %v835_v12, inf  ;;  %v846_v24 = vsel %vm321_vm2, %v836_v13, inf  ;;  %v848_v25 = vsel %vm321_vm2, %v837_v14, inf }
 0x1b0   : > { %v843_v11 = vmin.f32 %v838_v0, %v842_v18  ;;  %v845_v60 = vmin.f32 %v839_v15, %v844_v19  ;;  %v847_v30 = vmin.f32 %v840_v16, %v846_v24  ;;  %v849_v61 = vmin.f32 %v841_v17, %v848_v25 }
 0x1b2   : > { %v850_v21 = vmin.f32 %v843_v11, %v845_v60  ;;  %v851_v23 = vmin.f32 %v847_v30, %v849_v61 }
 0x1b4   : > { %v852_v35 = vmin.f32 %v850_v21, %v851_v23 }
 0x1b6   : > { %v853_v28 = vrot.slane %v852_v35, 4 }
 0x1b8   : > { %v854_v27 = vmin.f32 %v852_v35, %v853_v28 }
 0x1ba   : > { %v855_v29 = vrot.slane %v854_v27, 2 }
 0x1bc   : > { %v856_v47 = vmin.f32 %v854_v27, %v855_v29 }
 0x1be   : > { %v857_v33 = vrot.slane %v856_v47, 1 }
 0x1c0   : > { %v858_v32 = vmin.f32 %v856_v47, %v857_v33 }
 0x1c2   : > { %vm866_vm15 = vcmp.eq.f32.partialorder %v2907_v45, %v858_v32  ;;  %vm865_vm0 = vcmp.eq.f32.partialorder %v2905_v44, %v858_v32  ;;  %vm864_vm1 = vcmp.eq.f32.partialorder %v2903_v43, %v858_v32  ;;  %vm863_vm3 = vcmp.eq.f32.partialorder %v2901_v42, %v858_v32 }
 0x1c3   : > { %2454 = vmatpush.msk.msrb.mxu2 %vm866_vm15, %v2748_v20  ;;  %v3363_v34 = vsel %vm866_vm15, 1e+30, %v3257_v36  ;;  %v3366_v48 = vsel %vm865_vm0, 1e+30, %v3260_v31  ;;  %v3371_v2 = vsel %vm864_vm1, 1e+30, %v3265_v46  ;;  %vm862_vm4 = vcmp.eq.f32.partialorder %v2899_v40, %v858_v32 }
 0x1c4   : > { %v930_v50 = vsel %vm321_vm2, %v3363_v34, inf  ;;  %v928_v51 = vsel %vm321_vm2, %v3366_v48, inf  ;;  %v926_v36 = vsel %vm321_vm2, %v3371_v2, inf  ;;  %v3383_v31 = vsel %vm863_vm3, 1e+30, %v3277_v26 }
 0x1c5   : > { %2455 = vmatpush.msk.msrb.mxu2 %vm865_vm0, %v2748_v20  ;;  %v924_v46 = vsel %vm321_vm2, %v3383_v31, inf  ;;  %v3391_v41 = vsel %vm862_vm4, 1e+30, %v3285_v4  ;;  %vm861_vm5 = vcmp.eq.f32.partialorder %v2897_v39, %v858_v32  ;;  %vm860_vm6 = vcmp.eq.f32.partialorder %v2895_v38, %v858_v32 }
 0x1c6   : > { %v923_v62 = vsel %vm321_vm2, %v3391_v41, inf  ;;  %v3400_v26 = vsel %vm861_vm5, 1e+30, %v3294_v5  ;;  %v3405_v52 = vsel %vm860_vm6, 1e+30, %v3299_v49  ;;  %vm859_vm7 = vcmp.eq.f32.partialorder %v2893_v37, %v858_v32 }
 0x1c7   : > { %2456 = vmatpush.msk.msrb.mxu2 %vm864_vm1, %v2748_v20  ;;  %v931_v4 = vmin.f32 %v923_v62, %v930_v50  ;;  %v922_v53 = vsel %vm321_vm2, %v3400_v26, inf  ;;  %v921_v54 = vsel %vm321_vm2, %v3405_v52, inf  ;;  %v3418_v5 = vsel %vm859_vm7, 1e+30, %v3312_v22 }
 0x1c8   : > { %v929_v49 = vmin.f32 %v922_v53, %v928_v51  ;;  %v927_v55 = vmin.f32 %v921_v54, %v926_v36  ;;  %v920_v63 = vsel %vm321_vm2, %v3418_v5, inf }
 0x1c9   : > { %2457 = vmatpush.msk.msrb.mxu2 %vm863_vm3, %v2748_v20  ;;  %v925_v56 = vmin.f32 %v920_v63, %v924_v46 }
 0x1ca   : > { %v933_v57 = vmin.f32 %v929_v49, %v931_v4 }
 0x1cb   : > { %2458 = vmatpush.msk.msrb.mxu2 %vm862_vm4, %v2748_v20  ;;  %v932_v58 = vmin.f32 %v925_v56, %v927_v55 }
 0x1cd   : > { %2459 = vmatpush.msk.msrb.mxu2 %vm861_vm5, %v2748_v20  ;;  %v934_v22 = vmin.f32 %v932_v58, %v933_v57 }
 0x1cf   : > { %2460 = vmatpush.msk.msrb.mxu2 %vm860_vm6, %v2748_v20  ;;  %v935_v59 = vrot.slane %v934_v22, 4 }
 0x1d1   : > { %2461 = vmatpush.msk.msrb.mxu2 %vm859_vm7, %v2748_v20  ;;  %v936_v1 = vmin.f32 %v934_v22, %v935_v59 }
 0x1d2   : > { %2462 = vmatmul.msk.f32.vlgmr.msrb.gmra.mxu2 %vm321_vm2, %v3438_v3 }
 0x1d3   : > { %v937_v6 = vrot.slane %v936_v1, 2 }
 0x1d5   : > { %v938_v0 = vmin.f32 %v936_v1, %v937_v6 }
 0x1d7   : > { %v939_v7 = vrot.slane %v938_v0, 1 }
 0x1d9   : > { %v940_v8 = vmin.f32 %v938_v0, %v939_v7 }
 0x1db   : > { %vm941_vm8 = vcmp.le.f32.partialorder %v3418_v5, %v940_v8  ;;  %vm942_vm9 = vcmp.le.f32.partialorder %v3405_v52, %v940_v8  ;;  %vm943_vm10 = vcmp.le.f32.partialorder %v3400_v26, %v940_v8  ;;  %vm944_vm11 = vcmp.le.f32.partialorder %v3391_v41, %v940_v8 }
 0x1dc   : > { %v949_v9 = vsel %vm941_vm8, %v2893_v37, 64.0  ;;  %vm945_vm12 = vcmp.le.f32.partialorder %v3383_v31, %v940_v8  ;;  %vm946_vm13 = vcmp.le.f32.partialorder %v3371_v2, %v940_v8  ;;  %vm947_vm14 = vcmp.le.f32.partialorder %v3366_v48, %v940_v8 }
 0x1dd   : > { %v957_v10 = vsel %vm321_vm2, %v949_v9, inf  ;;  %vm948_vm15 = vcmp.le.f32.partialorder %v3363_v34, %v940_v8  ;;  %v950_v12 = vsel %vm942_vm9, %v2895_v38, 64.0  ;;  %v951_v13 = vsel %vm943_vm10, %v2897_v39, 64.0 }
 0x1de   : > { %v952_v14 = vsel %vm944_vm11, %v2899_v40, 64.0  ;;  %v953_v15 = vsel %vm945_vm12, %v2901_v42, 64.0  ;;  %v954_v16 = vsel %vm946_vm13, %v2903_v43, 64.0  ;;  %v955_v17 = vsel %vm947_vm14, %v2905_v44, 64.0 }
 0x1df   : > { %v956_v18 = vsel %vm948_vm15, %v2907_v45, 64.0  ;;  %v958_v19 = vsel %vm321_vm2, %v950_v12, inf  ;;  %v959_v24 = vsel %vm321_vm2, %v951_v13, inf  ;;  %v960_v25 = vsel %vm321_vm2, %v952_v14, inf }
 0x1e0   : > { %v961_v11 = vsel %vm321_vm2, %v953_v15, inf  ;;  %v963_v60 = vsel %vm321_vm2, %v954_v16, inf  ;;  %v965_v30 = vsel %vm321_vm2, %v955_v17, inf  ;;  %v967_v61 = vsel %vm321_vm2, %v956_v18, inf }
 0x1e1   : > { %v962_v21 = vmin.f32 %v957_v10, %v961_v11  ;;  %v964_v23 = vmin.f32 %v958_v19, %v963_v60  ;;  %v966_v35 = vmin.f32 %v959_v24, %v965_v30  ;;  %v968_v28 = vmin.f32 %v960_v25, %v967_v61 }
 0x1e3   : > { %v969_v27 = vmin.f32 %v962_v21, %v964_v23  ;;  %v970_v29 = vmin.f32 %v966_v35, %v968_v28 }
 0x1e5   : > { %v971_v47 = vmin.f32 %v969_v27, %v970_v29 }
 0x1e7   : > { %v972_v33 = vrot.slane %v971_v47, 4 }
 0x1e9   : > { %v973_v32 = vmin.f32 %v971_v47, %v972_v33 }
 0x1eb   : > { %v974_v50 = vrot.slane %v973_v32, 2 }
 0x1ed   : > { %v975_v51 = vmin.f32 %v973_v32, %v974_v50 }
 0x1ef   : > { %v976_v36 = vrot.slane %v975_v51, 1 }
 0x1f1   : > { %v977_v46 = vmin.f32 %v975_v51, %v976_v36 }
 0x1f3   : > { %vm985_vm0 = vcmp.eq.f32.partialorder %v2907_v45, %v977_v46  ;;  %vm984_vm1 = vcmp.eq.f32.partialorder %v2905_v44, %v977_v46  ;;  %vm983_vm3 = vcmp.eq.f32.partialorder %v2903_v43, %v977_v46  ;;  %vm982_vm4 = vcmp.eq.f32.partialorder %v2901_v42, %v977_v46 }
 0x1f4   : > { %2471 = vmatpush.msk.msrb.mxu3 %vm985_vm0, %v2748_v20  ;;  %v3472_v62 = vsel %vm985_vm0, 1e+30, %v3363_v34  ;;  %v3475_v4 = vsel %vm984_vm1, 1e+30, %v3366_v48  ;;  %v3480_v53 = vsel %vm983_vm3, 1e+30, %v3371_v2  ;;  %vm981_vm5 = vcmp.eq.f32.partialorder %v2899_v40, %v977_v46 }
 0x1f5   : > { %v1049_v54 = vsel %vm321_vm2, %v3472_v62, inf  ;;  %v1047_v49 = vsel %vm321_vm2, %v3475_v4, inf  ;;  %v1045_v34 = vsel %vm321_vm2, %v3480_v53, inf  ;;  %v3492_v48 = vsel %vm982_vm4, 1e+30, %v3383_v31 }
 0x1f6   : > { %2472 = vmatpush.msk.msrb.mxu3 %vm984_vm1, %v2748_v20  ;;  %v1043_v2 = vsel %vm321_vm2, %v3492_v48, inf  ;;  %v3500_v55 = vsel %vm981_vm5, 1e+30, %v3391_v41  ;;  %vm980_vm6 = vcmp.eq.f32.partialorder %v2897_v39, %v977_v46  ;;  %vm979_vm7 = vcmp.eq.f32.partialorder %v2895_v38, %v977_v46 }
 0x1f7   : > { %v1042_v63 = vsel %vm321_vm2, %v3500_v55, inf  ;;  %v3509_v31 = vsel %vm980_vm6, 1e+30, %v3400_v26  ;;  %v3514_v56 = vsel %vm979_vm7, 1e+30, %v3405_v52  ;;  %vm978_vm8 = vcmp.eq.f32.partialorder %v2893_v37, %v977_v46 }
 0x1f8   : > { %2473 = vmatpush.msk.msrb.mxu3 %vm983_vm3, %v2748_v20  ;;  %v1050_v41 = vmin.f32 %v1042_v63, %v1049_v54  ;;  %v1041_v57 = vsel %vm321_vm2, %v3509_v31, inf  ;;  %v1040_v58 = vsel %vm321_vm2, %v3514_v56, inf  ;;  %v3527_v26 = vsel %vm978_vm8, 1e+30, %v3418_v5 }
 0x1f9   : > { %v1048_v52 = vmin.f32 %v1041_v57, %v1047_v49  ;;  %v1046_v22 = vmin.f32 %v1040_v58, %v1045_v34  ;;  %v1039_v59 = vsel %vm321_vm2, %v3527_v26, inf }
 0x1fa   : > { %2474 = vmatpush.msk.msrb.mxu3 %vm982_vm4, %v2748_v20  ;;  %v1044_v1 = vmin.f32 %v1039_v59, %v1043_v2 }
 0x1fb   : > { %v1052_v6 = vmin.f32 %v1048_v52, %v1050_v41 }
 0x1fc   : > { %2475 = vmatpush.msk.msrb.mxu3 %vm981_vm5, %v2748_v20  ;;  %v1051_v0 = vmin.f32 %v1044_v1, %v1046_v22 }
 0x1fe   : > { %2476 = vmatpush.msk.msrb.mxu3 %vm980_vm6, %v2748_v20  ;;  %v1053_v5 = vmin.f32 %v1051_v0, %v1052_v6 }
 0x200   : > { %2477 = vmatpush.msk.msrb.mxu3 %vm979_vm7, %v2748_v20  ;;  %v1054_v7 = vrot.slane %v1053_v5, 4 }
 0x202   : > { %2478 = vmatpush.msk.msrb.mxu3 %vm978_vm8, %v2748_v20  ;;  %v1055_v8 = vmin.f32 %v1053_v5, %v1054_v7 }
 0x203   : > { %2479 = vmatmul.msk.f32.vlgmr.msrb.gmra.mxu3 %vm321_vm2, %v3438_v3 }
 0x204   : > { %v1056_v9 = vrot.slane %v1055_v8, 2 }
 0x206   : > { %v1057_v10 = vmin.f32 %v1055_v8, %v1056_v9 }
 0x208   : > { %v1058_v12 = vrot.slane %v1057_v10, 1 }
 0x20a   : > { %v1059_v13 = vmin.f32 %v1057_v10, %v1058_v12 }
 0x20c   : > { %vm1060_vm9 = vcmp.le.f32.partialorder %v3527_v26, %v1059_v13  ;;  %vm1061_vm10 = vcmp.le.f32.partialorder %v3514_v56, %v1059_v13  ;;  %vm1062_vm11 = vcmp.le.f32.partialorder %v3509_v31, %v1059_v13  ;;  %vm1063_vm12 = vcmp.le.f32.partialorder %v3500_v55, %v1059_v13 }
 0x20d   : > { %vm1064_vm13 = vcmp.le.f32.partialorder %v3492_v48, %v1059_v13  ;;  %vm1065_vm14 = vcmp.le.f32.partialorder %v3480_v53, %v1059_v13  ;;  %vm1066_vm15 = vcmp.le.f32.partialorder %v3475_v4, %v1059_v13  ;;  %vm1067_vm0 = vcmp.le.f32.partialorder %v3472_v62, %v1059_v13 }
 0x20e   : > { %v1068_v14 = vsel %vm1060_vm9, %v2893_v37, 64.0  ;;  %v1069_v15 = vsel %vm1061_vm10, %v2895_v38, 64.0  ;;  %v1070_v16 = vsel %vm1062_vm11, %v2897_v39, 64.0  ;;  %v1071_v17 = vsel %vm1063_vm12, %v2899_v40, 64.0 }
 0x20f   : > { %v1072_v18 = vsel %vm1064_vm13, %v2901_v42, 64.0  ;;  %v1073_v19 = vsel %vm1065_vm14, %v2903_v43, 64.0  ;;  %v1074_v24 = vsel %vm1066_vm15, %v2905_v44, 64.0  ;;  %v1075_v25 = vsel %vm1067_vm0, %v2907_v45, 64.0 }
 0x210   : > { %v1076_v11 = vsel %vm321_vm2, %v1068_v14, inf  ;;  %v1077_v60 = vsel %vm321_vm2, %v1069_v15, inf  ;;  %v1078_v30 = vsel %vm321_vm2, %v1070_v16, inf  ;;  %v1079_v61 = vsel %vm321_vm2, %v1071_v17, inf }
 0x211   : > { %v1080_v21 = vsel %vm321_vm2, %v1072_v18, inf  ;;  %v1082_v23 = vsel %vm321_vm2, %v1073_v19, inf  ;;  %v1084_v35 = vsel %vm321_vm2, %v1074_v24, inf  ;;  %v1086_v28 = vsel %vm321_vm2, %v1075_v25, inf }
 0x212   : > { %v1081_v27 = vmin.f32 %v1076_v11, %v1080_v21  ;;  %v1083_v29 = vmin.f32 %v1077_v60, %v1082_v23  ;;  %v1085_v47 = vmin.f32 %v1078_v30, %v1084_v35  ;;  %v1087_v33 = vmin.f32 %v1079_v61, %v1086_v28 }
 0x214   : > { %v1088_v32 = vmin.f32 %v1081_v27, %v1083_v29  ;;  %v1089_v50 = vmin.f32 %v1085_v47, %v1087_v33 }
 0x216   : > { %v1090_v51 = vmin.f32 %v1088_v32, %v1089_v50 }
 0x218   : > { %v1091_v36 = vrot.slane %v1090_v51, 4 }
 0x21a   : > { %v1092_v46 = vmin.f32 %v1090_v51, %v1091_v36 }
 0x21c   : > { %v1093_v54 = vrot.slane %v1092_v46, 2 }
 0x21e   : > { %v1094_v49 = vmin.f32 %v1092_v46, %v1093_v54 }
 0x220   : > { %v1095_v34 = vrot.slane %v1094_v49, 1 }
 0x222   : > { %v1096_v2 = vmin.f32 %v1094_v49, %v1095_v34 }
 0x224   : > { %vm1104_vm1 = vcmp.eq.f32.partialorder %v2907_v45, %v1096_v2  ;;  %vm1103_vm3 = vcmp.eq.f32.partialorder %v2905_v44, %v1096_v2  ;;  %vm1097_vm4 = vcmp.eq.f32.partialorder %v2893_v37, %v1096_v2  ;;  %vm1098_vm5 = vcmp.eq.f32.partialorder %v2895_v38, %v1096_v2 }
 0x225   : > { %v3577_v63 = vsel %vm1104_vm1, 1e+30, %v3472_v62  ;;  %2488 = vmatpush.msk.msra.mxu1 %vm1104_vm1, %v2748_v20  ;;  %v3581_v41 = vsel %vm1103_vm3, 1e+30, %v3475_v4  ;;  %vm1099_vm6 = vcmp.eq.f32.partialorder %v2897_v39, %v1096_v2  ;;  %vm1100_vm7 = vcmp.eq.f32.partialorder %v2899_v40, %v1096_v2 }
 0x226   : > { %v1168_v57 = vsel %vm321_vm2, %v3577_v63, inf  ;;  %v1166_v58 = vsel %vm321_vm2, %v3581_v41, inf  ;;  %vm1101_vm8 = vcmp.eq.f32.partialorder %v2901_v42, %v1096_v2  ;;  %vm1102_vm9 = vcmp.eq.f32.partialorder %v2903_v43, %v1096_v2 }
 0x227   : > { %2489 = vmatpush.msk.msra.mxu1 %vm1103_vm3, %v2748_v20  ;;  %v3595_v62 = vsel %vm1097_vm4, 1e+30, %v3527_v26  ;;  %v3600_v4 = vsel %vm1098_vm5, 1e+30, %v3514_v56  ;;  %v3605_v52 = vsel %vm1099_vm6, 1e+30, %v3509_v31 }
 0x228   : > { %v3610_v22 = vsel %vm1100_vm7, 1e+30, %v3500_v55  ;;  %v3615_v26 = vsel %vm1101_vm8, 1e+30, %v3492_v48  ;;  %v3618_v59 = vsel %vm1102_vm9, 1e+30, %v3480_v53 }
 0x229   : > { %2490 = vmatpush.msk.msra.mxu1 %vm1102_vm9, %v2748_v20  ;;  %v1158_v56 = vsel %vm321_vm2, %v3595_v62, inf  ;;  %v1159_v31 = vsel %vm321_vm2, %v3600_v4, inf  ;;  %v1160_v55 = vsel %vm321_vm2, %v3605_v52, inf  ;;  %v1161_v1 = vsel %vm321_vm2, %v3610_v22, inf }
 0x22a   : > { %v1162_v48 = vsel %vm321_vm2, %v3615_v26, inf  ;;  %v1164_v53 = vsel %vm321_vm2, %v3618_v59, inf  ;;  %v1167_v6 = vmin.f32 %v1160_v55, %v1166_v58  ;;  %v1169_v0 = vmin.f32 %v1161_v1, %v1168_v57 }
 0x22b   : > { %v1163_v5 = vmin.f32 %v1158_v56, %v1162_v48  ;;  %v1165_v7 = vmin.f32 %v1159_v31, %v1164_v53  ;;  %2491 = vmatpush.msk.msra.mxu1 %vm1101_vm8, %v2748_v20 }
 0x22c   : > { %v1171_v8 = vmin.f32 %v1167_v6, %v1169_v0 }
 0x22d   : > { %v1170_v9 = vmin.f32 %v1163_v5, %v1165_v7  ;;  %2492 = vmatpush.msk.msra.mxu1 %vm1100_vm7, %v2748_v20 }
 0x22f   : > { %v1172_v10 = vmin.f32 %v1170_v9, %v1171_v8  ;;  %2493 = vmatpush.msk.msra.mxu1 %vm1099_vm6, %v2748_v20 }
 0x231   : > { %v1173_v12 = vrot.slane %v1172_v10, 4  ;;  %2494 = vmatpush.msk.msra.mxu1 %vm1098_vm5, %v2748_v20 }
 0x233   : > { %v1174_v13 = vmin.f32 %v1172_v10, %v1173_v12  ;;  %2495 = vmatpush.msk.msra.mxu1 %vm1097_vm4, %v2748_v20 }
 0x234   : > { %2496 = vmatmul.msk.f32.vlgmr.msra.gmra.mxu1 %vm321_vm2, %v3438_v3 }
 0x235   : > { %v1175_v14 = vrot.slane %v1174_v13, 2 }
 0x237   : > { %v1176_v15 = vmin.f32 %v1174_v13, %v1175_v14 }
 0x239   : > { %v1177_v16 = vrot.slane %v1176_v15, 1 }
 0x23b   : > { %v1178_v17 = vmin.f32 %v1176_v15, %v1177_v16 }
 0x23d   : > { %vm1184_vm10 = vcmp.le.f32.partialorder %v3618_v59, %v1178_v17  ;;  %vm1185_vm11 = vcmp.le.f32.partialorder %v3581_v41, %v1178_v17  ;;  %vm1186_vm12 = vcmp.le.f32.partialorder %v3577_v63, %v1178_v17  ;;  %vm1183_vm13 = vcmp.le.f32.partialorder %v3615_v26, %v1178_v17 }
 0x23e   : > { %v1192_v18 = vsel %vm1184_vm10, %v2903_v43, 64.0  ;;  %v1191_v19 = vsel %vm1183_vm13, %v2901_v42, 64.0  ;;  %vm1182_vm14 = vcmp.le.f32.partialorder %v3610_v22, %v1178_v17  ;;  %vm1179_vm15 = vcmp.le.f32.partialorder %v3595_v62, %v1178_v17 }
 0x23f   : > { %v1201_v24 = vsel %vm321_vm2, %v1192_v18, inf  ;;  %v1199_v25 = vsel %vm321_vm2, %v1191_v19, inf  ;;  %v1190_v11 = vsel %vm1182_vm14, %v2899_v40, 64.0  ;;  %vm1180_vm0 = vcmp.le.f32.partialorder %v3600_v4, %v1178_v17 }
 0x240   : > { %v1198_v60 = vsel %vm321_vm2, %v1190_v11, inf  ;;  %vm1181_vm1 = vcmp.le.f32.partialorder %v3605_v52, %v1178_v17  ;;  %v1187_v30 = vsel %vm1179_vm15, %v2893_v37, 64.0  ;;  %v1188_v61 = vsel %vm1180_vm0, %v2895_v38, 64.0 }
 0x241   : > { %v1189_v21 = vsel %vm1181_vm1, %v2897_v39, 64.0  ;;  %v1193_v23 = vsel %vm1185_vm11, %v2905_v44, 64.0  ;;  %v1194_v35 = vsel %vm1186_vm12, %v2907_v45, 64.0  ;;  %v1195_v28 = vsel %vm321_vm2, %v1187_v30, inf }
 0x242   : > { %v1196_v27 = vsel %vm321_vm2, %v1188_v61, inf  ;;  %v1197_v29 = vsel %vm321_vm2, %v1189_v21, inf  ;;  %v1200_v47 = vmin.f32 %v1195_v28, %v1199_v25  ;;  %v1203_v33 = vsel %vm321_vm2, %v1193_v23, inf }
 0x243   : > { %v1202_v32 = vmin.f32 %v1196_v27, %v1201_v24  ;;  %v1204_v50 = vmin.f32 %v1197_v29, %v1203_v33  ;;  %v1205_v51 = vsel %vm321_vm2, %v1194_v35, inf }
 0x244   : > { %v1206_v36 = vmin.f32 %v1198_v60, %v1205_v51 }
 0x245   : > { %v1207_v46 = vmin.f32 %v1200_v47, %v1202_v32 }
 0x246   : > { %v1208_v54 = vmin.f32 %v1204_v50, %v1206_v36 }
 0x248   : > { %v1209_v49 = vmin.f32 %v1207_v46, %v1208_v54 }
 0x24a   : > { %v1210_v34 = vrot.slane %v1209_v49, 4 }
 0x24c   : > { %v1211_v2 = vmin.f32 %v1209_v49, %v1210_v34 }
 0x24e   : > { %v1212_v57 = vrot.slane %v1211_v2, 2 }
 0x250   : > { %v1213_v58 = vmin.f32 %v1211_v2, %v1212_v57 }
 0x252   : > { %v1214_v56 = vrot.slane %v1213_v58, 1 }
 0x254   : > { %v1215_v31 = vmin.f32 %v1213_v58, %v1214_v56 }
 0x256   : > { %vm1223_vm3 = vcmp.eq.f32.partialorder %v2907_v45, %v1215_v31  ;;  %vm1222_vm4 = vcmp.eq.f32.partialorder %v2905_v44, %v1215_v31  ;;  %vm1216_vm5 = vcmp.eq.f32.partialorder %v2893_v37, %v1215_v31  ;;  %vm1217_vm6 = vcmp.eq.f32.partialorder %v2895_v38, %v1215_v31 }
 0x257   : > { %2505 = vmatpush.msk.msra.mxu2 %vm1223_vm3, %v2748_v20  ;;  %v3684_v55 = vsel %vm1223_vm3, 1e+30, %v3577_v63  ;;  %v3687_v1 = vsel %vm1222_vm4, 1e+30, %v3581_v41  ;;  %vm1218_vm7 = vcmp.eq.f32.partialorder %v2897_v39, %v1215_v31  ;;  %vm1219_vm8 = vcmp.eq.f32.partialorder %v2899_v40, %v1215_v31 }
 0x258   : > { %v1285_v48 = vsel %vm321_vm2, %v3687_v1, inf  ;;  %vm1220_vm9 = vcmp.eq.f32.partialorder %v2901_v42, %v1215_v31  ;;  %vm1221_vm10 = vcmp.eq.f32.partialorder %v2903_v43, %v1215_v31  ;;  %v3698_v53 = vsel %vm1216_vm5, 1e+30, %v3595_v62 }
 0x259   : > { %2506 = vmatpush.msk.msra.mxu2 %vm1222_vm4, %v2748_v20  ;;  %v3704_v63 = vsel %vm1217_vm6, 1e+30, %v3600_v4  ;;  %v3709_v41 = vsel %vm1218_vm7, 1e+30, %v3605_v52  ;;  %v3714_v6 = vsel %vm1219_vm8, 1e+30, %v3610_v22 }
 0x25a   : > { %v3719_v62 = vsel %vm1220_vm9, 1e+30, %v3615_v26  ;;  %v3722_v0 = vsel %vm1221_vm10, 1e+30, %v3618_v59  ;;  %v1277_v4 = vsel %vm321_vm2, %v3698_v53, inf  ;;  %v1278_v52 = vsel %vm321_vm2, %v3704_v63, inf }
 0x25b   : > { %2507 = vmatpush.msk.msra.mxu2 %vm1221_vm10, %v2748_v20  ;;  %v1279_v22 = vsel %vm321_vm2, %v3709_v41, inf  ;;  %v1280_v5 = vsel %vm321_vm2, %v3714_v6, inf  ;;  %v1281_v26 = vsel %vm321_vm2, %v3719_v62, inf  ;;  %v1283_v59 = vsel %vm321_vm2, %v3722_v0, inf }
 0x25c   : > { %v1282_v7 = vmin.f32 %v1277_v4, %v1281_v26  ;;  %v1284_v8 = vmin.f32 %v1278_v52, %v1283_v59  ;;  %v1286_v9 = vmin.f32 %v1279_v22, %v1285_v48  ;;  %v1287_v10 = vsel %vm321_vm2, %v3684_v55, inf }
 0x25d   : > { %v1288_v12 = vmin.f32 %v1280_v5, %v1287_v10  ;;  %2508 = vmatpush.msk.msra.mxu2 %vm1220_vm9, %v2748_v20 }
 0x25e   : > { %v1289_v13 = vmin.f32 %v1282_v7, %v1284_v8 }
 0x25f   : > { %v1290_v14 = vmin.f32 %v1286_v9, %v1288_v12  ;;  %2509 = vmatpush.msk.msra.mxu2 %vm1219_vm8, %v2748_v20 }
 0x261   : > { %v1291_v15 = vmin.f32 %v1289_v13, %v1290_v14  ;;  %2510 = vmatpush.msk.msra.mxu2 %vm1218_vm7, %v2748_v20 }
 0x263   : > { %v1292_v16 = vrot.slane %v1291_v15, 4  ;;  %2511 = vmatpush.msk.msra.mxu2 %vm1217_vm6, %v2748_v20 }
 0x265   : > { %v1293_v17 = vmin.f32 %v1291_v15, %v1292_v16  ;;  %2512 = vmatpush.msk.msra.mxu2 %vm1216_vm5, %v2748_v20 }
 0x266   : > { %2513 = vmatmul.msk.f32.vlgmr.msra.gmra.mxu2 %vm321_vm2, %v3438_v3 }
 0x267   : > { %v1294_v18 = vrot.slane %v1293_v17, 2 }
 0x269   : > { %v1295_v19 = vmin.f32 %v1293_v17, %v1294_v18 }
 0x26b   : > { %v1296_v24 = vrot.slane %v1295_v19, 1 }
 0x26d   : > { %v1297_v25 = vmin.f32 %v1295_v19, %v1296_v24 }
 0x26f   : > { %vm1303_vm11 = vcmp.le.f32.partialorder %v3722_v0, %v1297_v25  ;;  %vm1304_vm12 = vcmp.le.f32.partialorder %v3687_v1, %v1297_v25  ;;  %vm1305_vm13 = vcmp.le.f32.partialorder %v3684_v55, %v1297_v25  ;;  %vm1302_vm14 = vcmp.le.f32.partialorder %v3719_v62, %v1297_v25 }
 0x270   : > { %v1311_v11 = vsel %vm1303_vm11, %v2903_v43, 64.0  ;;  %v1310_v60 = vsel %vm1302_vm14, %v2901_v42, 64.0  ;;  %vm1301_vm15 = vcmp.le.f32.partialorder %v3714_v6, %v1297_v25  ;;  %v1313_v30 = vsel %vm1305_vm13, %v2907_v45, 64.0 }
 0x271   : > { %v1320_v61 = vsel %vm321_vm2, %v1311_v11, inf  ;;  %v1318_v21 = vsel %vm321_vm2, %v1310_v60, inf  ;;  %v1309_v23 = vsel %vm1301_vm15, %v2899_v40, 64.0  ;;  %v1324_v35 = vsel %vm321_vm2, %v1313_v30, inf }
 0x272   : > { %v1317_v28 = vsel %vm321_vm2, %v1309_v23, inf  ;;  %vm1298_vm0 = vcmp.le.f32.partialorder %v3698_v53, %v1297_v25  ;;  %vm1299_vm1 = vcmp.le.f32.partialorder %v3704_v63, %v1297_v25  ;;  %vm1300_vm3 = vcmp.le.f32.partialorder %v3709_v41, %v1297_v25 }
 0x273   : > { %v1325_v27 = vmin.f32 %v1317_v28, %v1324_v35  ;;  %v1306_v29 = vsel %vm1298_vm0, %v2893_v37, 64.0  ;;  %v1307_v47 = vsel %vm1299_vm1, %v2895_v38, 64.0  ;;  %v1308_v33 = vsel %vm1300_vm3, %v2897_v39, 64.0 }
 0x274   : > { %v1312_v32 = vsel %vm1304_vm12, %v2905_v44, 64.0  ;;  %v1314_v50 = vsel %vm321_vm2, %v1306_v29, inf  ;;  %v1315_v51 = vsel %vm321_vm2, %v1307_v47, inf  ;;  %v1316_v36 = vsel %vm321_vm2, %v1308_v33, inf }
 0x275   : > { %v1319_v46 = vmin.f32 %v1314_v50, %v1318_v21  ;;  %v1321_v54 = vmin.f32 %v1315_v51, %v1320_v61  ;;  %v1322_v49 = vsel %vm321_vm2, %v1312_v32, inf }
 0x276   : > { %v1323_v34 = vmin.f32 %v1316_v36, %v1322_v49 }
 0x277   : > { %v1326_v2 = vmin.f32 %v1319_v46, %v1321_v54 }
 0x278   : > { %v1327_v57 = vmin.f32 %v1323_v34, %v1325_v27 }
 0x27a   : > { %v1328_v58 = vmin.f32 %v1326_v2, %v1327_v57 }
 0x27c   : > { %v1329_v56 = vrot.slane %v1328_v58, 4 }
 0x27e   : > { %v1330_v31 = vmin.f32 %v1328_v58, %v1329_v56 }
 0x280   : > { %v1331_v48 = vrot.slane %v1330_v31, 2 }
 0x282   : > { %v1332_v4 = vmin.f32 %v1330_v31, %v1331_v48 }
 0x284   : > { %v1333_v52 = vrot.slane %v1332_v4, 1 }
 0x286   : > { %v1334_v22 = vmin.f32 %v1332_v4, %v1333_v52 }
 0x288   : > { %vm1342_vm4 = vcmp.eq.f32.partialorder %v2907_v45, %v1334_v22  ;;  %vm1341_vm5 = vcmp.eq.f32.partialorder %v2905_v44, %v1334_v22  ;;  %vm1335_vm6 = vcmp.eq.f32.partialorder %v2893_v37, %v1334_v22  ;;  %vm1336_vm7 = vcmp.eq.f32.partialorder %v2895_v38, %v1334_v22 }
 0x289   : > { %2522 = vmatpush.msk.msra.mxu3 %vm1342_vm4, %v2748_v20  ;;  %v3788_v5 = vsel %vm1342_vm4, 1e+30, %v3684_v55  ;;  %v3791_v26 = vsel %vm1341_vm5, 1e+30, %v3687_v1  ;;  %vm1337_vm8 = vcmp.eq.f32.partialorder %v2897_v39, %v1334_v22  ;;  %vm1338_vm9 = vcmp.eq.f32.partialorder %v2899_v40, %v1334_v22 }
 0x28a   : > { %v1404_v59 = vsel %vm321_vm2, %v3791_v26, inf  ;;  %vm1339_vm10 = vcmp.eq.f32.partialorder %v2901_v42, %v1334_v22  ;;  %vm1340_vm11 = vcmp.eq.f32.partialorder %v2903_v43, %v1334_v22  ;;  %v3802_v7 = vsel %vm1335_vm6, 1e+30, %v3698_v53 }
 0x28b   : > { %2523 = vmatpush.msk.msra.mxu3 %vm1341_vm5, %v2748_v20  ;;  %v3808_v55 = vsel %vm1336_vm7, 1e+30, %v3704_v63  ;;  %v3813_v1 = vsel %vm1337_vm8, 1e+30, %v3709_v41  ;;  %v3818_v8 = vsel %vm1338_vm9, 1e+30, %v3714_v6 }
 0x28c   : > { %v3823_v53 = vsel %vm1339_vm10, 1e+30, %v3719_v62  ;;  %v3826_v9 = vsel %vm1340_vm11, 1e+30, %v3722_v0  ;;  %v1396_v63 = vsel %vm321_vm2, %v3802_v7, inf  ;;  %v1397_v41 = vsel %vm321_vm2, %v3808_v55, inf }
 0x28d   : > { %2524 = vmatpush.msk.msra.mxu3 %vm1340_vm11, %v2748_v20  ;;  %v1398_v6 = vsel %vm321_vm2, %v3813_v1, inf  ;;  %v1399_v10 = vsel %vm321_vm2, %v3818_v8, inf  ;;  %v1400_v62 = vsel %vm321_vm2, %v3823_v53, inf  ;;  %v1402_v0 = vsel %vm321_vm2, %v3826_v9, inf }
 0x28e   : > { %v1401_v12 = vmin.f32 %v1396_v63, %v1400_v62  ;;  %v1403_v13 = vmin.f32 %v1397_v41, %v1402_v0  ;;  %v1405_v14 = vmin.f32 %v1398_v6, %v1404_v59  ;;  %v1406_v15 = vsel %vm321_vm2, %v3788_v5, inf }
 0x28f   : > { %v1407_v16 = vmin.f32 %v1399_v10, %v1406_v15  ;;  %2525 = vmatpush.msk.msra.mxu3 %vm1339_vm10, %v2748_v20 }
 0x290   : > { %v1408_v17 = vmin.f32 %v1401_v12, %v1403_v13 }
 0x291   : > { %v1409_v18 = vmin.f32 %v1405_v14, %v1407_v16  ;;  %2526 = vmatpush.msk.msra.mxu3 %vm1338_vm9, %v2748_v20 }
 0x293   : > { %v1410_v19 = vmin.f32 %v1408_v17, %v1409_v18  ;;  %2527 = vmatpush.msk.msra.mxu3 %vm1337_vm8, %v2748_v20 }
 0x295   : > { %v1411_v24 = vrot.slane %v1410_v19, 4  ;;  %2528 = vmatpush.msk.msra.mxu3 %vm1336_vm7, %v2748_v20 }
 0x297   : > { %v1412_v25 = vmin.f32 %v1410_v19, %v1411_v24  ;;  %2529 = vmatpush.msk.msra.mxu3 %vm1335_vm6, %v2748_v20 }
 0x298   : > { %2530 = vmatmul.msk.f32.vlgmr.msra.gmra.mxu3 %vm321_vm2, %v3438_v3 }
 0x299   : > { %v1413_v11 = vrot.slane %v1412_v25, 2 }
 0x29b   : > { %v1414_v60 = vmin.f32 %v1412_v25, %v1413_v11 }
 0x29d   : > { %v1415_v30 = vrot.slane %v1414_v60, 1 }
 0x29f   : > { %v1416_v61 = vmin.f32 %v1414_v60, %v1415_v30 }
 0x2a1   : > { %vm1422_vm12 = vcmp.le.f32.partialorder %v3826_v9, %v1416_v61  ;;  %vm1423_vm13 = vcmp.le.f32.partialorder %v3791_v26, %v1416_v61  ;;  %vm1421_vm14 = vcmp.le.f32.partialorder %v3823_v53, %v1416_v61  ;;  %vm1420_vm15 = vcmp.le.f32.partialorder %v3818_v8, %v1416_v61 }
 0x2a2   : > { %v1430_v21 = vsel %vm1422_vm12, %v2903_v43, 64.0  ;;  %v1429_v23 = vsel %vm1421_vm14, %v2901_v42, 64.0  ;;  %vm1424_vm0 = vcmp.le.f32.partialorder %v3788_v5, %v1416_v61  ;;  %v1428_v35 = vsel %vm1420_vm15, %v2899_v40, 64.0 }
 0x2a3   : > { %v1439_v28 = vsel %vm321_vm2, %v1430_v21, inf  ;;  %v1437_v27 = vsel %vm321_vm2, %v1429_v23, inf  ;;  %v1432_v29 = vsel %vm1424_vm0, %v2907_v45, 64.0  ;;  %v1436_v47 = vsel %vm321_vm2, %v1428_v35, inf }
 0x2a4   : > { %v1443_v33 = vsel %vm321_vm2, %v1432_v29, inf  ;;  %vm1417_vm1 = vcmp.le.f32.partialorder %v3802_v7, %v1416_v61  ;;  %vm1418_vm3 = vcmp.le.f32.partialorder %v3808_v55, %v1416_v61  ;;  %vm1419_vm4 = vcmp.le.f32.partialorder %v3813_v1, %v1416_v61 }
 0x2a5   : > { %v1444_v32 = vmin.f32 %v1436_v47, %v1443_v33  ;;  %v1425_v50 = vsel %vm1417_vm1, %v2893_v37, 64.0  ;;  %v1426_v51 = vsel %vm1418_vm3, %v2895_v38, 64.0  ;;  %v1427_v36 = vsel %vm1419_vm4, %v2897_v39, 64.0 }
 0x2a6   : > { %v1431_v46 = vsel %vm1423_vm13, %v2905_v44, 64.0  ;;  %v1433_v54 = vsel %vm321_vm2, %v1425_v50, inf  ;;  %v1434_v49 = vsel %vm321_vm2, %v1426_v51, inf  ;;  %v1435_v34 = vsel %vm321_vm2, %v1427_v36, inf }
 0x2a7   : > { %v1438_v2 = vmin.f32 %v1433_v54, %v1437_v27  ;;  %v1440_v57 = vmin.f32 %v1434_v49, %v1439_v28  ;;  %v1441_v58 = vsel %vm321_vm2, %v1431_v46, inf }
 0x2a8   : > { %v1442_v56 = vmin.f32 %v1435_v34, %v1441_v58 }
 0x2a9   : > { %v1445_v31 = vmin.f32 %v1438_v2, %v1440_v57 }
 0x2aa   : > { %v1446_v48 = vmin.f32 %v1442_v56, %v1444_v32 }
 0x2ac   : > { %v1447_v4 = vmin.f32 %v1445_v31, %v1446_v48 }
 0x2ae   : > { %v1448_v52 = vrot.slane %v1447_v4, 4 }
 0x2b0   : > { %v1449_v22 = vmin.f32 %v1447_v4, %v1448_v52 }
 0x2b2   : > { %v1450_v59 = vrot.slane %v1449_v22, 2 }
 0x2b4   : > { %v1451_v63 = vmin.f32 %v1449_v22, %v1450_v59 }
 0x2b6   : > { %v1452_v41 = vrot.slane %v1451_v63, 1 }
 0x2b8   : > { %v1453_v6 = vmin.f32 %v1451_v63, %v1452_v41 }
 0x2ba   : > { %vm1461_vm5 = vcmp.eq.f32.partialorder %v2907_v45, %v1453_v6  ;;  %vm1460_vm6 = vcmp.eq.f32.partialorder %v2905_v44, %v1453_v6  ;;  %vm1454_vm7 = vcmp.eq.f32.partialorder %v2893_v37, %v1453_v6  ;;  %vm1455_vm8 = vcmp.eq.f32.partialorder %v2895_v38, %v1453_v6 }
 0x2bb   : > { %2539 = vmatpush.msk.msrb.mxu1 %vm1461_vm5, %v2748_v20  ;;  %v3892_v10 = vsel %vm1461_vm5, 1e+30, %v3788_v5  ;;  %v3895_v62 = vsel %vm1460_vm6, 1e+30, %v3791_v26  ;;  %vm1456_vm9 = vcmp.eq.f32.partialorder %v2897_v39, %v1453_v6  ;;  %vm1457_vm10 = vcmp.eq.f32.partialorder %v2899_v40, %v1453_v6 }
 0x2bc   : > { %v1523_v0 = vsel %vm321_vm2, %v3895_v62, inf  ;;  %vm1458_vm11 = vcmp.eq.f32.partialorder %v2901_v42, %v1453_v6  ;;  %vm1459_vm12 = vcmp.eq.f32.partialorder %v2903_v43, %v1453_v6  ;;  %v3906_v12 = vsel %vm1454_vm7, 1e+30, %v3802_v7 }
 0x2bd   : > { %2540 = vmatpush.msk.msrb.mxu1 %vm1460_vm6, %v2748_v20  ;;  %v3912_v5 = vsel %vm1455_vm8, 1e+30, %v3808_v55  ;;  %v3917_v26 = vsel %vm1456_vm9, 1e+30, %v3813_v1  ;;  %v3922_v13 = vsel %vm1457_vm10, 1e+30, %v3818_v8 }
 0x2be   : > { %v3927_v7 = vsel %vm1458_vm11, 1e+30, %v3823_v53  ;;  %v3930_v14 = vsel %vm1459_vm12, 1e+30, %v3826_v9  ;;  %v1515_v55 = vsel %vm321_vm2, %v3906_v12, inf  ;;  %v1516_v1 = vsel %vm321_vm2, %v3912_v5, inf }
 0x2bf   : > { %2541 = vmatpush.msk.msrb.mxu1 %vm1459_vm12, %v2748_v20  ;;  %v1517_v8 = vsel %vm321_vm2, %v3917_v26, inf  ;;  %v1518_v15 = vsel %vm321_vm2, %v3922_v13, inf  ;;  %v1519_v53 = vsel %vm321_vm2, %v3927_v7, inf  ;;  %v1521_v9 = vsel %vm321_vm2, %v3930_v14, inf }
 0x2c0   : > { %v1520_v16 = vmin.f32 %v1515_v55, %v1519_v53  ;;  %v1522_v17 = vmin.f32 %v1516_v1, %v1521_v9  ;;  %v1524_v18 = vmin.f32 %v1517_v8, %v1523_v0  ;;  %v1525_v19 = vsel %vm321_vm2, %v3892_v10, inf }
 0x2c1   : > { %v1526_v24 = vmin.f32 %v1518_v15, %v1525_v19  ;;  %2542 = vmatpush.msk.msrb.mxu1 %vm1458_vm11, %v2748_v20 }
 0x2c2   : > { %v1527_v25 = vmin.f32 %v1520_v16, %v1522_v17 }
 0x2c3   : > { %v1528_v11 = vmin.f32 %v1524_v18, %v1526_v24  ;;  %2543 = vmatpush.msk.msrb.mxu1 %vm1457_vm10, %v2748_v20 }
 0x2c5   : > { %v1529_v60 = vmin.f32 %v1527_v25, %v1528_v11  ;;  %2544 = vmatpush.msk.msrb.mxu1 %vm1456_vm9, %v2748_v20 }
 0x2c7   : > { %v1530_v30 = vrot.slane %v1529_v60, 4  ;;  %2545 = vmatpush.msk.msrb.mxu1 %vm1455_vm8, %v2748_v20 }
 0x2c9   : > { %v1531_v61 = vmin.f32 %v1529_v60, %v1530_v30  ;;  %2546 = vmatpush.msk.msrb.mxu1 %vm1454_vm7, %v2748_v20 }
 0x2ca   : > { %2547 = vmatmul.msk.f32.vlgmr.msrb.gmra.mxu1 %vm321_vm2, %v3438_v3 }
 0x2cb   : > { %v1532_v21 = vrot.slane %v1531_v61, 2 }
 0x2cd   : > { %v1533_v23 = vmin.f32 %v1531_v61, %v1532_v21 }
 0x2cf   : > { %v1534_v35 = vrot.slane %v1533_v23, 1 }
 0x2d1   : > { %v1535_v28 = vmin.f32 %v1533_v23, %v1534_v35 }
 0x2d3   : > { %vm1541_vm13 = vcmp.le.f32.partialorder %v3930_v14, %v1535_v28  ;;  %vm1542_vm14 = vcmp.le.f32.partialorder %v3895_v62, %v1535_v28  ;;  %vm1540_vm15 = vcmp.le.f32.partialorder %v3927_v7, %v1535_v28  ;;  %vm1539_vm0 = vcmp.le.f32.partialorder %v3922_v13, %v1535_v28 }
 0x2d4   : > { %v1549_v27 = vsel %vm1541_vm13, %v2903_v43, 64.0  ;;  %v1548_v29 = vsel %vm1540_vm15, %v2901_v42, 64.0  ;;  %vm1543_vm1 = vcmp.le.f32.partialorder %v3892_v10, %v1535_v28  ;;  %v1547_v47 = vsel %vm1539_vm0, %v2899_v40, 64.0 }
 0x2d5   : > { %v1558_v33 = vsel %vm321_vm2, %v1549_v27, inf  ;;  %v1556_v32 = vsel %vm321_vm2, %v1548_v29, inf  ;;  %v1551_v50 = vsel %vm1543_vm1, %v2907_v45, 64.0  ;;  %v1555_v51 = vsel %vm321_vm2, %v1547_v47, inf }
 0x2d6   : > { %v1562_v36 = vsel %vm321_vm2, %v1551_v50, inf  ;;  %vm1536_vm3 = vcmp.le.f32.partialorder %v3906_v12, %v1535_v28  ;;  %vm1537_vm4 = vcmp.le.f32.partialorder %v3912_v5, %v1535_v28  ;;  %vm1538_vm5 = vcmp.le.f32.partialorder %v3917_v26, %v1535_v28 }
 0x2d7   : > { %v1563_v46 = vmin.f32 %v1555_v51, %v1562_v36  ;;  %v1544_v54 = vsel %vm1536_vm3, %v2893_v37, 64.0  ;;  %v1545_v49 = vsel %vm1537_vm4, %v2895_v38, 64.0  ;;  %v1546_v34 = vsel %vm1538_vm5, %v2897_v39, 64.0 }
 0x2d8   : > { %v1550_v2 = vsel %vm1542_vm14, %v2905_v44, 64.0  ;;  %v1552_v57 = vsel %vm321_vm2, %v1544_v54, inf  ;;  %v1553_v58 = vsel %vm321_vm2, %v1545_v49, inf  ;;  %v1554_v56 = vsel %vm321_vm2, %v1546_v34, inf }
 0x2d9   : > { %v1557_v31 = vmin.f32 %v1552_v57, %v1556_v32  ;;  %v1559_v48 = vmin.f32 %v1553_v58, %v1558_v33  ;;  %v1560_v4 = vsel %vm321_vm2, %v1550_v2, inf }
 0x2da   : > { %v1561_v52 = vmin.f32 %v1554_v56, %v1560_v4 }
 0x2db   : > { %v1564_v22 = vmin.f32 %v1557_v31, %v1559_v48 }
 0x2dc   : > { %v1565_v59 = vmin.f32 %v1561_v52, %v1563_v46 }
 0x2de   : > { %v1566_v63 = vmin.f32 %v1564_v22, %v1565_v59 }
 0x2e0   : > { %v1567_v41 = vrot.slane %v1566_v63, 4 }
 0x2e2   : > { %v1568_v6 = vmin.f32 %v1566_v63, %v1567_v41 }
 0x2e4   : > { %v1569_v0 = vrot.slane %v1568_v6, 2 }
 0x2e6   : > { %v1570_v55 = vmin.f32 %v1568_v6, %v1569_v0 }
 0x2e8   : > { %v1571_v1 = vrot.slane %v1570_v55, 1 }
 0x2ea   : > { %v1572_v8 = vmin.f32 %v1570_v55, %v1571_v1 }
 0x2ec   : > { %vm1580_vm6 = vcmp.eq.f32.partialorder %v2907_v45, %v1572_v8  ;;  %vm1579_vm7 = vcmp.eq.f32.partialorder %v2905_v44, %v1572_v8  ;;  %vm1573_vm8 = vcmp.eq.f32.partialorder %v2893_v37, %v1572_v8  ;;  %vm1574_vm9 = vcmp.eq.f32.partialorder %v2895_v38, %v1572_v8 }
 0x2ed   : > { %2556 = vmatpush.msk.msrb.mxu2 %vm1580_vm6, %v2748_v20  ;;  %v3996_v15 = vsel %vm1580_vm6, 1e+30, %v3892_v10  ;;  %v3999_v53 = vsel %vm1579_vm7, 1e+30, %v3895_v62  ;;  %vm1575_vm10 = vcmp.eq.f32.partialorder %v2897_v39, %v1572_v8  ;;  %vm1576_vm11 = vcmp.eq.f32.partialorder %v2899_v40, %v1572_v8 }
 0x2ee   : > { %v1642_v9 = vsel %vm321_vm2, %v3999_v53, inf  ;;  %vm1577_vm12 = vcmp.eq.f32.partialorder %v2901_v42, %v1572_v8  ;;  %vm1578_vm13 = vcmp.eq.f32.partialorder %v2903_v43, %v1572_v8  ;;  %v4010_v16 = vsel %vm1573_vm8, 1e+30, %v3906_v12 }
 0x2ef   : > { %2557 = vmatpush.msk.msrb.mxu2 %vm1579_vm7, %v2748_v20  ;;  %v4016_v10 = vsel %vm1574_vm9, 1e+30, %v3912_v5  ;;  %v4021_v62 = vsel %vm1575_vm10, 1e+30, %v3917_v26  ;;  %v4026_v17 = vsel %vm1576_vm11, 1e+30, %v3922_v13 }
 0x2f0   : > { %v4031_v12 = vsel %vm1577_vm12, 1e+30, %v3927_v7  ;;  %v4034_v18 = vsel %vm1578_vm13, 1e+30, %v3930_v14  ;;  %v1634_v5 = vsel %vm321_vm2, %v4010_v16, inf  ;;  %v1635_v26 = vsel %vm321_vm2, %v4016_v10, inf }
 0x2f1   : > { %2558 = vmatpush.msk.msrb.mxu2 %vm1578_vm13, %v2748_v20  ;;  %v1636_v13 = vsel %vm321_vm2, %v4021_v62, inf  ;;  %v1637_v19 = vsel %vm321_vm2, %v4026_v17, inf  ;;  %v1638_v7 = vsel %vm321_vm2, %v4031_v12, inf  ;;  %v1640_v14 = vsel %vm321_vm2, %v4034_v18, inf }
 0x2f2   : > { %v1639_v24 = vmin.f32 %v1634_v5, %v1638_v7  ;;  %v1641_v25 = vmin.f32 %v1635_v26, %v1640_v14  ;;  %v1643_v11 = vmin.f32 %v1636_v13, %v1642_v9  ;;  %v1644_v60 = vsel %vm321_vm2, %v3996_v15, inf }
 0x2f3   : > { %v1645_v30 = vmin.f32 %v1637_v19, %v1644_v60  ;;  %2559 = vmatpush.msk.msrb.mxu2 %vm1577_vm12, %v2748_v20 }
 0x2f4   : > { %v1646_v61 = vmin.f32 %v1639_v24, %v1641_v25 }
 0x2f5   : > { %v1647_v21 = vmin.f32 %v1643_v11, %v1645_v30  ;;  %2560 = vmatpush.msk.msrb.mxu2 %vm1576_vm11, %v2748_v20 }
 0x2f7   : > { %v1648_v23 = vmin.f32 %v1646_v61, %v1647_v21  ;;  %2561 = vmatpush.msk.msrb.mxu2 %vm1575_vm10, %v2748_v20 }
 0x2f9   : > { %v1649_v35 = vrot.slane %v1648_v23, 4  ;;  %2562 = vmatpush.msk.msrb.mxu2 %vm1574_vm9, %v2748_v20 }
 0x2fb   : > { %v1650_v28 = vmin.f32 %v1648_v23, %v1649_v35  ;;  %2563 = vmatpush.msk.msrb.mxu2 %vm1573_vm8, %v2748_v20 }
 0x2fc   : > { %2564 = vmatmul.msk.f32.vlgmr.msrb.gmra.mxu2 %vm321_vm2, %v3438_v3 }
 0x2fd   : > { %v1651_v27 = vrot.slane %v1650_v28, 2 }
 0x2ff   : > { %v1652_v29 = vmin.f32 %v1650_v28, %v1651_v27 }
 0x301   : > { %v1653_v47 = vrot.slane %v1652_v29, 1 }
 0x303   : > { %v1654_v33 = vmin.f32 %v1652_v29, %v1653_v47 }
 0x305   : > { %vm1660_vm14 = vcmp.le.f32.partialorder %v4034_v18, %v1654_v33  ;;  %vm1661_vm15 = vcmp.le.f32.partialorder %v3999_v53, %v1654_v33  ;;  %vm1659_vm0 = vcmp.le.f32.partialorder %v4031_v12, %v1654_v33  ;;  %vm1658_vm1 = vcmp.le.f32.partialorder %v4026_v17, %v1654_v33 }
 0x306   : > { %v1668_v32 = vsel %vm1660_vm14, %v2903_v43, 64.0  ;;  %v1667_v50 = vsel %vm1659_vm0, %v2901_v42, 64.0  ;;  %vm1662_vm3 = vcmp.le.f32.partialorder %v3996_v15, %v1654_v33  ;;  %v1666_v3 = vsel %vm1658_vm1, %v2899_v40, 64.0 }
 0x307   : > { %v1677_v51 = vsel %vm321_vm2, %v1668_v32, inf  ;;  %v1675_v36 = vsel %vm321_vm2, %v1667_v50, inf  ;;  %v1670_v46 = vsel %vm1662_vm3, %v2907_v45, 64.0  ;;  %v1674_v54 = vsel %vm321_vm2, %v1666_v3, inf }
 0x308   : > { %v1681_v49 = vsel %vm321_vm2, %v1670_v46, inf  ;;  %vm1655_vm4 = vcmp.le.f32.partialorder %v4010_v16, %v1654_v33  ;;  %vm1656_vm5 = vcmp.le.f32.partialorder %v4016_v10, %v1654_v33  ;;  %vm1657_vm6 = vcmp.le.f32.partialorder %v4021_v62, %v1654_v33  ;;  %v4175_v33 = vld [vmem:[%s2824_s26] sm:$0x7] }
 0x309   : > { %v1682_v34 = vmin.f32 %v1674_v54, %v1681_v49  ;;  %v1663_v2 = vsel %vm1655_vm4, %v2893_v37, 64.0  ;;  %v1664_v57 = vsel %vm1656_vm5, %v2895_v38, 64.0  ;;  %v1665_v58 = vsel %vm1657_vm6, %v2897_v39, 64.0 }
 0x30a   : > { %v1669_v56 = vsel %vm1661_vm15, %v2905_v44, 64.0  ;;  %v1671_v31 = vsel %vm321_vm2, %v1663_v2, inf  ;;  %v1672_v48 = vsel %vm321_vm2, %v1664_v57, inf  ;;  %v1673_v4 = vsel %vm321_vm2, %v1665_v58, inf }
 0x30b   : > { %v1676_v52 = vmin.f32 %v1671_v31, %v1675_v36  ;;  %v1678_v22 = vmin.f32 %v1672_v48, %v1677_v51  ;;  %v1679_v59 = vsel %vm321_vm2, %v1669_v56, inf }
 0x30c   : > { %v1680_v63 = vmin.f32 %v1673_v4, %v1679_v59 }
 0x30d   : > { %v1683_v41 = vmin.f32 %v1676_v52, %v1678_v22 }
 0x30e   : > { %v1684_v6 = vmin.f32 %v1680_v63, %v1682_v34 }
 0x310   : > { %v1685_v0 = vmin.f32 %v1683_v41, %v1684_v6 }
 0x312   : > { %v1686_v55 = vrot.slane %v1685_v0, 4 }
 0x314   : > { %v1687_v1 = vmin.f32 %v1685_v0, %v1686_v55 }
 0x316   : > { %v1688_v8 = vrot.slane %v1687_v1, 2 }
 0x318   : > { %v1689_v9 = vmin.f32 %v1687_v1, %v1688_v8 }
 0x31a   : > { %v1690_v5 = vrot.slane %v1689_v9, 1 }
 0x31c   : > { %v1691_v26 = vmin.f32 %v1689_v9, %v1690_v5 }
 0x31e   : > { %vm1699_vm7 = vcmp.eq.f32.partialorder %v2907_v45, %v1691_v26  ;;  %vm1698_vm8 = vcmp.eq.f32.partialorder %v2905_v44, %v1691_v26  ;;  %vm1692_vm9 = vcmp.eq.f32.partialorder %v2893_v37, %v1691_v26  ;;  %vm1693_vm10 = vcmp.eq.f32.partialorder %v2895_v38, %v1691_v26 }
 0x31f   : > { %2573 = vmatpush.msk.msrb.mxu3 %vm1699_vm7, %v2748_v20  ;;  %v4102_v13 = vsel %vm1698_vm8, 1e+30, %v3999_v53  ;;  %vm1694_vm11 = vcmp.eq.f32.partialorder %v2897_v39, %v1691_v26  ;;  %vm1695_vm12 = vcmp.eq.f32.partialorder %v2899_v40, %v1691_v26  ;;  %vm1696_vm13 = vcmp.eq.f32.partialorder %v2901_v42, %v1691_v26 }
 0x320   : > { %v1761_v19 = vsel %vm321_vm2, %v4102_v13, inf  ;;  %vm1697_vm14 = vcmp.eq.f32.partialorder %v2903_v43, %v1691_v26  ;;  %v4113_v7 = vsel %vm1692_vm9, 1e+30, %v4010_v16  ;;  %v4118_v53 = vsel %vm1693_vm10, 1e+30, %v4016_v10 }
 0x321   : > { %2574 = vmatpush.msk.msrb.mxu3 %vm1698_vm8, %v2748_v20  ;;  %v4124_v14 = vsel %vm1694_vm11, 1e+30, %v4021_v62  ;;  %v4129_v24 = vsel %vm1695_vm12, 1e+30, %v4026_v17  ;;  %v4134_v16 = vsel %vm1696_vm13, 1e+30, %v4031_v12 }
 0x322   : > { %v4137_v10 = vsel %vm1697_vm14, 1e+30, %v4034_v18  ;;  %v4142_v25 = vsel %vm1699_vm7, 1e+30, %v3996_v15  ;;  %v1753_v62 = vsel %vm321_vm2, %v4113_v7, inf  ;;  %v1754_v17 = vsel %vm321_vm2, %v4118_v53, inf }
 0x323   : > { %2575 = vmatpush.msk.msrb.mxu3 %vm1697_vm14, %v2748_v20  ;;  %v1755_v12 = vsel %vm321_vm2, %v4124_v14, inf  ;;  %v1756_v18 = vsel %vm321_vm2, %v4129_v24, inf  ;;  %v1757_v11 = vsel %vm321_vm2, %v4134_v16, inf  ;;  %v1759_v15 = vsel %vm321_vm2, %v4137_v10, inf }
 0x324   : > { %v1758_v60 = vmin.f32 %v1753_v62, %v1757_v11  ;;  %v1760_v30 = vmin.f32 %v1754_v17, %v1759_v15  ;;  %v1762_v61 = vmin.f32 %v1755_v12, %v1761_v19  ;;  %v1763_v21 = vsel %vm321_vm2, %v4142_v25, inf }
 0x325   : > { %v1764_v23 = vmin.f32 %v1756_v18, %v1763_v21  ;;  %2576 = vmatpush.msk.msrb.mxu3 %vm1696_vm13, %v2748_v20 }
 0x326   : > { %v1765_v35 = vmin.f32 %v1758_v60, %v1760_v30 }
 0x327   : > { %v1766_v28 = vmin.f32 %v1762_v61, %v1764_v23  ;;  %2577 = vmatpush.msk.msrb.mxu3 %vm1695_vm12, %v2748_v20 }
 0x329   : > { %v1767_v27 = vmin.f32 %v1765_v35, %v1766_v28  ;;  %2578 = vmatpush.msk.msrb.mxu3 %vm1694_vm11, %v2748_v20 }
 0x32b   : > { %v1768_v29 = vrot.slane %v1767_v27, 4  ;;  %2579 = vmatpush.msk.msrb.mxu3 %vm1693_vm10, %v2748_v20 }
 0x32d   : > { %v1769_v47 = vmin.f32 %v1767_v27, %v1768_v29  ;;  %2580 = vmatpush.msk.msrb.mxu3 %vm1692_vm9, %v2748_v20 }
 0x32e   : > { %2581 = vmatmul.msk.f32.vlgmr.msrb.gmra.mxu3 %vm321_vm2, %v4175_v33 }
 0x32f   : > { %v1770_v32 = vrot.slane %v1769_v47, 2 }
 0x331   : > { %v1771_v50 = vmin.f32 %v1769_v47, %v1770_v32 }
 0x333   : > { %v1772_v3 = vrot.slane %v1771_v50, 1 }
 0x335   : > { %v1773_v51 = vmin.f32 %v1771_v50, %v1772_v3 }
 0x337   : > { %vm1779_vm15 = vcmp.le.f32.partialorder %v4137_v10, %v1773_v51  ;;  %vm1778_vm0 = vcmp.le.f32.partialorder %v4134_v16, %v1773_v51  ;;  %vm1777_vm1 = vcmp.le.f32.partialorder %v4129_v24, %v1773_v51  ;;  %vm1774_vm3 = vcmp.le.f32.partialorder %v4113_v7, %v1773_v51 }
 0x338   : > { %v1787_v36 = vsel %vm1779_vm15, %v2903_v43, 64.0  ;;  %v1786_v46 = vsel %vm1778_vm0, %v2901_v42, 64.0  ;;  %v1785_v54 = vsel %vm1777_vm1, %v2899_v40, 64.0  ;;  %vm1775_vm4 = vcmp.le.f32.partialorder %v4118_v53, %v1773_v51 }
 0x339   : > { %v1796_v49 = vsel %vm321_vm2, %v1787_v36, inf  ;;  %v1794_v34 = vsel %vm321_vm2, %v1786_v46, inf  ;;  %v1793_v2 = vsel %vm321_vm2, %v1785_v54, inf  ;;  %vm1776_vm5 = vcmp.le.f32.partialorder %v4124_v14, %v1773_v51 }
 0x33a   : > { %vm1780_vm6 = vcmp.le.f32.partialorder %v4102_v13, %v1773_v51  ;;  %vm1781_vm7 = vcmp.le.f32.partialorder %v4142_v25, %v1773_v51  ;;  %v1782_v57 = vsel %vm1774_vm3, %v2893_v37, 64.0  ;;  %v1783_v58 = vsel %vm1775_vm4, %v2895_v38, 64.0 }
 0x33b   : > { %v1784_v56 = vsel %vm1776_vm5, %v2897_v39, 64.0  ;;  %v1788_v31 = vsel %vm1780_vm6, %v2905_v44, 64.0  ;;  %v1789_v48 = vsel %vm1781_vm7, %v2907_v45, 64.0  ;;  %v1790_v4 = vsel %vm321_vm2, %v1782_v57, inf }
 0x33c   : > { %v1791_v52 = vsel %vm321_vm2, %v1783_v58, inf  ;;  %v1792_v22 = vsel %vm321_vm2, %v1784_v56, inf  ;;  %v1795_v59 = vmin.f32 %v1790_v4, %v1794_v34  ;;  %v1798_v63 = vsel %vm321_vm2, %v1788_v31, inf }
 0x33d   : > { %v1797_v41 = vmin.f32 %v1791_v52, %v1796_v49  ;;  %v1799_v6 = vmin.f32 %v1792_v22, %v1798_v63  ;;  %v1800_v0 = vsel %vm321_vm2, %v1789_v48, inf }
 0x33e   : > { %v1801_v55 = vmin.f32 %v1793_v2, %v1800_v0 }
 0x33f   : > { %v1802_v1 = vmin.f32 %v1795_v59, %v1797_v41 }
 0x340   : > { %v1803_v8 = vmin.f32 %v1799_v6, %v1801_v55 }
 0x342   : > { %v1804_v9 = vmin.f32 %v1802_v1, %v1803_v8 }
 0x344   : > { %v1805_v5 = vrot.slane %v1804_v9, 4 }
 0x346   : > { %v1806_v26 = vmin.f32 %v1804_v9, %v1805_v5 }
 0x348   : > { %v1807_v19 = vrot.slane %v1806_v26, 2 }
 0x34a   : > { %v1808_v62 = vmin.f32 %v1806_v26, %v1807_v19 }
 0x34c   : > { %v1809_v17 = vrot.slane %v1808_v62, 1 }
 0x34e   : > { %v1810_v12 = vmin.f32 %v1808_v62, %v1809_v17 }
 0x350   : > { %vm1818_vm8 = vcmp.eq.f32.partialorder %v2907_v45, %v1810_v12  ;;  %vm1817_vm9 = vcmp.eq.f32.partialorder %v2905_v44, %v1810_v12  ;;  %vm1816_vm10 = vcmp.eq.f32.partialorder %v2903_v43, %v1810_v12  ;;  %vm1815_vm11 = vcmp.eq.f32.partialorder %v2901_v42, %v1810_v12 }
 0x351   : > { %2590 = vmatpush.msk.msrb.mxu0 %vm1818_vm8, %v2748_v20  ;;  %v4209_v18 = vsel %vm1818_vm8, 1e+30, %v4142_v25  ;;  %v4212_v11 = vsel %vm1817_vm9, 1e+30, %v4102_v13  ;;  %v4217_v15 = vsel %vm1816_vm10, 1e+30, %v4137_v10  ;;  %vm1814_vm12 = vcmp.eq.f32.partialorder %v2899_v40, %v1810_v12 }
 0x352   : > { %v1882_v60 = vsel %vm321_vm2, %v4209_v18, inf  ;;  %v1880_v30 = vsel %vm321_vm2, %v4212_v11, inf  ;;  %v1878_v25 = vsel %vm321_vm2, %v4217_v15, inf  ;;  %v4229_v13 = vsel %vm1815_vm11, 1e+30, %v4134_v16 }
 0x353   : > { %2591 = vmatpush.msk.msrb.mxu0 %vm1817_vm9, %v2748_v20  ;;  %v1876_v10 = vsel %vm321_vm2, %v4229_v13, inf  ;;  %v4237_v61 = vsel %vm1814_vm12, 1e+30, %v4129_v24  ;;  %vm1813_vm13 = vcmp.eq.f32.partialorder %v2897_v39, %v1810_v12  ;;  %vm1812_vm14 = vcmp.eq.f32.partialorder %v2895_v38, %v1810_v12 }
 0x354   : > { %v1875_v21 = vsel %vm321_vm2, %v4237_v61, inf  ;;  %v4246_v16 = vsel %vm1813_vm13, 1e+30, %v4124_v14  ;;  %v4251_v23 = vsel %vm1812_vm14, 1e+30, %v4118_v53  ;;  %vm1811_vm15 = vcmp.eq.f32.partialorder %v2893_v37, %v1810_v12 }
 0x355   : > { %2592 = vmatpush.msk.msrb.mxu0 %vm1816_vm10, %v2748_v20  ;;  %v1883_v24 = vmin.f32 %v1875_v21, %v1882_v60  ;;  %v1874_v35 = vsel %vm321_vm2, %v4246_v16, inf  ;;  %v1873_v28 = vsel %vm321_vm2, %v4251_v23, inf  ;;  %v4264_v14 = vsel %vm1811_vm15, 1e+30, %v4113_v7 }
 0x356   : > { %v1881_v53 = vmin.f32 %v1874_v35, %v1880_v30  ;;  %v1879_v27 = vmin.f32 %v1873_v28, %v1878_v25  ;;  %v1872_v29 = vsel %vm321_vm2, %v4264_v14, inf }
 0x357   : > { %2593 = vmatpush.msk.msrb.mxu0 %vm1815_vm11, %v2748_v20  ;;  %v1877_v47 = vmin.f32 %v1872_v29, %v1876_v10 }
 0x358   : > { %v1885_v32 = vmin.f32 %v1881_v53, %v1883_v24 }
 0x359   : > { %2594 = vmatpush.msk.msrb.mxu0 %vm1814_vm12, %v2748_v20  ;;  %v1884_v50 = vmin.f32 %v1877_v47, %v1879_v27 }
 0x35b   : > { %2595 = vmatpush.msk.msrb.mxu0 %vm1813_vm13, %v2748_v20  ;;  %v1886_v7 = vmin.f32 %v1884_v50, %v1885_v32 }
 0x35d   : > { %2596 = vmatpush.msk.msrb.mxu0 %vm1812_vm14, %v2748_v20  ;;  %v1887_v3 = vrot.slane %v1886_v7, 4 }
 0x35f   : > { %2597 = vmatpush.msk.msrb.mxu0 %vm1811_vm15, %v2748_v20  ;;  %v1888_v51 = vmin.f32 %v1886_v7, %v1887_v3 }
 0x360   : > { %2598 = vmatmul.msk.f32.vlgmr.msrb.gmra.mxu0 %vm321_vm2, %v4175_v33 }
 0x361   : > { %v1889_v36 = vrot.slane %v1888_v51, 2 }
 0x363   : > { %v1890_v46 = vmin.f32 %v1888_v51, %v1889_v36 }
 0x365   : > { %v1891_v54 = vrot.slane %v1890_v46, 1 }
 0x367   : > { %v1892_v49 = vmin.f32 %v1890_v46, %v1891_v54 }
 0x369   : > { %vm1893_vm0 = vcmp.le.f32.partialorder %v4264_v14, %v1892_v49  ;;  %vm1894_vm1 = vcmp.le.f32.partialorder %v4251_v23, %v1892_v49  ;;  %vm1895_vm3 = vcmp.le.f32.partialorder %v4246_v16, %v1892_v49  ;;  %vm1896_vm4 = vcmp.le.f32.partialorder %v4237_v61, %v1892_v49 }
 0x36a   : > { %vm1897_vm5 = vcmp.le.f32.partialorder %v4229_v13, %v1892_v49  ;;  %vm1898_vm6 = vcmp.le.f32.partialorder %v4217_v15, %v1892_v49  ;;  %vm1899_vm7 = vcmp.le.f32.partialorder %v4212_v11, %v1892_v49  ;;  %vm1900_vm8 = vcmp.le.f32.partialorder %v4209_v18, %v1892_v49 }
 0x36b   : > { %v1901_v34 = vsel %vm1893_vm0, %v2893_v37, 64.0  ;;  %v1902_v2 = vsel %vm1894_vm1, %v2895_v38, 64.0  ;;  %v1903_v57 = vsel %vm1895_vm3, %v2897_v39, 64.0  ;;  %v1904_v58 = vsel %vm1896_vm4, %v2899_v40, 64.0 }
 0x36c   : > { %v1905_v56 = vsel %vm1897_vm5, %v2901_v42, 64.0  ;;  %v1906_v31 = vsel %vm1898_vm6, %v2903_v43, 64.0  ;;  %v1907_v48 = vsel %vm1899_vm7, %v2905_v44, 64.0  ;;  %v1908_v4 = vsel %vm1900_vm8, %v2907_v45, 64.0 }
 0x36d   : > { %v1909_v52 = vsel %vm321_vm2, %v1901_v34, inf  ;;  %v1910_v22 = vsel %vm321_vm2, %v1902_v2, inf  ;;  %v1911_v59 = vsel %vm321_vm2, %v1903_v57, inf  ;;  %v1912_v63 = vsel %vm321_vm2, %v1904_v58, inf }
 0x36e   : > { %v1913_v41 = vsel %vm321_vm2, %v1905_v56, inf  ;;  %v1915_v6 = vsel %vm321_vm2, %v1906_v31, inf  ;;  %v1917_v0 = vsel %vm321_vm2, %v1907_v48, inf  ;;  %v1919_v55 = vsel %vm321_vm2, %v1908_v4, inf }
 0x36f   : > { %v1914_v1 = vmin.f32 %v1909_v52, %v1913_v41  ;;  %v1916_v8 = vmin.f32 %v1910_v22, %v1915_v6  ;;  %v1918_v9 = vmin.f32 %v1911_v59, %v1917_v0  ;;  %v1920_v5 = vmin.f32 %v1912_v63, %v1919_v55 }
 0x371   : > { %v1921_v26 = vmin.f32 %v1914_v1, %v1916_v8  ;;  %v1922_v19 = vmin.f32 %v1918_v9, %v1920_v5 }
 0x373   : > { %v1923_v62 = vmin.f32 %v1921_v26, %v1922_v19 }
 0x375   : > { %v1924_v17 = vrot.slane %v1923_v62, 4 }
 0x377   : > { %v1925_v12 = vmin.f32 %v1923_v62, %v1924_v17 }
 0x379   : > { %v1926_v60 = vrot.slane %v1925_v12, 2 }
 0x37b   : > { %v1927_v30 = vmin.f32 %v1925_v12, %v1926_v60 }
 0x37d   : > { %v1928_v25 = vrot.slane %v1927_v30, 1 }
 0x37f   : > { %v1929_v10 = vmin.f32 %v1927_v30, %v1928_v25 }
 0x381   : > { %vm1937_vm9 = vcmp.eq.f32.partialorder %v2907_v45, %v1929_v10  ;;  %vm1936_vm10 = vcmp.eq.f32.partialorder %v2905_v44, %v1929_v10  ;;  %vm1930_vm11 = vcmp.eq.f32.partialorder %v2893_v37, %v1929_v10  ;;  %vm1931_vm12 = vcmp.eq.f32.partialorder %v2895_v38, %v1929_v10 }
 0x382   : > { %v4315_v21 = vsel %vm1937_vm9, 1e+30, %v4209_v18  ;;  %2607 = vmatpush.msk.msra.mxu1 %vm1937_vm9, %v2748_v20  ;;  %v4319_v24 = vsel %vm1936_vm10, 1e+30, %v4212_v11  ;;  %vm1932_vm13 = vcmp.eq.f32.partialorder %v2897_v39, %v1929_v10  ;;  %vm1933_vm14 = vcmp.eq.f32.partialorder %v2899_v40, %v1929_v10 }
 0x383   : > { %v2001_v35 = vsel %vm321_vm2, %v4315_v21, inf  ;;  %v1999_v28 = vsel %vm321_vm2, %v4319_v24, inf  ;;  %vm1934_vm15 = vcmp.eq.f32.partialorder %v2901_v42, %v1929_v10  ;;  %vm1935_vm0 = vcmp.eq.f32.partialorder %v2903_v43, %v1929_v10 }
 0x384   : > { %2608 = vmatpush.msk.msra.mxu1 %vm1936_vm10, %v2748_v20  ;;  %v4333_v18 = vsel %vm1930_vm11, 1e+30, %v4264_v14  ;;  %v4338_v11 = vsel %vm1931_vm12, 1e+30, %v4251_v23  ;;  %v4343_v53 = vsel %vm1932_vm13, 1e+30, %v4246_v16 }
 0x385   : > { %v4348_v27 = vsel %vm1933_vm14, 1e+30, %v4237_v61  ;;  %v4353_v14 = vsel %vm1934_vm15, 1e+30, %v4229_v13  ;;  %v4356_v29 = vsel %vm1935_vm0, 1e+30, %v4217_v15 }
 0x386   : > { %2609 = vmatpush.msk.msra.mxu1 %vm1935_vm0, %v2748_v20  ;;  %v1991_v23 = vsel %vm321_vm2, %v4333_v18, inf  ;;  %v1992_v16 = vsel %vm321_vm2, %v4338_v11, inf  ;;  %v1993_v61 = vsel %vm321_vm2, %v4343_v53, inf  ;;  %v1994_v47 = vsel %vm321_vm2, %v4348_v27, inf }
 0x387   : > { %v1995_v13 = vsel %vm321_vm2, %v4353_v14, inf  ;;  %v1997_v15 = vsel %vm321_vm2, %v4356_v29, inf  ;;  %v2000_v32 = vmin.f32 %v1993_v61, %v1999_v28  ;;  %v2002_v50 = vmin.f32 %v1994_v47, %v2001_v35 }
 0x388   : > { %v1996_v7 = vmin.f32 %v1991_v23, %v1995_v13  ;;  %v1998_v3 = vmin.f32 %v1992_v16, %v1997_v15  ;;  %2610 = vmatpush.msk.msra.mxu1 %vm1934_vm15, %v2748_v20 }
 0x389   : > { %v2004_v51 = vmin.f32 %v2000_v32, %v2002_v50 }
 0x38a   : > { %v2003_v36 = vmin.f32 %v1996_v7, %v1998_v3  ;;  %2611 = vmatpush.msk.msra.mxu1 %vm1933_vm14, %v2748_v20 }
 0x38c   : > { %v2005_v46 = vmin.f32 %v2003_v36, %v2004_v51  ;;  %2612 = vmatpush.msk.msra.mxu1 %vm1932_vm13, %v2748_v20 }
 0x38e   : > { %v2006_v54 = vrot.slane %v2005_v46, 4  ;;  %2613 = vmatpush.msk.msra.mxu1 %vm1931_vm12, %v2748_v20 }
 0x390   : > { %v2007_v49 = vmin.f32 %v2005_v46, %v2006_v54  ;;  %2614 = vmatpush.msk.msra.mxu1 %vm1930_vm11, %v2748_v20 }
 0x391   : > { %2615 = vmatmul.msk.f32.vlgmr.msra.gmra.mxu1 %vm321_vm2, %v4175_v33 }
 0x392   : > { %v2008_v34 = vrot.slane %v2007_v49, 2 }
 0x394   : > { %v2009_v2 = vmin.f32 %v2007_v49, %v2008_v34 }
 0x396   : > { %v2010_v57 = vrot.slane %v2009_v2, 1 }
 0x398   : > { %v2011_v58 = vmin.f32 %v2009_v2, %v2010_v57 }
 0x39a   : > { %vm2017_vm1 = vcmp.le.f32.partialorder %v4356_v29, %v2011_v58  ;;  %vm2018_vm3 = vcmp.le.f32.partialorder %v4319_v24, %v2011_v58  ;;  %vm2019_vm4 = vcmp.le.f32.partialorder %v4315_v21, %v2011_v58  ;;  %vm2016_vm5 = vcmp.le.f32.partialorder %v4353_v14, %v2011_v58 }
 0x39b   : > { %v2025_v56 = vsel %vm2017_vm1, %v2903_v43, 64.0  ;;  %v2024_v31 = vsel %vm2016_vm5, %v2901_v42, 64.0  ;;  %vm2015_vm6 = vcmp.le.f32.partialorder %v4348_v27, %v2011_v58  ;;  %vm2012_vm7 = vcmp.le.f32.partialorder %v4333_v18, %v2011_v58 }
 0x39c   : > { %v2034_v48 = vsel %vm321_vm2, %v2025_v56, inf  ;;  %v2032_v4 = vsel %vm321_vm2, %v2024_v31, inf  ;;  %v2023_v52 = vsel %vm2015_vm6, %v2899_v40, 64.0  ;;  %vm2013_vm8 = vcmp.le.f32.partialorder %v4338_v11, %v2011_v58 }
 0x39d   : > { %v2031_v22 = vsel %vm321_vm2, %v2023_v52, inf  ;;  %vm2014_vm9 = vcmp.le.f32.partialorder %v4343_v53, %v2011_v58  ;;  %v2020_v59 = vsel %vm2012_vm7, %v2893_v37, 64.0  ;;  %v2021_v63 = vsel %vm2013_vm8, %v2895_v38, 64.0 }
 0x39e   : > { %v2022_v41 = vsel %vm2014_vm9, %v2897_v39, 64.0  ;;  %v2026_v6 = vsel %vm2018_vm3, %v2905_v44, 64.0  ;;  %v2027_v0 = vsel %vm2019_vm4, %v2907_v45, 64.0  ;;  %v2028_v55 = vsel %vm321_vm2, %v2020_v59, inf }
 0x39f   : > { %v2029_v1 = vsel %vm321_vm2, %v2021_v63, inf  ;;  %v2030_v8 = vsel %vm321_vm2, %v2022_v41, inf  ;;  %v2033_v9 = vmin.f32 %v2028_v55, %v2032_v4  ;;  %v2036_v5 = vsel %vm321_vm2, %v2026_v6, inf }
 0x3a0   : > { %v2035_v26 = vmin.f32 %v2029_v1, %v2034_v48  ;;  %v2037_v19 = vmin.f32 %v2030_v8, %v2036_v5  ;;  %v2038_v62 = vsel %vm321_vm2, %v2027_v0, inf }
 0x3a1   : > { %v2039_v17 = vmin.f32 %v2031_v22, %v2038_v62 }
 0x3a2   : > { %v2040_v12 = vmin.f32 %v2033_v9, %v2035_v26 }
 0x3a3   : > { %v2041_v60 = vmin.f32 %v2037_v19, %v2039_v17 }
 0x3a5   : > { %v2042_v30 = vmin.f32 %v2040_v12, %v2041_v60 }
 0x3a7   : > { %v2043_v25 = vrot.slane %v2042_v30, 4 }
 0x3a9   : > { %v2044_v10 = vmin.f32 %v2042_v30, %v2043_v25 }
 0x3ab   : > { %v2045_v35 = vrot.slane %v2044_v10, 2 }
 0x3ad   : > { %v2046_v28 = vmin.f32 %v2044_v10, %v2045_v35 }
 0x3af   : > { %v2047_v23 = vrot.slane %v2046_v28, 1 }
 0x3b1   : > { %v2048_v16 = vmin.f32 %v2046_v28, %v2047_v23  ;;  %v423_v28 = vpop.f32.mrf.mxu1  ;;  %v543_v23 = vpop.f32.mrf.mxu2 }
 0x3b3   : > { %vm2056_vm10 = vcmp.eq.f32.partialorder %v2907_v45, %v2048_v16  ;;  %vm2055_vm11 = vcmp.eq.f32.partialorder %v2905_v44, %v2048_v16  ;;  %vm2049_vm12 = vcmp.eq.f32.partialorder %v2893_v37, %v2048_v16  ;;  %vm2050_vm13 = vcmp.eq.f32.partialorder %v2895_v38, %v2048_v16 }
 0x3b4   : > { %2624 = vmatpush.msk.msra.mxu2 %vm2056_vm10, %v2748_v20  ;;  %v2109_v61 = vsel %vm2056_vm10, 1e+30, %v4315_v21  ;;  %v2108_v47 = vsel %vm2055_vm11, 1e+30, %v4319_v24  ;;  %vm2051_vm14 = vcmp.eq.f32.partialorder %v2897_v39, %v2048_v16  ;;  %vm2052_vm15 = vcmp.eq.f32.partialorder %v2899_v40, %v2048_v16 }
 0x3b5   : > { %v2118_v13 = vsel %vm321_vm2, %v2108_v47, inf  ;;  %vm2053_vm0 = vcmp.eq.f32.partialorder %v2901_v42, %v2048_v16  ;;  %vm2054_vm1 = vcmp.eq.f32.partialorder %v2903_v43, %v2048_v16  ;;  %v2102_v15 = vsel %vm2049_vm12, 1e+30, %v4333_v18 }
 0x3b6   : > { %2625 = vmatpush.msk.msra.mxu2 %vm2055_vm11, %v2748_v20  ;;  %v2103_v21 = vsel %vm2050_vm13, 1e+30, %v4338_v11  ;;  %v2104_v24 = vsel %vm2051_vm14, 1e+30, %v4343_v53  ;;  %v2105_v32 = vsel %vm2052_vm15, 1e+30, %v4348_v27 }
 0x3b7   : > { %v2106_v50 = vsel %vm2053_vm0, 1e+30, %v4353_v14  ;;  %v2107_v18 = vsel %vm2054_vm1, 1e+30, %v4356_v29  ;;  %v2110_v7 = vsel %vm321_vm2, %v2102_v15, inf  ;;  %v2111_v3 = vsel %vm321_vm2, %v2103_v21, inf }
 0x3b8   : > { %2626 = vmatpush.msk.msra.mxu2 %vm2054_vm1, %v2748_v20  ;;  %v2112_v11 = vsel %vm321_vm2, %v2104_v24, inf  ;;  %v2113_v53 = vsel %vm321_vm2, %v2105_v32, inf  ;;  %v2114_v51 = vsel %vm321_vm2, %v2106_v50, inf  ;;  %v2116_v27 = vsel %vm321_vm2, %v2107_v18, inf }
 0x3b9   : > { %v2115_v36 = vmin.f32 %v2110_v7, %v2114_v51  ;;  %v2117_v46 = vmin.f32 %v2111_v3, %v2116_v27  ;;  %v2119_v54 = vmin.f32 %v2112_v11, %v2118_v13  ;;  %v2120_v14 = vsel %vm321_vm2, %v2109_v61, inf  ;;  %v662_v13 = vpop.f32.mrf.mxu3  ;;  %v900_v51 = vpop.f32.mrf.mxu2 }
 0x3ba   : > { %v2121_v29 = vmin.f32 %v2113_v53, %v2120_v14  ;;  %2627 = vmatpush.msk.msra.mxu2 %vm2053_vm0, %v2748_v20  ;;  %vm431_vm11 = vcmask 516096   ;;  %v427_v16 = vrot.slane %v423_v28, 1  ;;  %v667_v7 = vrot.slane %v662_v13, 2  ;;  %v781_v53 = vpop.f32.mrf.mxu1 }
 0x3bb   : > { %v2122_v49 = vmin.f32 %v2115_v36, %v2117_v46  ;;  %432 = vst.msk [vmem:[%s4488_s4] sm:$0x1] %vm431_vm11, %v423_v28  ;;  %v785_v27 = vrot.slane %v781_v53, 1  ;;  %v786_v36 = vrot.slane %v781_v53, 2 }
 0x3bc   : > { %v2123_v34 = vmin.f32 %v2119_v54, %v2121_v29  ;;  %2628 = vmatpush.msk.msra.mxu2 %vm2052_vm15, %v2748_v20  ;;  %551 = vst.msk [vmem:[%s4488_s4 + $0x1] sm:$0x1] %vm431_vm11, %v543_v23  ;;  %v904_v29 = vrot.slane %v900_v51, 1 }
 0x3bd   : > { %433 = vst.msk [vmem:[%s4488_s4 + $0x10] sm:$0x1] %vm431_vm11, %v427_v16 }
 0x3be   : > { %v2124_v2 = vmin.f32 %v2122_v49, %v2123_v34  ;;  %2629 = vmatpush.msk.msra.mxu2 %vm2051_vm14, %v2748_v20  ;;  %670 = vst.msk [vmem:[%s4488_s4 + $0x2] sm:$0x1] %vm431_vm11, %v662_v13  ;;  %v905_v49 = vrot.slane %v900_v51, 2 }
 0x3bf   : > { %672 = vst.msk [vmem:[%s4488_s4 + $0x22] sm:$0x1] %vm431_vm11, %v667_v7 }
 0x3c0   : > { %v2125_v57 = vrot.slane %v2124_v2, 4  ;;  %2630 = vmatpush.msk.msra.mxu2 %vm2050_vm13, %v2748_v20  ;;  %789 = vst.msk [vmem:[%s4488_s4 + $0x3] sm:$0x1] %vm431_vm11, %v781_v53 }
 0x3c1   : > { %v1019_v54 = vpop.f32.mrf.mxu3  ;;  %790 = vst.msk [vmem:[%s4488_s4 + $0x13] sm:$0x1] %vm431_vm11, %v785_v27 }
 0x3c2   : > { %v2126_v58 = vmin.f32 %v2124_v2, %v2125_v57  ;;  %2631 = vmatpush.msk.msra.mxu2 %vm2049_vm12, %v2748_v20  ;;  %791 = vst.msk [vmem:[%s4488_s4 + $0x23] sm:$0x1] %vm431_vm11, %v786_v36 }
 0x3c3   : > { %2632 = vmatmul.msk.f32.vlgmr.msra.gmra.mxu2 %vm321_vm2, %v4175_v33  ;;  %908 = vst.msk [vmem:[%s4488_s4 + $0x4] sm:$0x1] %vm431_vm11, %v900_v51 }
 0x3c4   : > { %v2127_v56 = vrot.slane %v2126_v58, 2  ;;  %909 = vst.msk [vmem:[%s4488_s4 + $0x14] sm:$0x1] %vm431_vm11, %v904_v29 }
 0x3c5   : > { %910 = vst.msk [vmem:[%s4488_s4 + $0x24] sm:$0x1] %vm431_vm11, %v905_v49 }
 0x3c6   : > { %v2128_v31 = vmin.f32 %v2126_v58, %v2127_v56  ;;  %v1023_v56 = vrot.slane %v1019_v54, 1  ;;  %1027 = vst.msk [vmem:[%s4488_s4 + $0x5] sm:$0x1] %vm431_vm11, %v1019_v54 }
 0x3c8   : > { %v2129_v48 = vrot.slane %v2128_v31, 1  ;;  %1028 = vst.msk [vmem:[%s4488_s4 + $0x15] sm:$0x1] %vm431_vm11, %v1023_v56 }
 0x3ca   : > { %v2130_v4 = vmin.f32 %v2128_v31, %v2129_v48  ;;  %v1024_v31 = vrot.slane %v1019_v54, 2  ;;  %v1138_v48 = vpop.f32.mrf.mxu1 }
 0x3cb   : > { %1146 = vst.msk [vmem:[%s4488_s4 + $0x6] sm:$0x1] %vm431_vm11, %v1138_v48 }
 0x3cc   : > { %vm2136_vm3 = vcmp.le.f32.partialorder %v2107_v18, %v2130_v4  ;;  %vm2137_vm4 = vcmp.le.f32.partialorder %v2108_v47, %v2130_v4  ;;  %vm2138_vm5 = vcmp.le.f32.partialorder %v2109_v61, %v2130_v4  ;;  %vm2135_vm6 = vcmp.le.f32.partialorder %v2106_v50, %v2130_v4  ;;  %1029 = vst.msk [vmem:[%s4488_s4 + $0x25] sm:$0x1] %vm431_vm11, %v1024_v31 }
 0x3cd   : > { %v2144_v52 = vsel %vm2136_vm3, %v2903_v43, 64.0  ;;  %v2145_v22 = vsel %vm2137_vm4, %v2905_v44, 64.0  ;;  %v2143_v59 = vsel %vm2135_vm6, %v2901_v42, 64.0  ;;  %vm2134_vm7 = vcmp.le.f32.partialorder %v2105_v32, %v2130_v4 }
 0x3ce   : > { %v2153_v63 = vsel %vm321_vm2, %v2144_v52, inf  ;;  %v2151_v41 = vsel %vm321_vm2, %v2143_v59, inf  ;;  %v2142_v6 = vsel %vm2134_vm7, %v2899_v40, 64.0  ;;  %v2146_v0 = vsel %vm2138_vm5, %v2907_v45, 64.0  ;;  %v1376_v52 = vpop.f32.mrf.mxu3 }
 0x3cf   : > { %v2150_v55 = vsel %vm321_vm2, %v2142_v6, inf  ;;  %v2157_v1 = vsel %vm321_vm2, %v2146_v0, inf  ;;  %vm2131_vm8 = vcmp.le.f32.partialorder %v2102_v15, %v2130_v4  ;;  %vm2132_vm9 = vcmp.le.f32.partialorder %v2103_v21, %v2130_v4  ;;  %1384 = vst.msk [vmem:[%s4488_s4 + $0x8] sm:$0x1] %vm431_vm11, %v1376_v52 }
 0x3d0   : > { %v2158_v8 = vmin.f32 %v2150_v55, %v2157_v1  ;;  %vm2133_vm10 = vcmp.le.f32.partialorder %v2104_v24, %v2130_v4  ;;  %v2139_v9 = vsel %vm2131_vm8, %v2893_v37, 64.0  ;;  %v2140_v5 = vsel %vm2132_vm9, %v2895_v38, 64.0  ;;  %v1257_v4 = vpop.f32.mrf.mxu2 }
 0x3d1   : > { %v2141_v26 = vsel %vm2133_vm10, %v2897_v39, 64.0  ;;  %v2147_v19 = vsel %vm321_vm2, %v2139_v9, inf  ;;  %v2148_v62 = vsel %vm321_vm2, %v2140_v5, inf  ;;  %v2155_v17 = vsel %vm321_vm2, %v2145_v22, inf  ;;  %1265 = vst.msk [vmem:[%s4488_s4 + $0x7] sm:$0x1] %vm431_vm11, %v1257_v4 }
 0x3d2   : > { %v2149_v12 = vsel %vm321_vm2, %v2141_v26, inf  ;;  %v2152_v60 = vmin.f32 %v2147_v19, %v2151_v41  ;;  %v2154_v30 = vmin.f32 %v2148_v62, %v2153_v63  ;;  %v428_v61 = vrot.slane %v423_v28, 2  ;;  %v1495_v55 = vpop.f32.mrf.mxu1 }
 0x3d3   : > { %v2156_v25 = vmin.f32 %v2149_v12, %v2155_v17  ;;  %v547_v47 = vrot.slane %v543_v23, 1  ;;  %v548_v21 = vrot.slane %v543_v23, 2  ;;  %v554_v24 = vadd.f32 %v543_v23, %v423_v28  ;;  %1503 = vst.msk [vmem:[%s4488_s4 + $0x9] sm:$0x1] %vm431_vm11, %v1495_v55 }
 0x3d4   : > { %v2159_v10 = vmin.f32 %v2152_v60, %v2154_v30  ;;  %434 = vst.msk [vmem:[%s4488_s4 + $0x20] sm:$0x1] %vm431_vm11, %v428_v61  ;;  %v666_v50 = vrot.slane %v662_v13, 1  ;;  %v1142_v22 = vrot.slane %v1138_v48, 1  ;;  %v1143_v59 = vrot.slane %v1138_v48, 2 }
 0x3d5   : > { %v2160_v35 = vmin.f32 %v2156_v25, %v2158_v8  ;;  %v673_v18 = vadd.f32 %v662_v13, %v554_v24  ;;  %552 = vst.msk [vmem:[%s4488_s4 + $0x11] sm:$0x1] %vm431_vm11, %v547_v47  ;;  %v1381_v0 = vrot.slane %v1376_v52, 2  ;;  %v1499_v8 = vrot.slane %v1495_v55, 1 }
 0x3d6   : > { %553 = vst.msk [vmem:[%s4488_s4 + $0x21] sm:$0x1] %vm431_vm11, %v548_v21  ;;  %v1733_v9 = vpop.f32.mrf.mxu3 }
 0x3d7   : > { %v2161_v15 = vmin.f32 %v2159_v10, %v2160_v35  ;;  %671 = vst.msk [vmem:[%s4488_s4 + $0x12] sm:$0x1] %vm431_vm11, %v666_v50  ;;  %v792_v46 = vadd.f32 %v781_v53, %v673_v18  ;;  %v1737_v17 = vrot.slane %v1733_v9, 1 }
 0x3d8   : > { %1147 = vst.msk [vmem:[%s4488_s4 + $0x16] sm:$0x1] %vm431_vm11, %v1142_v22  ;;  %v1614_v1 = vpop.f32.mrf.mxu2  ;;  %v2222_v50 = vld [vmem:[%s4488_s4] sm:$0xff] }
 0x3d9   : > { %v2162_v32 = vrot.slane %v2161_v15, 4  ;;  %v911_v34 = vadd.f32 %v900_v51, %v792_v46  ;;  %1148 = vst.msk [vmem:[%s4488_s4 + $0x26] sm:$0x1] %vm431_vm11, %v1143_v59 }
 0x3da   : > { %1386 = vst.msk [vmem:[%s4488_s4 + $0x28] sm:$0x1] %vm431_vm11, %v1381_v0 }
 0x3db   : > { %v2163_v3 = vmin.f32 %v2161_v15, %v2162_v32  ;;  %v1030_v57 = vadd.f32 %v1019_v54, %v911_v34  ;;  %1504 = vst.msk [vmem:[%s4488_s4 + $0x19] sm:$0x1] %vm431_vm11, %v1499_v8 }
 0x3dc   : > { %1622 = vst.msk [vmem:[%s4488_s4 + $0xa] sm:$0x1] %vm431_vm11, %v1614_v1 }
 0x3dd   : > { %v2164_v11 = vrot.slane %v2163_v3, 2  ;;  %v1149_v63 = vadd.f32 %v1138_v48, %v1030_v57  ;;  %v1852_v26 = vpop.f32.mrf.mxu0  ;;  %1741 = vst.msk [vmem:[%s4488_s4 + $0xb] sm:$0x1] %vm431_vm11, %v1733_v9 }
 0x3de   : > { %1742 = vst.msk [vmem:[%s4488_s4 + $0x1b] sm:$0x1] %vm431_vm11, %v1737_v17  ;;  %v1857_v12 = vrot.slane %v1852_v26, 2 }
 0x3df   : > { %v2165_v14 = vmin.f32 %v2163_v3, %v2164_v11  ;;  %v1268_v41 = vadd.f32 %v1257_v4, %v1149_v63  ;;  %1860 = vst.msk [vmem:[%s4488_s4 + $0xc] sm:$0x1] %vm431_vm11, %v1852_v26 }
 0x3e0   : > { %1862 = vst.msk [vmem:[%s4488_s4 + $0x2c] sm:$0x1] %vm431_vm11, %v1857_v12 }
 0x3e1   : > { %v2166_v2 = vrot.slane %v2165_v14, 1  ;;  %v1387_v6 = vadd.f32 %v1376_v52, %v1268_v41 }
 0x3e3   : > { %v2167_v58 = vmin.f32 %v2165_v14, %v2166_v2 }
 0x3e5   : > { %vm2175_vm12 = vcmp.eq.f32.partialorder %v2907_v45, %v2167_v58  ;;  %vm2174_vm13 = vcmp.eq.f32.partialorder %v2905_v44, %v2167_v58  ;;  %vm2173_vm14 = vcmp.eq.f32.partialorder %v2903_v43, %v2167_v58  ;;  %v1261_v45 = vrot.slane %v1257_v4, 1 }
 0x3e6   : > { %2641 = vmatpush.msk.msra.mxu3 %vm2175_vm12, %v2748_v20  ;;  %v1262_v44 = vrot.slane %v1257_v4, 2  ;;  %vm2172_vm15 = vcmp.eq.f32.partialorder %v2901_v42, %v2167_v58  ;;  %v1380_v43 = vrot.slane %v1376_v52, 1  ;;  %vm2171_vm0 = vcmp.eq.f32.partialorder %v2899_v40, %v2167_v58 }
 0x3e7   : > { %1266 = vst.msk [vmem:[%s4488_s4 + $0x17] sm:$0x1] %vm431_vm11, %v1261_v45  ;;  %v1506_v42 = vadd.f32 %v1495_v55, %v1387_v6  ;;  %vm2170_vm1 = vcmp.eq.f32.partialorder %v2897_v39, %v2167_v58  ;;  %v1500_v40 = vrot.slane %v1495_v55, 2  ;;  %vm2169_vm3 = vcmp.eq.f32.partialorder %v2895_v38, %v2167_v58 }
 0x3e8   : > { %2642 = vmatpush.msk.msra.mxu3 %vm2174_vm13, %v2748_v20  ;;  %1267 = vst.msk [vmem:[%s4488_s4 + $0x27] sm:$0x1] %vm431_vm11, %v1262_v44  ;;  %v1618_v39 = vrot.slane %v1614_v1, 1  ;;  %vm2168_vm4 = vcmp.eq.f32.partialorder %v2893_v37, %v2167_v58  ;;  %v1619_v38 = vrot.slane %v1614_v1, 2  ;;  %v1738_v37 = vrot.slane %v1733_v9, 2 }
 0x3e9   : > { %1385 = vst.msk [vmem:[%s4488_s4 + $0x18] sm:$0x1] %vm431_vm11, %v1380_v43  ;;  %v1625_v5 = vadd.f32 %v1614_v1, %v1506_v42 }
 0x3ea   : > { %2643 = vmatpush.msk.msra.mxu3 %vm2173_vm14, %v2748_v20  ;;  %1505 = vst.msk [vmem:[%s4488_s4 + $0x29] sm:$0x1] %vm431_vm11, %v1500_v40 }
 0x3eb   : > { %v1744_v19 = vadd.f32 %v1733_v9, %v1625_v5  ;;  %1623 = vst.msk [vmem:[%s4488_s4 + $0x1a] sm:$0x1] %vm431_vm11, %v1618_v39 }
 0x3ec   : > { %2644 = vmatpush.msk.msra.mxu3 %vm2172_vm15, %v2748_v20  ;;  %1624 = vst.msk [vmem:[%s4488_s4 + $0x2a] sm:$0x1] %vm431_vm11, %v1619_v38 }
 0x3ed   : > { %v1863_v62 = vadd.f32 %v1852_v26, %v1744_v19  ;;  %1743 = vst.msk [vmem:[%s4488_s4 + $0x2b] sm:$0x1] %vm431_vm11, %v1738_v37 }
 0x3ee   : > { %2645 = vmatpush.msk.msra.mxu3 %vm2171_vm0, %v2748_v20  ;;  %v2224_v53 = vld [vmem:[%s4488_s4 + $0x10] sm:$0xff] }
 0x3ef   : > { %v2226_v51 = vld [vmem:[%s4488_s4 + $0x20] sm:$0xff] }
 0x3f0   : > { %2646 = vmatpush.msk.msra.mxu3 %vm2170_vm1, %v2748_v20 }
 0x3f2   : > { %2647 = vmatpush.msk.msra.mxu3 %vm2169_vm3, %v2748_v20 }
 0x3f4   : > { %2648 = vmatpush.msk.msra.mxu3 %vm2168_vm4, %v2748_v20  ;;  %v1856_v20 = vrot.slane %v1852_v26, 1 }
 0x3f5   : > { %2649 = vmatmul.msk.f32.vlgmr.msra.gmra.mxu3 %vm321_vm2, %v4175_v33 }
 0x3f6   : > { %1861 = vst.msk [vmem:[%s4488_s4 + $0x1c] sm:$0x1] %vm431_vm11, %v1856_v20 }
 0x40e   : > { %v1971_v33 = vpop.f32.mrf.mxu1 }
 0x40f   : > { %v1975_v60 = vrot.slane %v1971_v33, 1  ;;  %v1976_v30 = vrot.slane %v1971_v33, 2  ;;  %1979 = vst.msk [vmem:[%s4488_s4 + $0xd] sm:$0x1] %vm431_vm11, %v1971_v33  ;;  %v1982_v25 = vadd.f32 %v1971_v33, %v1863_v62 }
 0x411   : > { %1980 = vst.msk [vmem:[%s4488_s4 + $0x1d] sm:$0x1] %vm431_vm11, %v1975_v60 }
 0x412   : > { %1981 = vst.msk [vmem:[%s4488_s4 + $0x2d] sm:$0x1] %vm431_vm11, %v1976_v30 }
 0x446   : > { %v2090_v10 = vpop.f32.mrf.mxu2 }
 0x447   : > { %v2094_v35 = vrot.slane %v2090_v10, 1  ;;  %v2095_v28 = vrot.slane %v2090_v10, 2  ;;  %2098 = vst.msk [vmem:[%s4488_s4 + $0xe] sm:$0x1] %vm431_vm11, %v2090_v10  ;;  %v2101_v23 = vadd.f32 %v2090_v10, %v1982_v25 }
 0x449   : > { %2099 = vst.msk [vmem:[%s4488_s4 + $0x1e] sm:$0x1] %vm431_vm11, %v2094_v35 }
 0x44a   : > { %2100 = vst.msk [vmem:[%s4488_s4 + $0x2e] sm:$0x1] %vm431_vm11, %v2095_v28 }
 0x478   : > { %v2209_v16 = vpop.f32.mrf.mxu3 }
 0x479   : > { %v2213_v61 = vrot.slane %v2209_v16, 1  ;;  %v2214_v47 = vrot.slane %v2209_v16, 2  ;;  %2217 = vst.msk [vmem:[%s4488_s4 + $0xf] sm:$0x1] %vm431_vm11, %v2209_v16  ;;  %v2220_v13 = vadd.f32 %v2209_v16, %v2101_v23 }
 0x47b   : > { %2218 = vst.msk [vmem:[%s4488_s4 + $0x1f] sm:$0x1] %vm431_vm11, %v2213_v61  ;;  %v2221_v15 = vmul.f32 0.0625, %v2220_v13 }
 0x47c   : > { %2219 = vst.msk [vmem:[%s4488_s4 + $0x2f] sm:$0x1] %vm431_vm11, %v2214_v47 }
 0x47d   : > { %v2229_v21 = vrot.slane %v2221_v15, 1  ;;  %v2230_v24 = vrot.slane %v2221_v15, 2  ;;  %v2231_v32 = vperm.slane %v2221_v15, 0 }
 0x47f   : > { %v2232_v18 = vperm.slane %v2229_v21, 0  ;;  %v2233_v7 = vperm.slane %v2230_v24, 0  ;;  %v2237_v3 = vsub.f32 %v2222_v50, %v2231_v32 }
 0x480   : > { %v2223_v11 = vld [vmem:[%s4488_s4 + $0x8] sm:$0xff] }
 0x481   : > { %v2238_v27 = vsub.f32 %v2223_v11, %v2231_v32  ;;  %v2239_v36 = vsub.f32 %v2224_v53, %v2232_v18  ;;  %2243 = vst.msk [vmem:[%s4488_s4] sm:$0xff] %vm321_vm2, %v2237_v3  ;;  %v2241_v54 = vsub.f32 %v2226_v51, %v2233_v7 }
 0x482   : > { %v2225_v46 = vld [vmem:[%s4488_s4 + $0x18] sm:$0xff] }
 0x483   : > { %v2227_v14 = vld [vmem:[%s4488_s4 + $0x28] sm:$0xff]  ;;  %v2240_v29 = vsub.f32 %v2225_v46, %v2232_v18  ;;  %2244 = vst.msk [vmem:[%s4488_s4 + $0x8] sm:$0xff] %vm321_vm2, %v2238_v27 }
 0x484   : > { %v2242_v49 = vsub.f32 %v2227_v14, %v2233_v7  ;;  %2245 = vst.msk [vmem:[%s4488_s4 + $0x10] sm:$0xff] %vm321_vm2, %v2239_v36 }
 0x485   : > { %2246 = vst.msk [vmem:[%s4488_s4 + $0x18] sm:$0xff] %vm321_vm2, %v2240_v29 }
 0x486   : > { %2247 = vst.msk [vmem:[%s4488_s4 + $0x20] sm:$0xff] %vm321_vm2, %v2241_v54 }
 0x487   : > { %2248 = vst.msk [vmem:[%s4488_s4 + $0x28] sm:$0xff] %vm321_vm2, %v2242_v49 }
 0x488   : > { %s2655_s6 = sshll.u32 %s2792_s13, 4  ;;  %s2272_s7 = sshll.u32 %s4488_s4, 4  ;;  %s2273_s7 = int_to_ptr.vmem [resolvable:$true] %s2272_s7 }
 0x489   : > { %s2261_s16 = scalar_lea.hbm %s4662_s2, %s2655_s6  ;;  %s2749_s21 = smov 256  }
 0x48a   : > { %s2274_s17 = sshll.u32 %s2261_s16, 4  ;;  %2657 = sst [smem:[#allocation5]] (%p2809_p5), %s2749_s21  ;;  %s2275_s17 = int_to_ptr.hbm [resolvable:$true] %s2274_s17 }
 0x48b   : > { %s2750_s22 = smov 512   ;;  %s2751_s23 = smov 2  }
 0x48c   : > { %2658 = sst [smem:[#allocation5 + $0x1]] (%p2809_p5), %s2750_s22  ;;  %s2752_s13 = smov 128  }
 0x48d   : > { %2659 = sst [smem:[#allocation5 + $0x2]] (%p2809_p5), %s2751_s23  ;;  %s2753_s24 = smov 8  }
 0x48e   : > { %2660 = sst [smem:[#allocation5 + $0x3]] (%p2809_p5), %s2752_s13  ;;  %s2754_s25 = smov [#allocation4]  }
 0x48f   : > { %2661 = sst [smem:[#allocation5 + $0x4]] (%p2809_p5), %s2752_s13  ;;  %s2755_s26 = smov 0  }
 0x490   : > { %2662 = sst [smem:[#allocation5 + $0x5]] (%p2809_p5), %s2753_s24 }
 0x491   : > { %2663 = dma.general (%p2809_p5), %s2273_s7, 768, %s2275_s17, %s2250_s5, %s2754_s25, [#allocation5], %s2755_s26, 0  }
 0x492 PF: > { %p2669_p11 = scmp.ge.s32.totalorder %s2746_s12, 2  ;;  %s2302_s27 = sand.u32 1, %s2734_s9  }
 0x493   : > { %s2303_s28 = scalar_lea.sflag [#allocation3], %s2302_s27 }
 0x494   : > { %p2666_p12 = pnand %p2669_p11, %p2813_p6 }
 0x496   : > { %p2667_p13 = pneg %p2666_p12 }
 0x498   : > { %2729 = dma.done.wait (%p2667_p13), %s2303_s28, 768  }
 0x499   : > { %2731 = vsyncadd (%p2667_p13), %s2303_s28, 4294966528  ;;  %p12_p0 = scmp.ge.s32.totalorder %s2796_s15, 4   ;;  %s4665_s9 = smov %s2738_s10 }
 0x49a   : > { %s4666_s10 = smov %s2742_s11  ;;  %s4667_s11 = smov %s2807_s18 }
 0x49b   : > { %s4668_s12 = smov %s2796_s15  ;;  %14 = sbr.rel (!%p12_p0) target bundleno = 3 (0x3), region = 71 }
 0x4a0   :  { %2309 = vsyncpa [#allocation3], 1 }
 0x4a1   :  { %2311 = vsyncpa [#allocation3 + $0x1], 1 }

</bundles_post_ra>
